<compile_context>
chip_gen: v7x
topology: tpu7x:2x2x1
jax: 0.10.0
libtpu: 0.0.40
codegen_flags: <defaults>
</compile_context>

<pallas_src>
import functools

import jax
import jax.numpy as jnp
from jax.experimental import pallas as pl
from jax.experimental.pallas import tpu as pltpu


def _pe_kernel(freq_ref, x_ref, o_ref, *, num_freqs):
    """NeRF positional encoding for one tile of rows.

    freq_ref: VMEM (1, num_freqs*in_features) f32 — 2**linspace(0, max_freq)
              frequencies repeated per feature (frequency-major / feature-minor),
              broadcast over rows.  Constant block index -> fetched once.
    x_ref:    VMEM (block_rows, in_features) f32.
    o_ref:    VMEM (block_rows, 2*num_freqs*in_features), output dtype.
    """
    x = x_ref[...]                                            # (R, F)
    # phase[:, k*F + f] = x[:, f] * freqs[k]  — identical layout to torch's
    # (x.unsqueeze(-2) * freqs.unsqueeze(-1)).reshape(..., num_freqs*in_features)
    phase = jnp.tile(x, (1, num_freqs)) * freq_ref[...]       # (R, NF*F), one vmul
    # Single contiguous full-width store == torch.cat([sin, cos], dim=-1).
    out = jnp.concatenate([jnp.sin(phase), jnp.cos(phase)], axis=-1)
    o_ref[...] = out.astype(o_ref.dtype)


def positional_encoding(x, max_freq, num_freqs, *, block_rows=8192, out_dtype=None):
    """JAX/Pallas equivalent of PositionalEncoding.forward.

    Args:
      x: (num_rays, num_samples, in_features) float array (any leading dims work).
      max_freq, num_freqs: as in the PyTorch module __init__.
      block_rows: target rows per grid step (rounded to a multiple of 8 and
                  clamped by a VMEM budget).
      out_dtype: output dtype; defaults to x.dtype.  Use jnp.bfloat16 to halve
                 store bandwidth on v5e/v6e if the consumer accepts it.
    Returns:
      (num_rays, num_samples, 2*num_freqs*in_features) array.
    """
    if out_dtype is None:
        out_dtype = x.dtype
    x = x.astype(jnp.float32)
    *lead, in_features = x.shape
    half = num_freqs * in_features
    out_features = 2 * half

    # 2 ** linspace(0, max_freq, num_freqs), repeated per feature so the kernel
    # needs only a single element-wise multiply against the lane-tiled input.
    freqs = 2.0 ** jnp.linspace(0.0, float(max_freq), num_freqs)
    freq_row = jnp.repeat(freqs.astype(jnp.float32), in_features)[None, :]   # (1, half)

    x2 = x.reshape(-1, in_features)          # free reshape (contiguous)
    n_rows = x2.shape[0]

    # Biggest comfortable row tile: each grid step has ~0.35us fixed overhead, so
    # large tiles run near the HBM roofline.  Cap by an approximate per-buffer
    # VMEM budget (input + phase + output, f32, double-buffered by Pallas) so
    # large feature counts still fit well under the scoped-VMEM limit.
    bytes_per_row = 4 * (in_features + half + out_features)
    vmem_budget = 8 * 1024 * 1024
    rows_cap = max(8, (int(vmem_budget // max(bytes_per_row, 1)) // 8) * 8)
    block_rows = min(block_rows, rows_cap)
    if n_rows <= block_rows:
        block_rows = n_rows                  # single block; dim == array dim is legal
    else:
        block_rows = max(8, (block_rows // 8) * 8)   # sublane-aligned tile
    grid = (pl.cdiv(n_rows, block_rows),)

    kernel = functools.partial(_pe_kernel, num_freqs=num_freqs)

    out2 = pl.pallas_call(
        kernel,
        out_shape=jax.ShapeDtypeStruct((n_rows, out_features), out_dtype),
        grid=grid,
        in_specs=[
            # Frequency row: whole (tiny) array, same block every step -> fetched once.
            pl.BlockSpec((1, half), lambda i: (0, 0)),
            # Input row tile.
            pl.BlockSpec((block_rows, in_features), lambda i: (i, 0)),
        ],
        out_specs=pl.BlockSpec((block_rows, out_features), lambda i: (i, 0)),
        compiler_params=pltpu.CompilerParams(
            dimension_semantics=("parallel",),   # rows can shard across 2 TCs on v7x
        ),
    )(freq_row, x2)

    return out2.reshape(*lead, out_features)


def _reference(x, max_freq, num_freqs):
    """Pure-JAX reference mirroring the PyTorch forward exactly."""
    x = x.astype(jnp.float32)
    freqs = (2.0 ** jnp.linspace(0.0, float(max_freq), num_freqs)).astype(jnp.float32)
    x_proj = x[..., None, :] * freqs[:, None]            # (..., num_freqs, in_features)
    x_proj = x_proj.reshape(*x.shape[:-1], -1)           # (..., num_freqs*in_features)
    return jnp.concatenate([jnp.sin(x_proj), jnp.cos(x_proj)], axis=-1)


if __name__ == "__main__":
    key = jax.random.PRNGKey(0)

    # x: (num_rays, num_samples, in_features) — small shapes per the module's forward.
    num_rays, num_samples, in_features = 8, 16, 3
    max_freq, num_freqs = 5, 6

    x = jax.random.normal(key, (num_rays, num_samples, in_features), dtype=jnp.float32)
    ref = _reference(x, max_freq, num_freqs)
    out_shape = (num_rays, num_samples, 2 * num_freqs * in_features)

    # Default path: whole problem in one large block.
    out = jax.block_until_ready(positional_encoding(x, max_freq, num_freqs))
    assert out.shape == out_shape, out.shape
    assert jnp.allclose(out, ref, atol=5e-5, rtol=1e-5), "mismatch vs reference"

    # Multi-tile path: 4 grid steps with an explicit smaller row block.
    out_tiled = jax.block_until_ready(
        positional_encoding(x, max_freq, num_freqs, block_rows=32))
    assert jnp.allclose(out_tiled, ref, atol=5e-5, rtol=1e-5), "mismatch (tiled)"

    # Ragged path: block of 48 rows over 128 rows -> clipped partial last block.
    out_ragged = jax.block_until_ready(
        positional_encoding(x, max_freq, num_freqs, block_rows=48))
    assert jnp.allclose(out_ragged, ref, atol=5e-5, rtol=1e-5), "mismatch (ragged)"

    print("KERNEL_OK")
</pallas_src>

<mosaic_0001>
module attributes {stable_mosaic.version = 11 : i64} {
  func.func @_pe_kernel(%arg0: i32, %arg1: memref<1x18xf32, #tpu.memory_space<vmem>>, %arg2: memref<128x3xf32, #tpu.memory_space<vmem>>, %arg3: memref<128x36xf32, #tpu.memory_space<vmem>>) attributes {dimension_semantics = [#tpu.dimension_semantics<parallel>], iteration_bounds = array<i64: 1>, scalar_prefetch = 0 : i64, scratch_operands = 0 : i64, tpu.core_type = #tpu.core_type<tc>, window_params = [{pipeline_mode = #tpu.pipeline_mode<synchronous>, transform_indices = @transform_0, window_bounds = array<i64: 1, 18>}, {transform_indices = @transform_1, window_bounds = array<i64: 128, 3>}, {transform_indices = @transform_2, window_bounds = array<i64: 128, 36>}]} {
    %c0 = arith.constant 0 : index
    %c0_0 = arith.constant 0 : index
    %0 = vector.load %arg2[%c0, %c0_0] : memref<128x3xf32, #tpu.memory_space<vmem>>, vector<128x3xf32>
    %1 = tpu.concatenate %0, %0, %0, %0, %0, %0 in 1 : vector<128x3xf32>, vector<128x3xf32>, vector<128x3xf32>, vector<128x3xf32>, vector<128x3xf32>, vector<128x3xf32> -> vector<128x18xf32>
    %c0_1 = arith.constant 0 : index
    %c0_2 = arith.constant 0 : index
    %2 = vector.load %arg1[%c0_1, %c0_2] : memref<1x18xf32, #tpu.memory_space<vmem>>, vector<1x18xf32>
    %3 = vector.broadcast %2 : vector<1x18xf32> to vector<128x18xf32>
    %4 = arith.mulf %1, %3 : vector<128x18xf32>
    %5 = math.sin %4 : vector<128x18xf32>
    %6 = math.cos %4 : vector<128x18xf32>
    %7 = tpu.concatenate %5, %6 in 1 : vector<128x18xf32>, vector<128x18xf32> -> vector<128x36xf32>
    %c0_3 = arith.constant 0 : index
    %c0_4 = arith.constant 0 : index
    %8 = vector.load %arg3[%c0_3, %c0_4] : memref<128x36xf32, #tpu.memory_space<vmem>>, vector<128x36xf32>
    tpu.vector_store %arg3[%c0_3, %c0_4], %7 {strides = array<i32>} : memref<128x36xf32, #tpu.memory_space<vmem>>, vector<128x36xf32>,
    return
  }
  func.func @transform_0(%arg0: i32) -> (i32, i32) {
    %c0_i32 = arith.constant 0 : i32
    %c0_i32_0 = arith.constant 0 : i32
    %c0_i32_1 = arith.constant 0 : i32
    return %c0_i32, %c0_i32_0 : i32, i32
  }
  func.func @transform_1(%arg0: i32) -> (i32, i32) {
    %c0_i32 = arith.constant 0 : i32
    %c0_i32_0 = arith.constant 0 : i32
    return %arg0, %c0_i32 : i32, i32
  }
  func.func @transform_2(%arg0: i32) -> (i32, i32) {
    %c0_i32 = arith.constant 0 : i32
    %c0_i32_0 = arith.constant 0 : i32
    return %arg0, %c0_i32 : i32, i32
  }
}

</mosaic_0001>

<bundles_post_ra>
// kernel: tpu_custom_call.1
= control target key start
LH: loop header
LB: loop body
LE: loop exit
PB: predicated region body
PF: predicated region fallthrough
CT: control target
= control target key end

     0   :  { %s4074_s13 = smov 3   ;;  %s4075_s15 = smov 6   ;;  %vm283_vm0 = vcmask 23552   ;;  %vm300_vm1 = vcmask 48128   ;;  %vm317_vm2 = vcmask 72704   ;;  %vm334_vm3 = vcmask 97280   ;;  %s6692_s1 = inlined_call_operand.vmem [shape: f32[128,3], index: 1, kind: input, shape index: {}]   ;;  %s6693_s0 = inlined_call_operand.vmem [shape: f32[1,18], index: 0, kind: input, shape index: {}]   ;;  %s6694_s2 = inlined_call_operand.vmem [shape: f32[128,36], index: 2, kind: output, shape index: {}]  }
   0x1   :  { %v4104_v0 = vld [vmem:[%s6692_s1 + $0x10] sm:$0xff]  ;;  %v4109_v1 = vld [vmem:[%s6692_s1] sm:$0xff]  ;;  %v4116_v2 = vld [vmem:[%s6692_s1 + $0x18] sm:$0xff]  ;;  %s4078_s16 = smov 15   ;;  %vm351_vm4 = vcmask 121856  }
   0x2   :  { %47 = vrot.lane.b32.xlu1 %v4104_v0, %s4074_s13  ;;  %43 = vrot.lane.b32.xlu0 %v4109_v1, %s4074_s13  ;;  %v4121_v3 = vld [vmem:[%s6692_s1 + $0x8] sm:$0xff]  ;;  %v4133_v5 = vld [vmem:[%s6692_s1 + $0x20] sm:$0xff] }
   0x3   :  { %v4128_v4 = vld [vmem:[%s6692_s1 + $0x28] sm:$0xff]  ;;  %v4140_v6 = vld [vmem:[%s6692_s1 + $0x38] sm:$0xff]  ;;  %v4145_v7 = vld [vmem:[%s6692_s1 + $0x30] sm:$0xff] }
   0x4   :  { %v4152_v8 = vld [vmem:[%s6692_s1 + $0x48] sm:$0xff]  ;;  %v4157_v9 = vld [vmem:[%s6692_s1 + $0x40] sm:$0xff]  ;;  %v4164_v10 = vld [vmem:[%s6692_s1 + $0x58] sm:$0xff] }
   0x5   :  { %v4169_v11 = vld [vmem:[%s6692_s1 + $0x50] sm:$0xff]  ;;  %v4176_v12 = vld [vmem:[%s6692_s1 + $0x68] sm:$0xff]  ;;  %v4181_v13 = vld [vmem:[%s6692_s1 + $0x60] sm:$0xff] }
   0x6   :  { %49 = vrot.lane.b32.xlu1 %v4116_v2, %s4074_s13  ;;  %45 = vrot.lane.b32.xlu0 %v4121_v3, %s4074_s13  ;;  %v4188_v14 = vld [vmem:[%s6692_s1 + $0x78] sm:$0xff]  ;;  %v4193_v15 = vld [vmem:[%s6692_s1 + $0x70] sm:$0xff]  ;;  %s4076_s1 = smov 9  }
   0xa   :  { %53 = vrot.lane.b32.xlu1 %v4128_v4, %s4074_s13  ;;  %51 = vrot.lane.b32.xlu0 %v4133_v5, %s4074_s13 }
   0xe   :  { %57 = vrot.lane.b32.xlu1 %v4140_v6, %s4074_s13  ;;  %55 = vrot.lane.b32.xlu0 %v4145_v7, %s4074_s13 }
  0x12   :  { %61 = vrot.lane.b32.xlu1 %v4152_v8, %s4074_s13  ;;  %59 = vrot.lane.b32.xlu0 %v4157_v9, %s4074_s13 }
  0x16   :  { %65 = vrot.lane.b32.xlu1 %v4164_v10, %s4074_s13  ;;  %63 = vrot.lane.b32.xlu0 %v4169_v11, %s4074_s13 }
  0x1a   :  { %69 = vrot.lane.b32.xlu1 %v4176_v12, %s4074_s13  ;;  %67 = vrot.lane.b32.xlu0 %v4181_v13, %s4074_s13 }
  0x1e   :  { %73 = vrot.lane.b32.xlu1 %v4188_v14, %s4074_s13  ;;  %71 = vrot.lane.b32.xlu0 %v4193_v15, %s4074_s13  ;;  %s4077_s13 = smov 12  }
  0x22   :  { %93 = vrot.lane.b32.xlu1 %v4121_v3, %s4075_s15  ;;  %91 = vrot.lane.b32.xlu0 %v4109_v1, %s4075_s15 }
  0x26   :  { %97 = vrot.lane.b32.xlu1 %v4116_v2, %s4075_s15  ;;  %95 = vrot.lane.b32.xlu0 %v4104_v0, %s4075_s15 }
  0x2a   :  { %101 = vrot.lane.b32.xlu1 %v4128_v4, %s4075_s15  ;;  %99 = vrot.lane.b32.xlu0 %v4133_v5, %s4075_s15 }
  0x2e   :  { %105 = vrot.lane.b32.xlu1 %v4140_v6, %s4075_s15  ;;  %103 = vrot.lane.b32.xlu0 %v4145_v7, %s4075_s15 }
  0x32   :  { %109 = vrot.lane.b32.xlu1 %v4152_v8, %s4075_s15  ;;  %107 = vrot.lane.b32.xlu0 %v4157_v9, %s4075_s15 }
  0x36   :  { %113 = vrot.lane.b32.xlu1 %v4164_v10, %s4075_s15  ;;  %111 = vrot.lane.b32.xlu0 %v4169_v11, %s4075_s15 }
  0x3a   :  { %117 = vrot.lane.b32.xlu1 %v4176_v12, %s4075_s15  ;;  %115 = vrot.lane.b32.xlu0 %v4181_v13, %s4075_s15 }
  0x3e   :  { %121 = vrot.lane.b32.xlu1 %v4188_v14, %s4075_s15  ;;  %119 = vrot.lane.b32.xlu0 %v4193_v15, %s4075_s15 }
  0x42   :  { %141 = vrot.lane.b32.xlu1 %v4121_v3, %s4076_s1  ;;  %139 = vrot.lane.b32.xlu0 %v4109_v1, %s4076_s1 }
  0x46   :  { %145 = vrot.lane.b32.xlu1 %v4116_v2, %s4076_s1  ;;  %143 = vrot.lane.b32.xlu0 %v4104_v0, %s4076_s1 }
  0x4a   :  { %149 = vrot.lane.b32.xlu1 %v4128_v4, %s4076_s1  ;;  %147 = vrot.lane.b32.xlu0 %v4133_v5, %s4076_s1 }
  0x4e   :  { %153 = vrot.lane.b32.xlu1 %v4140_v6, %s4076_s1  ;;  %151 = vrot.lane.b32.xlu0 %v4145_v7, %s4076_s1 }
  0x52   :  { %157 = vrot.lane.b32.xlu1 %v4152_v8, %s4076_s1  ;;  %155 = vrot.lane.b32.xlu0 %v4157_v9, %s4076_s1 }
  0x56   :  { %161 = vrot.lane.b32.xlu1 %v4164_v10, %s4076_s1  ;;  %159 = vrot.lane.b32.xlu0 %v4169_v11, %s4076_s1 }
  0x5a   :  { %165 = vrot.lane.b32.xlu1 %v4176_v12, %s4076_s1  ;;  %163 = vrot.lane.b32.xlu0 %v4181_v13, %s4076_s1 }
  0x5e   :  { %169 = vrot.lane.b32.xlu1 %v4188_v14, %s4076_s1  ;;  %167 = vrot.lane.b32.xlu0 %v4193_v15, %s4076_s1 }
  0x62   :  { %189 = vrot.lane.b32.xlu1 %v4121_v3, %s4077_s13  ;;  %187 = vrot.lane.b32.xlu0 %v4109_v1, %s4077_s13 }
  0x66   :  { %193 = vrot.lane.b32.xlu1 %v4116_v2, %s4077_s13  ;;  %191 = vrot.lane.b32.xlu0 %v4104_v0, %s4077_s13 }
  0x6a   :  { %197 = vrot.lane.b32.xlu1 %v4128_v4, %s4077_s13  ;;  %195 = vrot.lane.b32.xlu0 %v4133_v5, %s4077_s13 }
  0x6e   :  { %201 = vrot.lane.b32.xlu1 %v4140_v6, %s4077_s13  ;;  %199 = vrot.lane.b32.xlu0 %v4145_v7, %s4077_s13 }
  0x72   :  { %205 = vrot.lane.b32.xlu1 %v4152_v8, %s4077_s13  ;;  %203 = vrot.lane.b32.xlu0 %v4157_v9, %s4077_s13 }
  0x74   :  { %v48_v16 = vpop.permute.xlu1 %47  ;;  %v44_v17 = vpop.permute.xlu0 %43 }
  0x75   :  { %v284_v44 = vsel %vm283_vm0, %v4109_v1, %v44_v17  ;;  %v286_v50 = vsel %vm283_vm0, %v4104_v0, %v48_v16 }
  0x76   :  { %209 = vrot.lane.b32.xlu1 %v4164_v10, %s4077_s13  ;;  %207 = vrot.lane.b32.xlu0 %v4169_v11, %s4077_s13 }
  0x78   :  { %v50_v18 = vpop.permute.xlu1 %49  ;;  %v46_v19 = vpop.permute.xlu0 %45 }
  0x79   :  { %v285_v45 = vsel %vm283_vm0, %v4121_v3, %v46_v19  ;;  %v287_v51 = vsel %vm283_vm0, %v4116_v2, %v50_v18 }
  0x7a   :  { %213 = vrot.lane.b32.xlu1 %v4176_v12, %s4077_s13  ;;  %211 = vrot.lane.b32.xlu0 %v4181_v13, %s4077_s13 }
  0x7c   :  { %v54_v20 = vpop.permute.xlu1 %53  ;;  %v52_v21 = vpop.permute.xlu0 %51 }
  0x7d   :  { %v289_v22 = vsel %vm283_vm0, %v4128_v4, %v54_v20  ;;  %v288_v23 = vsel %vm283_vm0, %v4133_v5, %v52_v21 }
  0x7e   :  { %217 = vrot.lane.b32.xlu1 %v4188_v14, %s4077_s13  ;;  %215 = vrot.lane.b32.xlu0 %v4193_v15, %s4077_s13 }
  0x80   :  { %v58_v24 = vpop.permute.xlu1 %57  ;;  %v56_v25 = vpop.permute.xlu0 %55 }
  0x81   :  { %v291_v26 = vsel %vm283_vm0, %v4140_v6, %v58_v24  ;;  %v290_v27 = vsel %vm283_vm0, %v4145_v7, %v56_v25 }
  0x82   :  { %237 = vrot.lane.b32.xlu1 %v4121_v3, %s4078_s16  ;;  %235 = vrot.lane.b32.xlu0 %v4109_v1, %s4078_s16 }
  0x84   :  { %v62_v28 = vpop.permute.xlu1 %61  ;;  %v60_v29 = vpop.permute.xlu0 %59 }
  0x85   :  { %v293_v30 = vsel %vm283_vm0, %v4152_v8, %v62_v28  ;;  %v292_v31 = vsel %vm283_vm0, %v4157_v9, %v60_v29 }
  0x86   :  { %241 = vrot.lane.b32.xlu1 %v4116_v2, %s4078_s16  ;;  %239 = vrot.lane.b32.xlu0 %v4104_v0, %s4078_s16 }
  0x88   :  { %v66_v32 = vpop.permute.xlu1 %65  ;;  %v64_v33 = vpop.permute.xlu0 %63 }
  0x89   :  { %v295_v34 = vsel %vm283_vm0, %v4164_v10, %v66_v32  ;;  %v294_v35 = vsel %vm283_vm0, %v4169_v11, %v64_v33 }
  0x8a   :  { %245 = vrot.lane.b32.xlu1 %v4128_v4, %s4078_s16  ;;  %243 = vrot.lane.b32.xlu0 %v4133_v5, %s4078_s16 }
  0x8c   :  { %v70_v36 = vpop.permute.xlu1 %69  ;;  %v68_v37 = vpop.permute.xlu0 %67 }
  0x8d   :  { %v297_v38 = vsel %vm283_vm0, %v4176_v12, %v70_v36  ;;  %v296_v39 = vsel %vm283_vm0, %v4181_v13, %v68_v37 }
  0x8e   :  { %249 = vrot.lane.b32.xlu1 %v4140_v6, %s4078_s16  ;;  %247 = vrot.lane.b32.xlu0 %v4145_v7, %s4078_s16 }
  0x90   :  { %v74_v40 = vpop.permute.xlu1 %73  ;;  %v72_v41 = vpop.permute.xlu0 %71 }
  0x91   :  { %v299_v42 = vsel %vm283_vm0, %v4188_v14, %v74_v40  ;;  %v298_v43 = vsel %vm283_vm0, %v4193_v15, %v72_v41 }
  0x92   :  { %253 = vrot.lane.b32.xlu1 %v4152_v8, %s4078_s16  ;;  %251 = vrot.lane.b32.xlu0 %v4157_v9, %s4078_s16 }
  0x94   :  { %v94_v46 = vpop.permute.xlu1 %93  ;;  %v92_v47 = vpop.permute.xlu0 %91 }
  0x95   :  { %v4294_v48 = vsel %vm300_vm1, %v285_v45, %v94_v46  ;;  %v4297_v49 = vsel %vm300_vm1, %v284_v44, %v92_v47 }
  0x96   :  { %257 = vrot.lane.b32.xlu1 %v4164_v10, %s4078_s16  ;;  %255 = vrot.lane.b32.xlu0 %v4169_v11, %s4078_s16 }
  0x98   :  { %v98_v52 = vpop.permute.xlu1 %97  ;;  %v96_v53 = vpop.permute.xlu0 %95 }
  0x99   :  { %v304_v54 = vsel %vm300_vm1, %v287_v51, %v98_v52  ;;  %v303_v55 = vsel %vm300_vm1, %v286_v50, %v96_v53 }
  0x9a   :  { %261 = vrot.lane.b32.xlu1 %v4176_v12, %s4078_s16  ;;  %259 = vrot.lane.b32.xlu0 %v4181_v13, %s4078_s16 }
  0x9c   :  { %v102_v56 = vpop.permute.xlu1 %101  ;;  %v100_v57 = vpop.permute.xlu0 %99 }
  0x9d   :  { %v306_v58 = vsel %vm300_vm1, %v289_v22, %v102_v56  ;;  %v305_v59 = vsel %vm300_vm1, %v288_v23, %v100_v57 }
  0x9e   :  { %265 = vrot.lane.b32.xlu1 %v4188_v14, %s4078_s16  ;;  %263 = vrot.lane.b32.xlu0 %v4193_v15, %s4078_s16 }
  0xa0   :  { %v106_v60 = vpop.permute.xlu1 %105  ;;  %v104_v61 = vpop.permute.xlu0 %103 }
  0xa1   :  { %v308_v62 = vsel %vm300_vm1, %v291_v26, %v106_v60  ;;  %v307_v63 = vsel %vm300_vm1, %v290_v27, %v104_v61 }
  0xa4   :  { %v110_v0 = vpop.permute.xlu1 %109  ;;  %v108_v1 = vpop.permute.xlu0 %107 }
  0xa5   :  { %v310_v2 = vsel %vm300_vm1, %v293_v30, %v110_v0  ;;  %v309_v3 = vsel %vm300_vm1, %v292_v31, %v108_v1 }
  0xa8   :  { %v114_v4 = vpop.permute.xlu1 %113  ;;  %v112_v5 = vpop.permute.xlu0 %111 }
  0xa9   :  { %v312_v6 = vsel %vm300_vm1, %v295_v34, %v114_v4  ;;  %v311_v7 = vsel %vm300_vm1, %v294_v35, %v112_v5 }
  0xac   :  { %v118_v8 = vpop.permute.xlu1 %117  ;;  %v116_v9 = vpop.permute.xlu0 %115 }
  0xad   :  { %v314_v10 = vsel %vm300_vm1, %v297_v38, %v118_v8  ;;  %v313_v11 = vsel %vm300_vm1, %v296_v39, %v116_v9 }
  0xb0   :  { %v122_v12 = vpop.permute.xlu1 %121  ;;  %v120_v13 = vpop.permute.xlu0 %119 }
  0xb1   :  { %v316_v14 = vsel %vm300_vm1, %v299_v42, %v122_v12  ;;  %v315_v15 = vsel %vm300_vm1, %v298_v43, %v120_v13 }
  0xb4   :  { %v4329_v16 = vpop.permute.xlu1 %141  ;;  %v4331_v17 = vpop.permute.xlu0 %139 }
  0xb8   :  { %v146_v18 = vpop.permute.xlu1 %145  ;;  %v144_v19 = vpop.permute.xlu0 %143 }
  0xb9   :  { %v4334_v20 = vsel %vm317_vm2, %v304_v54, %v146_v18  ;;  %v320_v21 = vsel %vm317_vm2, %v303_v55, %v144_v19  ;;  %v318_v18 = vsel %vm317_vm2, %v4297_v49, %v4331_v17 }
  0xbc   :  { %v150_v22 = vpop.permute.xlu1 %149  ;;  %v148_v23 = vpop.permute.xlu0 %147 }
  0xbd   :  { %v323_v24 = vsel %vm317_vm2, %v306_v58, %v150_v22  ;;  %v322_v25 = vsel %vm317_vm2, %v305_v59, %v148_v23  ;;  %v4390_v23 = vld [vmem:[%s6693_s0] ss:$0 sm:$0xff]  ;;  %s4085_s0 = smov 18  }
  0xc0   :  { %v154_v26 = vpop.permute.xlu1 %153  ;;  %v152_v27 = vpop.permute.xlu0 %151 }
  0xc1   :  { %v325_v28 = vsel %vm317_vm2, %v308_v62, %v154_v26  ;;  %v324_v29 = vsel %vm317_vm2, %v307_v63, %v152_v27 }
  0xc4   :  { %v158_v30 = vpop.permute.xlu1 %157  ;;  %v156_v31 = vpop.permute.xlu0 %155 }
  0xc5   :  { %v327_v32 = vsel %vm317_vm2, %v310_v2, %v158_v30  ;;  %v326_v33 = vsel %vm317_vm2, %v309_v3, %v156_v31 }
  0xc8   :  { %v162_v34 = vpop.permute.xlu1 %161  ;;  %v160_v35 = vpop.permute.xlu0 %159 }
  0xc9   :  { %v329_v36 = vsel %vm317_vm2, %v312_v6, %v162_v34  ;;  %v328_v37 = vsel %vm317_vm2, %v311_v7, %v160_v35 }
  0xcc   :  { %v166_v38 = vpop.permute.xlu1 %165  ;;  %v164_v39 = vpop.permute.xlu0 %163 }
  0xcd   :  { %v331_v40 = vsel %vm317_vm2, %v314_v10, %v166_v38  ;;  %v330_v41 = vsel %vm317_vm2, %v313_v11, %v164_v39 }
  0xd0   :  { %v170_v42 = vpop.permute.xlu1 %169  ;;  %v168_v43 = vpop.permute.xlu0 %167 }
  0xd1   :  { %v333_v44 = vsel %vm317_vm2, %v316_v14, %v170_v42  ;;  %v332_v45 = vsel %vm317_vm2, %v315_v15, %v168_v43  ;;  %v319_v15 = vsel %vm317_vm2, %v4294_v48, %v4329_v16 }
  0xd4   :  { %v190_v46 = vpop.permute.xlu1 %189  ;;  %v188_v47 = vpop.permute.xlu0 %187 }
  0xd5   :  { %v336_v19 = vsel %vm334_vm3, %v319_v15, %v190_v46 }
  0xd8   :  { %v194_v50 = vpop.permute.xlu1 %193  ;;  %v192_v51 = vpop.permute.xlu0 %191 }
  0xd9   :  { %v337_v52 = vsel %vm334_vm3, %v320_v21, %v192_v51  ;;  %v335_v21 = vsel %vm334_vm3, %v318_v18, %v188_v47  ;;  %v338_v27 = vsel %vm334_vm3, %v4334_v20, %v194_v50 }
  0xdc   :  { %v198_v53 = vpop.permute.xlu1 %197  ;;  %v196_v54 = vpop.permute.xlu0 %195 }
  0xdd   :  { %v340_v55 = vsel %vm334_vm3, %v323_v24, %v198_v53  ;;  %v339_v56 = vsel %vm334_vm3, %v322_v25, %v196_v54 }
  0xe0   :  { %v202_v57 = vpop.permute.xlu1 %201  ;;  %v200_v58 = vpop.permute.xlu0 %199 }
  0xe1   :  { %v342_v59 = vsel %vm334_vm3, %v325_v28, %v202_v57  ;;  %v341_v60 = vsel %vm334_vm3, %v324_v29, %v200_v58 }
  0xe4   :  { %v206_v61 = vpop.permute.xlu1 %205  ;;  %v204_v62 = vpop.permute.xlu0 %203 }
  0xe5   :  { %v4355_v63 = vsel %vm334_vm3, %v327_v32, %v206_v61  ;;  %v4358_v0 = vsel %vm334_vm3, %v326_v33, %v204_v62 }
  0xe8   :  { %v210_v1 = vpop.permute.xlu1 %209  ;;  %v208_v2 = vpop.permute.xlu0 %207 }
  0xe9   :  { %v4361_v3 = vsel %vm334_vm3, %v329_v36, %v210_v1  ;;  %v4364_v4 = vsel %vm334_vm3, %v328_v37, %v208_v2 }
  0xec   :  { %v214_v5 = vpop.permute.xlu1 %213  ;;  %v212_v6 = vpop.permute.xlu0 %211 }
  0xed   :  { %v4367_v7 = vsel %vm334_vm3, %v331_v40, %v214_v5  ;;  %v4370_v8 = vsel %vm334_vm3, %v330_v41, %v212_v6 }
  0xf0   :  { %v218_v9 = vpop.permute.xlu1 %217  ;;  %v216_v10 = vpop.permute.xlu0 %215 }
  0xf1   :  { %v4373_v11 = vsel %vm334_vm3, %v333_v44, %v218_v9  ;;  %v4376_v12 = vsel %vm334_vm3, %v332_v45, %v216_v10 }
  0xf4   :  { %v238_v13 = vpop.permute.xlu1 %237  ;;  %v236_v14 = vpop.permute.xlu0 %235 }
  0xf5   :  { %v353_v22 = vsel %vm351_vm4, %v336_v19, %v238_v13  ;;  %v352_v26 = vsel %vm351_vm4, %v335_v21, %v236_v14 }
  0xf6   :  { %v4394_v48 = vmul.f32 %v4390_v23, %v353_v22  ;;  %v4397_v49 = vmul.f32 %v4390_v23, %v352_v26 }
  0xf8   :  { %v242_v24 = vpop.permute.xlu1 %241  ;;  %v240_v25 = vpop.permute.xlu0 %239  ;;  %v498_v31 = vand.u32 2139095040, %v4394_v48  ;;  %v394_v34 = vand.u32 2139095040, %v4397_v49  ;;  %v6696_v1 = vand.u32 2147483647, %v4394_v48 }
  0xf9   :  { %v355_v30 = vsel %vm351_vm4, %v338_v27, %v242_v24  ;;  %v354_v37 = vsel %vm351_vm4, %v337_v52, %v240_v25 }
  0xfa   :  { %v4413_v35 = vmul.f32 %v4390_v23, %v355_v30  ;;  %v499_v20 = vshrl.u32 %v498_v31, 23  ;;  %v395_v36 = vshrl.u32 %v394_v34, 23  ;;  %v4418_v40 = vmul.f32 %v4390_v23, %v354_v37 }
  0xfb   :  { %v4442_v14 = vand.u32 8388607, %v6696_v1  ;;  %v6701_v31 = vmov 2102212464  }
  0xfc   :  { %v246_v16 = vpop.permute.xlu1 %245  ;;  %v244_v17 = vpop.permute.xlu0 %243  ;;  %v706_v38 = vand.u32 2139095040, %v4413_v35  ;;  %v3810_v39 = vadd.s32 4294967169, %v499_v20  ;;  %v3806_v41 = vadd.s32 4294967169, %v395_v36  ;;  %v602_v44 = vand.u32 2139095040, %v4418_v40 }
  0xfd   :  { %v357_v28 = vsel %vm351_vm4, %v340_v55, %v246_v16  ;;  %v356_v29 = vsel %vm351_vm4, %v339_v56, %v244_v17  ;;  %v6699_v20 = vmov 920167782  }
  0xfe   :  { %v4406_v32 = vmul.f32 %v4390_v23, %v357_v28  ;;  %v4409_v33 = vmul.f32 %v4390_v23, %v356_v29  ;;  %v707_v42 = vshrl.u32 %v706_v38, 23  ;;  %v505_v43 = vadd.s32 1, %v3810_v39 }
  0xff   :  { %v401_v47 = vadd.s32 1, %v3806_v41  ;;  %v603_v51 = vshrl.u32 %v602_v44, 23  ;;  %v6697_v44 = vmov 1326507024  }
 0x100   :  { %6805 = vst [vmem:[#allocation2_spill] sm:$0xff] %v4406_v32  ;;  %6806 = vst [vmem:[#allocation3_spill] sm:$0xff] %v4409_v33  ;;  %v250_v45 = vpop.permute.xlu1 %249  ;;  %v248_v46 = vpop.permute.xlu0 %247  ;;  %v3818_v50 = vadd.s32 4294967169, %v707_v42  ;;  %vm506_vm5 = vcmp.gt.s32.totalorder %v505_v43, 0  ;;  %v914_v62 = vand.u32 2139095040, %v4406_v32 }
 0x101   :  { %v359_v53 = vsel %vm351_vm4, %v342_v59, %v250_v45  ;;  %v358_v52 = vsel %vm351_vm4, %v341_v60, %v248_v46  ;;  %vm402_vm6 = vcmp.gt.s32.totalorder %v401_v47, 0  ;;  %v507_v61 = vsel %vm506_vm5, %v505_v43, 0 }
 0x102   :  { %v713_v54 = vadd.s32 1, %v3818_v50  ;;  %v4424_v55 = vmul.f32 %v4390_v23, %v359_v53  ;;  %v4427_v56 = vmul.f32 %v4390_v23, %v358_v52  ;;  %v403_v2 = vsel %vm402_vm6, %v401_v47, 0 }
 0x103   :  { %v3814_v5 = vadd.s32 4294967169, %v603_v51  ;;  %v810_v59 = vand.u32 2139095040, %v4409_v33  ;;  %v4436_v9 = vand.u32 31, %v507_v61  ;;  %v4438_v10 = vand.u32 31, %v403_v2 }
 0x104   :  { %6807 = vst [vmem:[#allocation4_spill] sm:$0xff] %v4424_v55  ;;  %6808 = vst [vmem:[#allocation5_spill] sm:$0xff] %v4427_v56  ;;  %v254_v57 = vpop.permute.xlu1 %253  ;;  %v252_v58 = vpop.permute.xlu0 %251  ;;  %vm714_vm7 = vcmp.gt.s32.totalorder %v713_v54, 0  ;;  %v915_v13 = vshrl.u32 %v914_v62, 23  ;;  %v4451_v22 = vshrl.u32 %v507_v61, 5  ;;  %v1122_v30 = vand.u32 2139095040, %v4424_v55 }
 0x105   :  { %v361_v60 = vsel %vm351_vm4, %v4355_v63, %v254_v57  ;;  %v360_v6 = vsel %vm351_vm4, %v4358_v0, %v252_v58  ;;  %v609_v15 = vadd.s32 1, %v3814_v5  ;;  %v811_v18 = vshrl.u32 %v810_v59, 23 }
 0x106   :  { %v715_v19 = vsel %vm714_vm7, %v713_v54, 0  ;;  %v4445_v21 = vmul.f32 %v4390_v23, %v361_v60  ;;  %v4448_v63 = vmul.f32 %v4390_v23, %v360_v6  ;;  %v6695_v0 = vand.u32 2147483647, %v4397_v49 }
 0x107   :  { %v4454_v24 = vsub.s32 32, %v4436_v9  ;;  %v4457_v25 = vsub.s32 32, %v4438_v10  ;;  %v3826_v26 = vadd.s32 4294967169, %v915_v13  ;;  %v4460_v28 = vand.u32 31, %v715_v19 }
 0x108   :  { %6809 = vst [vmem:[#allocation6_spill] sm:$0xff] %v4445_v21  ;;  %6810 = vst [vmem:[#allocation7_spill] sm:$0xff] %v4448_v63  ;;  %v258_v16 = vpop.permute.xlu1 %257  ;;  %v256_v17 = vpop.permute.xlu0 %255  ;;  %vm610_vm8 = vcmp.gt.s32.totalorder %v609_v15, 0  ;;  %v3822_v29 = vadd.s32 4294967169, %v811_v18  ;;  %v521_v34 = vshll.u32 %v6701_v31, %v4436_v9  ;;  %v524_v36 = vshll.u32 %v6699_v20, %v4436_v9 }
 0x109   :  { %v4467_v37 = vshrl.u32 %v403_v2, 5  ;;  %v4471_v38 = vand.u32 8388607, %v6695_v0  ;;  %v522_v39 = vshrl.u32 %v6699_v20, %v4454_v24  ;;  %vm530_vm9 = vcmp.lt.s32.totalorder %v4451_v22, 4 }
 0x10a   :  { %v1018_v41 = vand.u32 2139095040, %v4427_v56  ;;  %v363_v42 = vsel %vm351_vm4, %v4361_v3, %v258_v16  ;;  %v362_v43 = vsel %vm351_vm4, %v4364_v4, %v256_v17  ;;  %v525_v45 = vshrl.u32 %v6697_v44, %v4454_v24 }
 0x10b   :  { %v418_v46 = vshrl.u32 %v6699_v20, %v4457_v25  ;;  %v611_v47 = vsel %vm610_vm8, %v609_v15, 0  ;;  %v921_v50 = vadd.s32 1, %v3826_v26  ;;  %v4487_v51 = vsub.s32 32, %v4460_v28 }
 0x10c   :  { %v817_v53 = vadd.s32 1, %v3822_v29  ;;  %v1123_v52 = vshrl.u32 %v1122_v30, 23  ;;  %v1330_v3 = vand.u32 2139095040, %v4445_v21  ;;  %v421_v4 = vshrl.u32 %v6697_v44, %v4457_v25 }
 0x10d   :  { %v1226_v54 = vand.u32 2139095040, %v4448_v63  ;;  %v4494_v57 = vmul.f32 %v4390_v23, %v363_v42  ;;  %v4497_v58 = vmul.f32 %v4390_v23, %v362_v43  ;;  %v417_v61 = vshll.u32 %v6701_v31, %v4438_v10  ;;  %v262_v43 = vpop.permute.xlu1 %261 }
 0x10e   :  { %v420_v62 = vshll.u32 %v6699_v20, %v4438_v10  ;;  %v4503_v2 = vand.u32 31, %v611_v47  ;;  %v1019_v5 = vshrl.u32 %v1018_v41, 23  ;;  %v4505_v59 = vor.u32 %v522_v39, %v521_v34 }
 0x10f   :  { %6811 = vst [vmem:[#allocation8_spill] sm:$0xff] %v4494_v57  ;;  %6812 = vst [vmem:[#allocation9_spill] sm:$0xff] %v4497_v58  ;;  %v526_v60 = vor.u32 %v525_v45, %v524_v36  ;;  %vm426_vm10 = vcmp.lt.s32.totalorder %v4467_v37, 4  ;;  %vm922_vm11 = vcmp.gt.s32.totalorder %v921_v50, 0  ;;  %v730_v6 = vshrl.u32 %v6699_v20, %v4487_v51  ;;  %v260_v45 = vpop.permute.xlu0 %259 }
 0x110   :  { %vm818_vm12 = vcmp.gt.s32.totalorder %v817_v53, 0  ;;  %v3834_v13 = vadd.s32 4294967169, %v1123_v52  ;;  %v1331_v15 = vshrl.u32 %v1330_v3, 23  ;;  %v4510_v18 = vor.u32 %v418_v46, %v417_v61 }
 0x111   :  { %v422_v26 = vor.u32 %v421_v4, %v420_v62  ;;  %v4512_v16 = vshrl.u32 %v715_v19, 5  ;;  %v1227_v17 = vshrl.u32 %v1226_v54, 23  ;;  %v729_v29 = vshll.u32 %v6701_v31, %v4460_v28 }
 0x112   :  { %v4517_v30 = vsub.s32 32, %v4503_v2  ;;  %v923_v34 = vsel %vm922_vm11, %v921_v50, 0  ;;  %v3830_v36 = vadd.s32 4294967169, %v1019_v5  ;;  %v4522_v39 = vsel %vm530_vm9, %v4505_v59, 920167782 }
 0x113   :  { %v4526_v41 = vsel %vm530_vm9, %v526_v60, 1326507024  ;;  %v4528_v19 = vshrl.u32 %v611_v47, 5  ;;  %v819_v42 = vsel %vm818_vm12, %v817_v53, 0  ;;  %v4530_v46 = vor.u32 %v730_v6, %v729_v29 }
 0x114   :  { %v733_v50 = vshrl.u32 %v6697_v44, %v4487_v51  ;;  %v1129_v52 = vadd.s32 1, %v3834_v13  ;;  %v3842_v3 = vadd.s32 4294967169, %v1331_v15  ;;  %v4537_v4 = vsel %vm426_vm10, %v4510_v18, 920167782 }
 0x115   :  { %v732_v54 = vshll.u32 %v6699_v20, %v4460_v28  ;;  %v4541_v47 = vand.u32 31, %v923_v34  ;;  %v3838_v53 = vadd.s32 4294967169, %v1227_v17  ;;  %v626_v61 = vshrl.u32 %v6699_v20, %v4517_v30 }
 0x116   :  { %v629_v62 = vshrl.u32 %v6697_v44, %v4517_v30  ;;  %v4547_v5 = vand.u32 31, %v819_v42  ;;  %v1025_v60 = vadd.s32 1, %v3830_v36  ;;  %v4551_v6 = vsel %vm426_vm10, %v422_v26, 1326507024  ;;  %v266_v44 = vpop.permute.xlu1 %265 }
 0x117   :  { %6813 = vst [vmem:[#allocation10_spill] sm:$0xff] %v4541_v47  ;;  %vm738_vm13 = vcmp.lt.s32.totalorder %v4512_v16, 4  ;;  %v625_v13 = vshll.u32 %v6701_v31, %v4503_v2  ;;  %v628_v15 = vshll.u32 %v6699_v20, %v4503_v2  ;;  %v734_v17 = vor.u32 %v733_v50, %v732_v54  ;;  %v264_v20 = vpop.permute.xlu0 %263 }
 0x118   :  { %6814 = vst [vmem:[#allocation11_spill] sm:$0xff] %v4547_v5  ;;  %v4561_v29 = vsel %vm738_vm13, %v4530_v46, 920167782  ;;  %vm1130_vm14 = vcmp.gt.s32.totalorder %v1129_v52, 0  ;;  %v1337_v36 = vadd.s32 1, %v3842_v3  ;;  %v4564_v0 = vsub.s32 32, %v4541_v47 }
 0x119   :  { %v1233_v26 = vadd.s32 1, %v3838_v53  ;;  %v365_v1 = vsel %vm351_vm4, %v4367_v7, %v262_v43  ;;  %v364_v27 = vsel %vm351_vm4, %v4370_v8, %v260_v45  ;;  %v4570_v50 = vor.u32 %v626_v61, %v625_v13 }
 0x11a   :  { %6815 = vst [vmem:[#allocation12_spill] sm:$0xff] %v4564_v0  ;;  %v630_v54 = vor.u32 %v629_v62, %v628_v15  ;;  %vm634_vm15 = vcmp.lt.s32.totalorder %v4528_v19, 4  ;;  %v4574_v31 = vsub.s32 32, %v4547_v5  ;;  %vm1026_vm0 = vcmp.gt.s32.totalorder %v1025_v60, 0 }
 0x11b   :  { %6816 = vst [vmem:[#allocation13_spill] sm:$0xff] %v4570_v50  ;;  %v4576_v3 = vshrl.u32 %v923_v34, 5  ;;  %v1131_v53 = vsel %vm1130_vm14, %v1129_v52, 0  ;;  %v4579_v63 = vmul.f32 %v4390_v23, %v365_v1  ;;  %v4582_v7 = vmul.f32 %v4390_v23, %v364_v27 }
 0x11c   :  { %6817 = vst [vmem:[#allocation14_spill] sm:$0xff] %v4574_v31  ;;  %v6821_v8 = vmov 2102212464   ;;  %vm1338_vm1 = vcmp.gt.s32.totalorder %v1337_v36, 0  ;;  %v367_v45 = vsel %vm351_vm4, %v4373_v11, %v266_v44  ;;  %v366_v61 = vsel %vm351_vm4, %v4376_v12, %v264_v20 }
 0x11d   :  { %6818 = vst [vmem:[#allocation15_spill] sm:$0xff] %v4576_v3  ;;  %6819 = vst [vmem:[#allocation16_spill] sm:$0xff] %v4579_v63  ;;  %v937_v43 = vshll.u32 %v6821_v8, %v4541_v47  ;;  %v6822_v34 = vmov 920167782   ;;  %v6823_v52 = vmov 1326507024   ;;  %v4599_v21 = vmul.f32 %v4390_v23, %v367_v45 }
 0x11e   :  { %6820 = vst [vmem:[#allocation17_spill] sm:$0xff] %v4582_v7  ;;  %v938_v62 = vshrl.u32 %v6822_v34, %v4564_v0  ;;  %v941_v1 = vshrl.u32 %v6823_v52, %v4564_v0  ;;  %v1027_v13 = vsel %vm1026_vm0, %v1025_v60, 0  ;;  %vm1234_vm2 = vcmp.gt.s32.totalorder %v1233_v26, 0 }
 0x11f   :  { %v834_v27 = vshrl.u32 %v6822_v34, %v4574_v31  ;;  %v4596_v15 = vand.u32 31, %v1131_v53  ;;  %6825 = vst [vmem:[#allocation19_spill] sm:$0xff] %v4599_v21  ;;  %v4602_v11 = vmul.f32 %v4390_v23, %v366_v61  ;;  %v940_v12 = vshll.u32 %v6822_v34, %v4541_v47 }
 0x120   :  { %v837_v20 = vshrl.u32 %v6823_v52, %v4574_v31  ;;  %v1339_v44 = vsel %vm1338_vm1, %v1337_v36, 0  ;;  %v1538_v60 = vand.u32 2139095040, %v4494_v57  ;;  %v4609_v56 = vshrl.u32 %v819_v42, 5 }
 0x121   :  { %6824 = vst [vmem:[#allocation18_spill] sm:$0xff] %v4596_v15  ;;  %6826 = vst [vmem:[#allocation20_spill] sm:$0xff] %v4602_v11  ;;  %v833_v55 = vshll.u32 %v6821_v8, %v4547_v5  ;;  %v4613_v33 = vand.u32 31, %v1027_v13  ;;  %v1235_v45 = vsel %vm1234_vm2, %v1233_v26, 0  ;;  %v4615_v0 = vor.u32 %v938_v62, %v937_v43 }
 0x122   :  { %6827 = vst [vmem:[#allocation21_spill] sm:$0xff] %v4609_v56  ;;  %v942_v23 = vor.u32 %v941_v1, %v940_v12  ;;  %v836_v61 = vshll.u32 %v6822_v34, %v4547_v5  ;;  %v1434_v47 = vand.u32 2139095040, %v4497_v58  ;;  %v4622_v36 = vsel %vm738_vm13, %v734_v17, 1326507024 }
 0x123   :  { %6828 = vst [vmem:[#allocation22_spill] sm:$0xff] %v4613_v33  ;;  %6829 = vst [vmem:[#allocation23_spill] sm:$0xff] %v4615_v0  ;;  %v4624_v42 = vor.u32 %v834_v27, %v833_v55  ;;  %v4627_v57 = vsub.s32 32, %v4596_v15  ;;  %v4629_v31 = vand.u32 31, %v1339_v44  ;;  %v4634_v26 = vsel %vm634_vm15, %v4570_v50, 920167782 }
 0x124   :  { %v838_v43 = vor.u32 %v837_v20, %v836_v61  ;;  %v4636_v62 = vand.u32 31, %v1235_v45  ;;  %v1539_v1 = vshrl.u32 %v1538_v60, 23  ;;  %v4640_v17 = vsel %vm634_vm15, %v630_v54, 1326507024 }
 0x125   :  { %6830 = vst [vmem:[#allocation24_spill] sm:$0xff] %v4624_v42  ;;  %6831 = vst [vmem:[#allocation25_spill] sm:$0xff] %v4627_v57  ;;  %vm946_vm3 = vcmp.lt.s32.totalorder %v4576_v3, 4  ;;  %v4643_v55 = vshrl.u32 %v1131_v53, 5  ;;  %v4646_v27 = vsub.s32 32, %v4613_v33  ;;  %vm842_vm4 = vcmp.lt.s32.totalorder %v4609_v56, 4 }
 0x126   :  { %6832 = vst [vmem:[#allocation26_spill] sm:$0xff] %v4629_v31  ;;  %6833 = vst [vmem:[#allocation27_spill] sm:$0xff] %v4636_v62  ;;  %v4651_v12 = vsel %vm946_vm3, %v4615_v0, 920167782  ;;  %v4655_v20 = vsel %vm946_vm3, %v942_v23, 1326507024  ;;  %v1146_v60 = vshrl.u32 %v6822_v34, %v4627_v57 }
 0x127   :  { %6834 = vst [vmem:[#allocation28_spill] sm:$0xff] %v4646_v27  ;;  %6835 = vst [vmem:[#allocation29_spill] sm:$0xff] %v4651_v12  ;;  %v1435_v54 = vshrl.u32 %v1434_v47, 23  ;;  %v4661_v53 = vsel %vm842_vm4, %v4624_v42, 920167782  ;;  %v4665_v61 = vshrl.u32 %v1027_v13, 5  ;;  %v1149_v47 = vshrl.u32 %v6823_v52, %v4627_v57 }
 0x128   :  { %6836 = vst [vmem:[#allocation30_spill] sm:$0xff] %v4655_v20  ;;  %6837 = vst [vmem:[#allocation31_spill] sm:$0xff] %v4661_v53  ;;  %v4668_v58 = vsub.s32 32, %v4629_v31  ;;  %v4672_v23 = vsel %vm842_vm4, %v838_v43, 1326507024  ;;  %v4677_v5 = vsub.s32 32, %v4636_v62  ;;  %v1145_v53 = vshll.u32 %v6821_v8, %v4596_v15 }
 0x129   :  { %6839 = vst [vmem:[#allocation33_spill] sm:$0xff] %v4672_v23  ;;  %v3850_v42 = vadd.s32 4294967169, %v1539_v1  ;;  %v1148_v13 = vshll.u32 %v6822_v34, %v4596_v15  ;;  %vm1154_vm5 = vcmp.lt.s32.totalorder %v4643_v55, 4  ;;  %v1042_v56 = vshrl.u32 %v6822_v34, %v4646_v27 }
 0x12a   :  { %6838 = vst [vmem:[#allocation32_spill] sm:$0xff] %v4668_v58  ;;  %6840 = vst [vmem:[#allocation34_spill] sm:$0xff] %v4677_v5  ;;  %v1041_v43 = vshll.u32 %v6821_v8, %v4613_v33  ;;  %v1044_v57 = vshll.u32 %v6822_v34, %v4613_v33  ;;  %v1045_v1 = vshrl.u32 %v6823_v52, %v4646_v27  ;;  %v3846_v23 = vadd.s32 4294967169, %v1435_v54 }
 0x12b   :  { %v4692_v0 = vor.u32 %v1146_v60, %v1145_v53  ;;  %vm1050_vm6 = vcmp.lt.s32.totalorder %v4665_v61, 4  ;;  %v1354_v15 = vshrl.u32 %v6822_v34, %v4668_v58  ;;  %v1357_v20 = vshrl.u32 %v6823_v52, %v4668_v58 }
 0x12c   :  { %v1150_v12 = vor.u32 %v1149_v47, %v1148_v13  ;;  %v1250_v3 = vshrl.u32 %v6822_v34, %v4677_v5  ;;  %v1253_v33 = vshrl.u32 %v6823_v52, %v4677_v5  ;;  %v1545_v32 = vadd.s32 1, %v3850_v42 }
 0x12d   :  { %v4703_v27 = vor.u32 %v1042_v56, %v1041_v43  ;;  %v4705_v54 = vshrl.u32 %v1339_v44, 5  ;;  %v1353_v53 = vshll.u32 %v6821_v8, %v4629_v31  ;;  %v1356_v60 = vshll.u32 %v6822_v34, %v4629_v31 }
 0x12e   :  { %v1046_v50 = vor.u32 %v1045_v1, %v1044_v57  ;;  %v1249_v47 = vshll.u32 %v6821_v8, %v4636_v62  ;;  %v1252_v13 = vshll.u32 %v6822_v34, %v4636_v62  ;;  %v1441_v58 = vadd.s32 1, %v3846_v23 }
 0x12f   :  { %6841 = vst [vmem:[#allocation35_spill] sm:$0xff] %v4703_v27  ;;  %6842 = vst [vmem:[#allocation36_spill] sm:$0xff] %v4705_v54  ;;  %v4718_v56 = vsel %vm1154_vm5, %v4692_v0, 920167782  ;;  %v4720_v44 = vor.u32 %v1354_v15, %v1353_v53  ;;  %v1358_v42 = vor.u32 %v1357_v20, %v1356_v60  ;;  %v4722_v43 = vshrl.u32 %v1235_v45, 5 }
 0x130   :  { %v4724_v5 = vor.u32 %v1250_v3, %v1249_v47  ;;  %v1254_v57 = vor.u32 %v1253_v33, %v1252_v13  ;;  %vm1546_vm7 = vcmp.gt.s32.totalorder %v1545_v32, 0  ;;  %v1746_v1 = vand.u32 2139095040, %v4579_v63 }
 0x131   :  { %6843 = vst [vmem:[#allocation37_spill] sm:$0xff] %v4720_v44  ;;  %6844 = vst [vmem:[#allocation38_spill] sm:$0xff] %v4722_v43  ;;  %v4729_v62 = vsel %vm1154_vm5, %v1150_v12, 1326507024  ;;  %v4734_v23 = vsel %vm1050_vm6, %v4703_v27, 920167782 }
 0x132   :  { %6845 = vst [vmem:[#allocation39_spill] sm:$0xff] %v4724_v5  ;;  %6846 = vst [vmem:[#allocation40_spill] sm:$0xff] %v4734_v23  ;;  %v1642_v15 = vand.u32 2139095040, %v4582_v7  ;;  %v6847_v45 = vor.u32 8388608, %v4442_v14  ;;  %v4743_v33 = vsel %vm1050_vm6, %v1046_v50, 1326507024 }
 0x133   :  { %vm6786_vm8 = vcmp.lt.s32.totalorder %v4705_v54, 4  ;;  %vm1442_vm11 = vcmp.gt.s32.totalorder %v1441_v58, 0  ;;  %v6748_v3 = vmov 2475754826   ;;  %vm6785_vm12 = vcmp.lt.s32.totalorder %v4722_v43, 4 }
 0x134   :  { %v4739_v20 = vshll.u32 %v6847_v45, 8  ;;  %v513_v12 = vshrl.u32 %v6748_v3, %v4454_v24  ;;  %v4751_v53 = vsel %vm6786_vm8, %v4720_v44, 920167782  ;;  %v4755_v14 = vsel %vm6786_vm8, %v1358_v42, 1326507024 }
 0x135   :  { %6848 = vst [vmem:[#allocation41_spill] sm:$0xff] %v4751_v53  ;;  %6849 = vst [vmem:[#allocation42_spill] sm:$0xff] %v4755_v14  ;;  %v1547_v50 = vsel %vm1546_vm7, %v1545_v32, 0  ;;  %v4761_v60 = vsel %vm6785_vm12, %v4724_v5, 920167782  ;;  %v1747_v13 = vshrl.u32 %v1746_v1, 23 }
 0x136   :  { %6850 = vst [vmem:[#allocation43_spill] sm:$0xff] %v4761_v60  ;;  %v4765_v47 = vsel %vm6785_vm12, %v1254_v57, 1326507024  ;;  %v6764_v45 = vmov 683565275   ;;  %v1443_v7 = vsel %vm1442_vm11, %v1441_v58, 0 }
 0x137   :  { %6851 = vst [vmem:[#allocation44_spill] sm:$0xff] %v4765_v47  ;;  %v512_v3 = vshll.u32 %v6764_v45, %v4436_v9  ;;  %v1643_v42 = vshrl.u32 %v1642_v15, 23  ;;  %v1954_v63 = vand.u32 2139095040, %v4599_v21  ;;  %v1850_v32 = vand.u32 2139095040, %v4602_v11 }
 0x138   :  { %v4771_v44 = vand.u32 31, %v1547_v50  ;;  %v6853_v60 = vmov 2475754826   ;;  %v6766_v43 = vmov 2131351028   ;;  %v4777_v1 = vshrl.u32 %v1547_v50, 5 }
 0x139   :  { %v514_v14 = vor.u32 %v513_v12, %v512_v3  ;;  %v515_v5 = vshll.u32 %v6853_v60, %v4436_v9  ;;  %v516_v57 = vshrl.u32 %v6766_v43, %v4454_v24  ;;  %v511_v58 = vshrl.u32 %v6764_v45, %v4454_v24 }
 0x13a   :  { %6852 = vst [vmem:[#allocation45_spill] sm:$0xff] %v4771_v44  ;;  %6854 = vst [vmem:[#allocation46_spill] sm:$0xff] %v4777_v1  ;;  %v518_v15 = vshll.u32 %v6766_v43, %v4436_v9  ;;  %v519_v11 = vshrl.u32 %v6821_v8, %v4454_v24  ;;  %v4785_v21 = vshrl.u32 %v1443_v7, 5  ;;  %v4787_v3 = vand.u32 31, %v1443_v7 }
 0x13b   :  { %v3858_v12 = vadd.s32 4294967169, %v1747_v13  ;;  %v517_v47 = vor.u32 %v516_v57, %v515_v5  ;;  %v4789_v53 = vadd.s32 4294967169, %v1643_v42  ;;  %v4791_v54 = vshrl.u32 %v1954_v63, 23 }
 0x13c   :  { %6855 = vst [vmem:[#allocation47_spill] sm:$0xff] %v4785_v21  ;;  %6856 = vst [vmem:[#allocation48_spill] sm:$0xff] %v4787_v3  ;;  %v520_v50 = vor.u32 %v519_v11, %v518_v15  ;;  %vm527_vm14 = vcmp.lt.s32.totalorder %v4451_v22, 1  ;;  %v4795_v45 = vsub.s32 32, %v4771_v44  ;;  %v4799_v9 = vshll.u32 %v6821_v8, %v4771_v44 }
 0x13d   :  { %v4801_v24 = vshrl.u32 %v1850_v32, 23  ;;  %v531_v7 = vsel %vm527_vm14, %v511_v58, %v514_v14  ;;  %vm528_vm0 = vcmp.lt.s32.totalorder %v4451_v22, 2  ;;  %vm529_vm1 = vcmp.lt.s32.totalorder %v4451_v22, 3 }
 0x13e   :  { %v532_v63 = vsel %vm530_vm9, %v520_v50, 2102212464  ;;  %v535_v5 = vsel %vm527_vm14, %v514_v14, %v517_v47  ;;  %v537_v13 = vsel %vm529_vm1, %v520_v50, %v4522_v39  ;;  %v539_v42 = vsel %vm527_vm14, %v517_v47, %v520_v50 }
 0x13f   :  { %v533_v11 = vsel %vm529_vm1, %v517_v47, %v532_v63  ;;  %v541_v57 = vsel %vm529_vm1, %v4505_v59, %v4526_v41  ;;  %v4812_v32 = vshll.u32 %v6822_v34, %v4771_v44  ;;  %v538_v15 = vsel %vm528_vm0, %v535_v5, %v537_v13 }
 0x140   :  { %v534_v58 = vsel %vm528_vm0, %v531_v7, %v533_v11  ;;  %v542_v43 = vsel %vm528_vm0, %v539_v42, %v541_v57  ;;  %v4819_v22 = vmul.u32.u64.low %v4739_v20, %v538_v15  ;;  %v4820_v14 = vmul.u32.u64.high %v4739_v20, %v538_v15, %v4819_v22 }
 0x141   :  { %v4815_v31 = vmul.u32.u64.low %v4739_v20, %v542_v43  ;;  %v4816_v23 = vmul.u32.u64.high %v4739_v20, %v542_v43, %v4815_v31  ;;  %v1562_v39 = vshrl.u32 %v6822_v34, %v4795_v45  ;;  %v4826_v59 = vsub.s32 32, %v4787_v3 }
 0x142   :  { %v6858_v41 = vmov 683565275   ;;  %v409_v50 = vshrl.u32 %v6853_v60, %v4457_v25  ;;  %v399_v43 = vor.u32 8388608, %v4471_v38  ;;  %v411_v31 = vshll.u32 %v6853_v60, %v4438_v10 }
 0x143   :  { %6857 = vst [vmem:[#allocation49_spill] sm:$0xff] %v4826_v59  ;;  %v408_v47 = vshll.u32 %v6858_v41, %v4438_v10  ;;  %v6859_v7 = vmov 2131351028   ;;  %v415_v5 = vshrl.u32 %v6821_v8, %v4457_v25  ;;  %v4841_v11 = vshrl.u32 %v6823_v52, %v4795_v45 }
 0x144   :  { %v412_v63 = vshrl.u32 %v6859_v7, %v4457_v25  ;;  %v550_v13 = vmul.u32 %v4739_v20, %v534_v58  ;;  %v414_v57 = vshll.u32 %v6859_v7, %v4438_v10  ;;  %vm552_vm9 = vc.u32 %v4816_v23, %v4819_v22 }
 0x145   :  { %v410_v42 = vor.u32 %v409_v50, %v408_v47  ;;  %v553_v38 = vadd.s32 1, %v4820_v14  ;;  %vm425_vm2 = vcmp.lt.s32.totalorder %v4467_v37, 3  ;;  %v407_v44 = vshrl.u32 %v6858_v41, %v4457_v25 }
 0x146   :  { %v413_v15 = vor.u32 %v412_v63, %v411_v31  ;;  %v416_v27 = vor.u32 %v415_v5, %v414_v57  ;;  %vm423_vm7 = vcmp.lt.s32.totalorder %v4467_v37, 1  ;;  %v437_v20 = vsel %vm425_vm2, %v4510_v18, %v4551_v6 }
 0x147   :  { %v554_v10 = vsel %vm552_vm9, %v553_v38, %v4820_v14  ;;  %vm424_vm11 = vcmp.lt.s32.totalorder %v4467_v37, 2  ;;  %v439_v47 = vshll.u32 %v399_v43, 8  ;;  %v1753_v5 = vadd.s32 1, %v3858_v12 }
 0x148   :  { %v431_v58 = vsel %vm423_vm7, %v410_v42, %v413_v15  ;;  %v555_v50 = vadd.s32 %v554_v10, %v550_v13  ;;  %v428_v31 = vsel %vm426_vm10, %v416_v27, 2102212464  ;;  %v433_v25 = vsel %vm425_vm2, %v416_v27, %v4537_v4 }
 0x149   :  { %v435_v63 = vsel %vm423_vm7, %v413_v15, %v416_v27  ;;  %v427_v57 = vsel %vm423_vm7, %v407_v44, %v410_v42  ;;  %v434_v18 = vsel %vm424_vm11, %v431_v58, %v433_v25  ;;  %v429_v43 = vsel %vm425_vm2, %v413_v15, %v428_v31 }
 0x14a   :  { %v438_v6 = vsel %vm424_vm11, %v435_v63, %v437_v20  ;;  %v556_v14 = vadd.s32 536870912, %v555_v50  ;;  %v1457_v10 = vshll.u32 %v6821_v8, %v4787_v3  ;;  %v4877_v4 = vshll.u32 %v6822_v34, %v4787_v3 }
 0x14b   :  { %v4870_v13 = vmul.u32.u64.low %v439_v47, %v438_v6  ;;  %v4871_v38 = vmul.u32.u64.high %v439_v47, %v438_v6, %v4870_v13  ;;  %v4879_v27 = vmul.u32.u64.low %v439_v47, %v434_v18  ;;  %v4880_v44 = vmul.u32.u64.high %v439_v47, %v434_v18, %v4879_v27 }
 0x14c   :  { %vm6778_vm10 = vcmp.lt.s32.totalorder %v4777_v1, 4  ;;  %v1458_v12 = vshrl.u32 %v6822_v34, %v4826_v59  ;;  %v1649_v42 = vadd.s32 1, %v4789_v53  ;;  %v4887_v15 = vshrl.u32 %v556_v14, 30 }
 0x14d   :  { %v6775_v20 = vand.u32 2147483647, %v4413_v35  ;;  %v4891_v58 = vor.u32 %v1562_v39, %v4799_v9  ;;  %v4895_v31 = vshrl.u32 %v6823_v52, %v4826_v59  ;;  %v4898_v25 = vadd.s32 4294967169, %v4791_v54 }
 0x14e   :  { %v430_v63 = vsel %vm424_vm11, %v427_v57, %v429_v43  ;;  %v1566_v53 = vor.u32 %v4841_v11, %v4812_v32  ;;  %vm1754_vm14 = vcmp.gt.s32.totalorder %v1753_v5, 0  ;;  %v558_v18 = vshll.u32 %v4887_v15, 30 }
 0x14f   :  { %6860 = vst [vmem:[#allocation50_spill] sm:$0xff] %v4891_v58  ;;  %vm448_vm0 = vc.u32 %v4871_v38, %v4879_v27  ;;  %v449_v9 = vadd.s32 1, %v4880_v44  ;;  %v721_v39 = vshrl.u32 %v6853_v60, %v4487_v51  ;;  %v724_v54 = vshrl.u32 %v6859_v7, %v4487_v51 }
 0x150   :  { %v727_v37 = vshrl.u32 %v6821_v8, %v4487_v51  ;;  %vm6784_vm1 = vcmp.lt.s32.totalorder %v4785_v21, 4  ;;  %vm1650_vm9 = vcmp.gt.s32.totalorder %v1649_v42, 0  ;;  %v4915_v32 = vsub.s32 %v555_v50, %v558_v18 }
 0x151   :  { %v446_v11 = vmul.u32 %v439_v47, %v430_v63  ;;  %v710_v57 = vand.u32 8388607, %v6775_v20  ;;  %v450_v6 = vsel %vm448_vm0, %v449_v9, %v4880_v44  ;;  %v720_v14 = vshll.u32 %v6858_v41, %v4460_v28 }
 0x152   :  { %v723_v43 = vshll.u32 %v6853_v60, %v4460_v28  ;;  %v726_v13 = vshll.u32 %v6859_v7, %v4460_v28  ;;  %v4926_v3 = vor.u32 %v1458_v12, %v1457_v10  ;;  %v4929_v50 = vadd.s32 4294967169, %v4801_v24 }
 0x153   :  { %v561_v47 = vsub.s32 0, %v4915_v32  ;;  %v451_v63 = vadd.s32 %v450_v6, %v446_v11  ;;  %v1462_v44 = vor.u32 %v4895_v31, %v4877_v4  ;;  %vm497_vm2 = vcmp.lt.s32.totalorder %v4394_v48, 0 }
 0x154   :  { %6861 = vst [vmem:[#allocation51_spill] sm:$0xff] %v4926_v3  ;;  %v722_v18 = vor.u32 %v721_v39, %v720_v14  ;;  %v725_v9 = vor.u32 %v724_v54, %v723_v43  ;;  %v728_v20 = vor.u32 %v727_v37, %v726_v13  ;;  %v1755_v59 = vsel %vm1754_vm14, %v1753_v5, 0 }
 0x155   :  { %v1651_v28 = vsel %vm1650_vm9, %v1649_v42, 0  ;;  %v3811_v10 = vmin.u32 %v561_v47, %v4915_v32  ;;  %v711_v12 = vor.u32 8388608, %v710_v57  ;;  %v4941_v24 = vsel %vm6778_vm10, %v4891_v58, 920167782 }
 0x156   :  { %6862 = vst [vmem:[#allocation52_spill] sm:$0xff] %v4941_v24  ;;  %v4945_v4 = vsel %vm6778_vm10, %v1566_v53, 1326507024  ;;  %v581_v31 = vsub.s32 4, %v4887_v15  ;;  %v452_v39 = vadd.s32 536870912, %v451_v63  ;;  %vm735_vm11 = vcmp.lt.s32.totalorder %v4512_v16, 1 }
 0x157   :  { %6863 = vst [vmem:[#allocation53_spill] sm:$0xff] %v4945_v4  ;;  %v6864_v54 = vand.u32 2147483647, %v4394_v48  ;;  %v563_v42 = vclz %v3811_v10  ;;  %vm736_vm14 = vcmp.lt.s32.totalorder %v4512_v16, 2  ;;  %vm737_vm0 = vcmp.lt.s32.totalorder %v4512_v16, 3 }
 0x158   :  { %v453_v37 = vshrl.u32 %v452_v39, 30  ;;  %v743_v53 = vsel %vm735_vm11, %v722_v18, %v725_v9  ;;  %v747_v11 = vsel %vm735_vm11, %v725_v9, %v728_v20  ;;  %v749_v57 = vsel %vm737_vm0, %v4530_v46, %v4622_v36 }
 0x159   :  { %vm4950_vm7 = vcmp.le.f32.partialorder %v6864_v54, 0.7853982  ;;  %v3812_v6 = vadd.s32 4294967294, %v563_v42  ;;  %v745_v14 = vsel %vm737_vm0, %v728_v20, %v4561_v29  ;;  %v750_v43 = vsel %vm736_vm14, %v747_v11, %v749_v57 }
 0x15a   :  { %v751_v13 = vshll.u32 %v711_v12, 8  ;;  %v4973_v47 = vsel %vm6784_vm1, %v4926_v3, 920167782  ;;  %v4975_v10 = vshrl.u32 %v1755_v59, 5  ;;  %v4977_v39 = vand.u32 31, %v1755_v59 }
 0x15b   :  { %6867 = vst [vmem:[#allocation54_spill] sm:$0xff] %v4973_v47  ;;  %v454_v54 = vshll.u32 %v453_v37, 30  ;;  %vm3813_vm9 = vcmp.lt.s32.totalorder %v3812_v6, 0  ;;  %v740_v46 = vsel %vm738_vm13, %v728_v20, 2102212464  ;;  %vm393_vm10 = vcmp.lt.s32.totalorder %v4397_v49, 0 }
 0x15c   :  { %6868 = vst [vmem:[#allocation55_spill] sm:$0xff] %v4977_v39  ;;  %v4981_v36 = vmul.u32.u64.low %v751_v13, %v750_v43  ;;  %v4982_v29 = vmul.u32.u64.high %v751_v13, %v750_v43, %v4981_v36  ;;  %v566_v42 = vsel %vm3813_vm9, 0, %v3812_v6  ;;  %v719_v11 = vshrl.u32 %v6858_v41, %v4487_v51 }
 0x15d   :  { %v4985_v12 = vsub.s32 %v451_v63, %v454_v54  ;;  %v746_v59 = vsel %vm736_vm14, %v743_v53, %v745_v14  ;;  %v551_v57 = vadd.s32 %v4819_v22, %v4816_v23  ;;  %v567_v3 = vsub.s32 32, %v566_v42 }
 0x15e   :  { %v571_v47 = vsub.s32 4294967266, %v566_v42  ;;  %v582_v20 = vsel %vm497_vm2, %v581_v31, %v4887_v15  ;;  %v568_v6 = vshll.u32 %v4915_v32, %v566_v42  ;;  %v739_v43 = vsel %vm735_vm11, %v719_v11, %v722_v18 }
 0x15f   :  { %v457_v63 = vsub.s32 0, %v4985_v12  ;;  %v741_v51 = vsel %vm737_vm0, %v725_v9, %v740_v46  ;;  %v569_v53 = vshrl.u32 %v551_v57, %v567_v3  ;;  %v5008_v22 = vsel %vm6784_vm1, %v1462_v44, 1326507024 }
 0x160   :  { %v572_v14 = vadd.s32 127, %v571_v47  ;;  %v5002_v54 = vmul.u32.u64.low %v751_v13, %v746_v59  ;;  %v5003_v23 = vmul.u32.u64.high %v751_v13, %v746_v59, %v5002_v54  ;;  %6869 = vst [vmem:[#allocation56_spill] sm:$0xff] %v5008_v22  ;;  %v5010_v15 = vshrl.u32 %v1651_v28, 5 }
 0x161   :  { %v584_v32 = vsel %vm4950_vm7, 0, %v582_v20  ;;  %v3807_v18 = vmin.u32 %v457_v63, %v4985_v12  ;;  %v570_v31 = vor.u32 %v569_v53, %v568_v6  ;;  %v477_v9 = vsub.s32 4, %v453_v37 }
 0x162   :  { %6870 = vst [vmem:[#allocation57_spill] sm:$0xff] %v5010_v15  ;;  %v573_v36 = vshll.u32 %v572_v14, 23  ;;  %v742_v3 = vsel %vm736_vm14, %v739_v43, %v741_v51  ;;  %v5018_v47 = vsub.s32 32, %v4977_v39  ;;  %v5020_v46 = vand.u32 31, %v1651_v28 }
 0x163   :  { %v459_v44 = vclz %v3807_v18  ;;  %v6780_v42 = vand.u32 2147483647, %v4418_v40  ;;  %v447_v59 = vadd.s32 %v4879_v27, %v4871_v38  ;;  %vm760_vm13 = vc.u32 %v4982_v29, %v5002_v54 }
 0x164   :  { %6871 = vst [vmem:[#allocation58_spill] sm:$0xff] %v5018_v47  ;;  %6872 = vst [vmem:[#allocation59_spill] sm:$0xff] %v5020_v46  ;;  %v574_v11 = vor.u32 4788187, %v573_v36  ;;  %v761_v57 = vadd.s32 1, %v5003_v23  ;;  %v588_v20 = vadd.s32 3, %v584_v32  ;;  %v758_v43 = vmul.u32 %v751_v13, %v742_v3 }
 0x165   :  { %v5028_v16 = vand.u32 3, %v584_v32  ;;  %v6873_v6 = vand.u32 2147483647, %v4397_v49  ;;  %v3808_v63 = vadd.s32 4294967294, %v459_v44  ;;  %v577_v53 = vcvt.s32.f32 %v570_v31 }
 0x166   :  { %v575_v51 = vand.u32 2147483647, %v574_v11  ;;  %v478_v38 = vsel %vm393_vm10, %v477_v9, %v453_v37  ;;  %v762_v27 = vsel %vm760_vm13, %v761_v57, %v5003_v23  ;;  %v606_v32 = vand.u32 8388607, %v6780_v42 }
 0x167   :  { %vm5032_vm11 = vcmp.le.f32.partialorder %v6873_v6, 0.7853982  ;;  %vm3809_vm14 = vcmp.lt.s32.totalorder %v3808_v63, 0  ;;  %v763_v14 = vadd.s32 %v762_v27, %v758_v43  ;;  %v617_v18 = vshrl.u32 %v6853_v60, %v4517_v30 }
 0x168   :  { %v578_v36 = vmul.f32 %v577_v53, %v575_v51  ;;  %v462_v6 = vsel %vm3809_vm14, 0, %v3808_v63  ;;  %v620_v13 = vshrl.u32 %v6859_v7, %v4517_v30  ;;  %v623_v31 = vshrl.u32 %v6821_v8, %v4517_v30 }
 0x169   :  { %v463_v3 = vsub.s32 32, %v462_v6  ;;  %v467_v37 = vsub.s32 4294967266, %v462_v6  ;;  %v764_v9 = vadd.s32 536870912, %v763_v14  ;;  %v622_v23 = vshll.u32 %v6859_v7, %v4503_v2 }
 0x16a   :  { %v579_v44 = vxor.u32 2147483648, %v578_v36  ;;  %v464_v11 = vshll.u32 %v4985_v12, %v462_v6  ;;  %v616_v57 = vshll.u32 %v6858_v41, %v4503_v2  ;;  %v619_v63 = vshll.u32 %v6853_v60, %v4503_v2 }
 0x16b   :  { %v465_v43 = vshrl.u32 %v447_v59, %v463_v3  ;;  %v468_v51 = vadd.s32 127, %v467_v37  ;;  %v5054_v53 = vshrl.u32 %v764_v9, 30  ;;  %v624_v27 = vor.u32 %v623_v31, %v622_v23  ;;  %v6876_v9 = vld [vmem:[#allocation13_spill] sm:$0xff] }
 0x16c   :  { %v580_v42 = vsel %vm497_vm2, %v579_v44, %v578_v36  ;;  %v5058_v22 = vand.u32 3, %v588_v20  ;;  %v618_v21 = vor.u32 %v617_v18, %v616_v57  ;;  %v621_v58 = vor.u32 %v620_v13, %v619_v63 }
 0x16d   :  { %v583_v12 = vsel %vm4950_vm7, %v4394_v48, %v580_v42  ;;  %v466_v6 = vor.u32 %v465_v43, %v464_v11  ;;  %v469_v4 = vshll.u32 %v468_v51, 23  ;;  %v766_v2 = vshll.u32 %v5054_v53, 30 }
 0x16e   :  { %4010 = vcosq.f32 %v583_v12  ;;  %v480_v59 = vsel %vm5032_vm11, 0, %v478_v38  ;;  %v607_v31 = vor.u32 8388608, %v606_v32  ;;  %vm631_vm0 = vcmp.lt.s32.totalorder %v4528_v19, 1 }
 0x16f   :  { %4012 = vsinq.f32 %v583_v12  ;;  %v470_v20 = vor.u32 4788187, %v469_v4  ;;  %v5067_v36 = vsub.s32 %v763_v14, %v766_v2  ;;  %v636_v18 = vsel %vm634_vm15, %v624_v27, 2102212464 }
 0x170   :  { %vm705_vm2 = vcmp.lt.s32.totalorder %v4413_v35, 0  ;;  %v615_v5 = vshrl.u32 %v6858_v41, %v4517_v30  ;;  %vm633_vm7 = vcmp.lt.s32.totalorder %v4528_v19, 3  ;;  %v639_v42 = vsel %vm631_vm0, %v618_v21, %v621_v58 }
 0x171   :  { %v643_v13 = vsel %vm631_vm0, %v621_v58, %v624_v27  ;;  %v471_v38 = vand.u32 2147483647, %v470_v20  ;;  %v473_v32 = vcvt.s32.f32 %v466_v6  ;;  %v769_v3 = vsub.s32 0, %v5067_v36 }
 0x172   :  { %v641_v4 = vsel %vm633_vm7, %v624_v27, %v4634_v26  ;;  %vm632_vm9 = vcmp.lt.s32.totalorder %v4528_v19, 2  ;;  %v635_v14 = vsel %vm631_vm0, %v615_v5, %v618_v21  ;;  %v637_v37 = vsel %vm633_vm7, %v621_v58, %v636_v18 }
 0x173   :  { %v645_v23 = vsel %vm633_vm7, %v6876_v9, %v4640_v17  ;;  %vm2253_vm15 = vcmp.eq.s32.totalorder %v5028_v16, 0  ;;  %v474_v30 = vmul.f32 %v473_v32, %v471_v38  ;;  %v3819_v44 = vmin.u32 %v769_v3, %v5067_v36 }
 0x174   :  { %v646_v11 = vsel %vm632_vm9, %v643_v13, %v645_v23  ;;  %v647_v57 = vshll.u32 %v607_v31, 8  ;;  %vm2252_vm13 = vcmp.lt.s32.totalorder %v5028_v16, 2  ;;  %vm2256_vm14 = vcmp.eq.s32.totalorder %v5028_v16, 2 }
 0x175   :  { %v484_v26 = vadd.s32 3, %v480_v59  ;;  %v789_v21 = vsub.s32 4, %v5054_v53  ;;  %v642_v58 = vsel %vm632_vm9, %v639_v42, %v641_v4  ;;  %vm587_vm0 = vweird.f32 %v4394_v48 }
 0x176   :  { %v475_v17 = vxor.u32 2147483648, %v474_v30  ;;  %v771_v63 = vclz %v3819_v44  ;;  %v5090_v43 = vmul.u32.u64.low %v647_v57, %v646_v11  ;;  %v5091_v51 = vmul.u32.u64.high %v647_v57, %v646_v11, %v5090_v43 }
 0x177   :  { %vm590_vm7 = vcmp.lt.s32.totalorder %v5058_v22, 2  ;;  %vm591_vm1 = vcmp.eq.s32.totalorder %v5058_v22, 0  ;;  %vm594_vm12 = vcmp.eq.s32.totalorder %v5058_v22, 2  ;;  %v6877_v27 = vand.u32 2147483647, %v4413_v35  ;;  %v6881_v43 = vld [vmem:[#allocation2_spill] sm:$0xff] }
 0x178   :  { %v638_v6 = vsel %vm632_vm9, %v635_v14, %v637_v37  ;;  %v476_v2 = vsel %vm393_vm10, %v475_v17, %v474_v30  ;;  %v3820_v31 = vadd.s32 4294967294, %v771_v63  ;;  %v4011_v5 = vpop.eup %4010  ;;  %v5113_v13 = vand.u32 3, %v484_v26 }
 0x179   :  { %vm5098_vm8 = vcmp.le.f32.partialorder %v6877_v27, 0.7853982  ;;  %v5106_v20 = vmul.u32.u64.low %v647_v57, %v642_v58  ;;  %v5107_v18 = vmul.u32.u64.high %v647_v57, %v642_v58, %v5106_v20  ;;  %v479_v42 = vsel %vm5032_vm11, %v4397_v49, %v476_v2  ;;  %v4013_v32 = vpop.eup %4012 }
 0x17a   :  { %v5115_v38 = vand.u32 3, %v480_v59  ;;  %v759_v19 = vadd.s32 %v5002_v54, %v4982_v29  ;;  %v595_v3 = vxor.u32 2147483648, %v4011_v5  ;;  %4014 = vcosq.f32 %v479_v42 }
 0x17b   :  { %vm3821_vm10 = vcmp.lt.s32.totalorder %v3820_v31, 0  ;;  %v790_v4 = vsel %vm705_vm2, %v789_v21, %v5054_v53  ;;  %v592_v14 = vxor.u32 2147483648, %v4013_v32  ;;  %4016 = vsinq.f32 %v479_v42 }
 0x17c   :  { %v774_v37 = vsel %vm3821_vm10, 0, %v3820_v31  ;;  %v654_v28 = vmul.u32 %v647_v57, %v638_v6  ;;  %v2258_v9 = vsel %vm2256_vm14, %v595_v3, %v4013_v32  ;;  %v596_v59 = vsel %vm594_vm12, %v595_v3, %v4013_v32 }
 0x17d   :  { %v775_v23 = vsub.s32 32, %v774_v37  ;;  %vm656_vm11 = vc.u32 %v5091_v51, %v5106_v20  ;;  %v2255_v29 = vsel %vm2253_vm15, %v4011_v5, %v592_v14  ;;  %v593_v54 = vsel %vm591_vm1, %v4011_v5, %v592_v14  ;;  %v6882_v5 = vld [vmem:[#allocation12_spill] sm:$0xff] }
 0x17e   :  { %v779_v53 = vsub.s32 4294967266, %v774_v37  ;;  %v657_v30 = vadd.s32 1, %v5107_v18  ;;  %v2259_v44 = vsel %vm2252_vm13, %v2255_v29, %v2258_v9  ;;  %v597_v11 = vsel %vm590_vm7, %v593_v54, %v596_v59 }
 0x17f   :  { %v776_v57 = vshll.u32 %v5067_v36, %v774_v37  ;;  %v777_v26 = vshrl.u32 %v759_v19, %v775_v23  ;;  %v2260_v21 = vsel %vm587_vm0, nan, %v2259_v44  ;;  %v5142_v58 = vsel %vm587_vm0, nan, %v597_v11 }
 0x180   :  { %6880 = vst [vmem:[#allocation13_spill] sm:$0xff] %v5142_v58  ;;  %v780_v17 = vadd.s32 127, %v779_v53  ;;  %v658_v63 = vsel %vm656_vm11, %v657_v30, %v5107_v18  ;;  %v5147_v16 = vshll.u32 %v6821_v8, %v4977_v39  ;;  %3721 = vrot.lane.b32.xlu1 %v2260_v21, %s4085_s0  ;;  %v792_v22 = vsel %vm5098_vm8, 0, %v790_v4  ;;  %v6883_v4 = vld [vmem:[#allocation10_spill] sm:$0xff] }
 0x181   :  { %v659_v36 = vadd.s32 %v658_v63, %v654_v28  ;;  %v6787_v27 = vand.u32 2147483647, %v6881_v43  ;;  %vm483_vm12 = vweird.f32 %v4397_v49  ;;  %vm2149_vm1 = vcmp.lt.s32.totalorder %v5115_v38, 2 }
 0x182   :  { %vm2150_vm9 = vcmp.eq.s32.totalorder %v5115_v38, 0  ;;  %v778_v48 = vor.u32 %v777_v26, %v776_v57  ;;  %v781_v6 = vshll.u32 %v780_v17, 23  ;;  %vm486_vm15 = vcmp.lt.s32.totalorder %v5113_v13, 2 }
 0x183   :  { %vm487_vm13 = vcmp.eq.s32.totalorder %v5113_v13, 0  ;;  %vm2153_vm14 = vcmp.eq.s32.totalorder %v5115_v38, 2  ;;  %v660_v2 = vadd.s32 536870912, %v659_v36  ;;  %vm490_vm0 = vcmp.eq.s32.totalorder %v5113_v13, 2 }
 0x184   :  { %v782_v31 = vor.u32 4788187, %v781_v6  ;;  %v796_v18 = vadd.s32 3, %v792_v22  ;;  %v929_v42 = vshrl.u32 %v6853_v60, %v6882_v5  ;;  %v4015_v19 = vpop.eup %4014  ;;  %v918_v3 = vand.u32 8388607, %v6787_v27 }
 0x185   :  { %v5162_v32 = vshrl.u32 %v660_v2, 30  ;;  %v928_v14 = vshll.u32 %v6858_v41, %v6883_v4  ;;  %v935_v37 = vshrl.u32 %v6821_v8, %v6882_v5  ;;  %v4017_v28 = vpop.eup %4016  ;;  %v491_v9 = vxor.u32 2147483648, %v4015_v19 }
 0x186   :  { %v783_v59 = vand.u32 2147483647, %v782_v31  ;;  %v785_v23 = vcvt.s32.f32 %v778_v48  ;;  %v932_v29 = vshrl.u32 %v6859_v7, %v6882_v5  ;;  %v488_v54 = vxor.u32 2147483648, %v4017_v28 }
 0x187   :  { %v662_v53 = vshll.u32 %v5162_v32, 30  ;;  %v931_v30 = vshll.u32 %v6853_v60, %v6883_v4  ;;  %v934_v44 = vshll.u32 %v6859_v7, %v6883_v4  ;;  %v2155_v11 = vsel %vm2153_vm14, %v491_v9, %v4017_v28 }
 0x188   :  { %v492_v57 = vsel %vm490_vm0, %v491_v9, %v4017_v28  ;;  %v786_v26 = vmul.f32 %v785_v23, %v783_v59  ;;  %v930_v21 = vor.u32 %v929_v42, %v928_v14  ;;  %v2152_v17 = vsel %vm2150_vm9, %v4015_v19, %v488_v54  ;;  %v6886_v23 = vld [vmem:[#allocation29_spill] sm:$0xff] }
 0x189   :  { %v489_v63 = vsel %vm487_vm13, %v4015_v19, %v488_v54  ;;  %v5185_v48 = vsub.s32 %v659_v36, %v662_v53  ;;  %v936_v6 = vor.u32 %v935_v37, %v934_v44  ;;  %v2156_v2 = vsel %vm2149_vm1, %v2152_v17, %v2155_v11  ;;  %v6885_v37 = vld [vmem:[#allocation15_spill] sm:$0xff]  ;;  %v6887_v44 = vld [vmem:[#allocation30_spill] sm:$0xff] }
 0x18a   :  { %v493_v31 = vsel %vm486_vm15, %v489_v63, %v492_v57  ;;  %v787_v4 = vxor.u32 2147483648, %v786_v26  ;;  %v933_v27 = vor.u32 %v932_v29, %v931_v30  ;;  %v2157_v42 = vsel %vm483_vm12, nan, %v2156_v2  ;;  %v6888_v11 = vld [vmem:[#allocation23_spill] sm:$0xff] }
 0x18b   :  { %v5195_v14 = vsel %vm483_vm12, nan, %v493_v31  ;;  %v5197_v28 = vand.u32 3, %v792_v22  ;;  %v665_v36 = vsub.s32 0, %v5185_v48  ;;  %3719 = vrot.lane.b32.xlu0 %v2157_v42, %s4085_s0  ;;  %v919_v13 = vor.u32 8388608, %v918_v3 }
 0x18c   :  { %6884 = vst [vmem:[#allocation2_spill] sm:$0xff] %v5195_v14  ;;  %v788_v38 = vsel %vm705_vm2, %v787_v4, %v786_v26  ;;  %v927_v19 = vshrl.u32 %v6858_v41, %v6882_v5  ;;  %vm943_vm7 = vcmp.lt.s32.totalorder %v6885_v37, 1  ;;  %vm945_vm10 = vcmp.lt.s32.totalorder %v6885_v37, 3 }
 0x18d   :  { %v791_v49 = vsel %vm5098_vm8, %v4413_v35, %v788_v38  ;;  %v3815_v22 = vmin.u32 %v665_v36, %v5185_v48  ;;  %v948_v9 = vsel %vm946_vm3, %v936_v6, 2102212464  ;;  %v5213_v59 = vand.u32 3, %v796_v18 }
 0x18e   :  { %4018 = vcosq.f32 %v791_v49  ;;  %v951_v3 = vsel %vm943_vm7, %v930_v21, %v933_v27  ;;  %v953_v29 = vsel %vm945_vm10, %v936_v6, %v6886_v23  ;;  %vm944_vm2 = vcmp.lt.s32.totalorder %v6885_v37, 2 }
 0x18f   :  { %4020 = vsinq.f32 %v791_v49  ;;  %v667_v5 = vclz %v3815_v22  ;;  %v947_v54 = vsel %vm943_vm7, %v927_v19, %v930_v21  ;;  %v685_v12 = vsub.s32 4, %v5162_v32  ;;  %v6889_v21 = vld [vmem:[#allocation3_spill] sm:$0xff] }
 0x190   :  { %v949_v53 = vsel %vm945_vm10, %v933_v27, %v948_v9  ;;  %v955_v30 = vsel %vm943_vm7, %v933_v27, %v936_v6  ;;  %v957_v57 = vsel %vm945_vm10, %v6888_v11, %v6887_v44  ;;  %v954_v18 = vsel %vm944_vm2, %v951_v3, %v953_v29  ;;  %v6890_v9 = vld [vmem:[#allocation11_spill] sm:$0xff] }
 0x191   :  { %v3816_v26 = vadd.s32 4294967294, %v667_v5  ;;  %v958_v17 = vsel %vm944_vm2, %v955_v30, %v957_v57  ;;  %v959_v63 = vshll.u32 %v919_v13, 8  ;;  %vm802_vm3 = vcmp.eq.s32.totalorder %v5213_v59, 2 }
 0x192   :  { %vm2462_vm8 = vcmp.eq.s32.totalorder %v5197_v28, 2  ;;  %vm601_vm11 = vcmp.lt.s32.totalorder %v4418_v40, 0  ;;  %v6788_v2 = vand.u32 2147483647, %v6889_v21  ;;  %vm799_vm12 = vcmp.eq.s32.totalorder %v5213_v59, 0 }
 0x193   :  { %vm2459_vm1 = vcmp.eq.s32.totalorder %v5197_v28, 0  ;;  %vm3817_vm9 = vcmp.lt.s32.totalorder %v3816_v26, 0  ;;  %v950_v27 = vsel %vm944_vm2, %v947_v54, %v949_v53  ;;  %vm798_vm15 = vcmp.lt.s32.totalorder %v5213_v59, 2 }
 0x194   :  { %v5232_v6 = vmul.u32.u64.low %v959_v63, %v958_v17  ;;  %v5233_v31 = vmul.u32.u64.high %v959_v63, %v958_v17, %v5232_v6  ;;  %vm2458_vm13 = vcmp.lt.s32.totalorder %v5197_v28, 2  ;;  %v655_v4 = vadd.s32 %v5106_v20, %v5091_v51  ;;  %v6891_v20 = vld [vmem:[#allocation14_spill] sm:$0xff] }
 0x195   :  { %v670_v42 = vsel %vm3817_vm9, 0, %v3816_v26  ;;  %v5239_v36 = vmul.u32.u64.low %v959_v63, %v954_v18  ;;  %v5240_v38 = vmul.u32.u64.high %v959_v63, %v954_v18, %v5239_v36  ;;  %vm795_vm14 = vweird.f32 %v4413_v35 }
 0x196   :  { %v671_v13 = vsub.s32 32, %v670_v42  ;;  %v675_v19 = vsub.s32 4294967266, %v670_v42  ;;  %v686_v37 = vsel %vm601_vm11, %v685_v12, %v5162_v32  ;;  %v814_v49 = vand.u32 8388607, %v6788_v2 }
 0x197   :  { %v966_v22 = vmul.u32 %v959_v63, %v950_v27  ;;  %v824_v51 = vshll.u32 %v6858_v41, %v6890_v9  ;;  %v825_v3 = vshrl.u32 %v6853_v60, %v6891_v20  ;;  %v828_v23 = vshrl.u32 %v6859_v7, %v6891_v20 }
 0x198   :  { %v672_v29 = vshll.u32 %v5185_v48, %v670_v42  ;;  %v673_v5 = vshrl.u32 %v655_v4, %v671_v13  ;;  %v676_v54 = vadd.s32 127, %v675_v19  ;;  %vm968_vm0 = vc.u32 %v5233_v31, %v5239_v36  ;;  %v4019_v32 = vpop.eup %4018  ;;  %v6892_v19 = vld [vmem:[#allocation21_spill] sm:$0xff] }
 0x199   :  { %v969_v12 = vadd.s32 1, %v5240_v38  ;;  %v815_v53 = vor.u32 8388608, %v814_v49  ;;  %v827_v30 = vshll.u32 %v6853_v60, %v6890_v9  ;;  %v830_v44 = vshll.u32 %v6859_v7, %v6890_v9  ;;  %v4021_v11 = vpop.eup %4020 }
 0x19a   :  { %v803_v57 = vxor.u32 2147483648, %v4019_v32  ;;  %v674_v26 = vor.u32 %v673_v5, %v672_v29  ;;  %v677_v18 = vshll.u32 %v676_v54, 23  ;;  %v831_v48 = vshrl.u32 %v6821_v8, %v6891_v20 }
 0x19b   :  { %v800_v17 = vxor.u32 2147483648, %v4021_v11  ;;  %v970_v63 = vsel %vm968_vm0, %v969_v12, %v5240_v38  ;;  %v826_v27 = vor.u32 %v825_v3, %v824_v51  ;;  %v829_v6 = vor.u32 %v828_v23, %v827_v30 }
 0x19c   :  { %v804_v4 = vsel %vm802_vm3, %v803_v57, %v4021_v11  ;;  %v2464_v42 = vsel %vm2462_vm8, %v803_v57, %v4021_v11  ;;  %v678_v13 = vor.u32 4788187, %v677_v18  ;;  %vm839_vm7 = vcmp.lt.s32.totalorder %v6892_v19, 1 }
 0x19d   :  { %v801_v49 = vsel %vm799_vm12, %v4019_v32, %v800_v17  ;;  %v2461_v9 = vsel %vm2459_vm1, %v4019_v32, %v800_v17  ;;  %v971_v29 = vadd.s32 %v970_v63, %v966_v22  ;;  %v832_v5 = vor.u32 %v831_v48, %v830_v44  ;;  %v6897_v44 = vld [vmem:[#allocation31_spill] sm:$0xff]  ;;  %v6898_v17 = vld [vmem:[#allocation33_spill] sm:$0xff]  ;;  %v6899_v63 = vld [vmem:[#allocation24_spill] sm:$0xff] }
 0x19e   :  { %v805_v38 = vsel %vm798_vm15, %v801_v49, %v804_v4  ;;  %v2465_v51 = vsel %vm2458_vm13, %v2461_v9, %v2464_v42  ;;  %v679_v3 = vand.u32 2147483647, %v678_v13  ;;  %v681_v23 = vcvt.s32.f32 %v674_v26 }
 0x19f   :  { %v5281_v54 = vsel %vm795_vm14, nan, %v805_v38  ;;  %v2466_v12 = vsel %vm795_vm14, nan, %v2465_v51  ;;  %v972_v30 = vadd.s32 536870912, %v971_v29  ;;  %vm841_vm10 = vcmp.lt.s32.totalorder %v6892_v19, 3 }
 0x1a0   :  { %6893 = vst [vmem:[#allocation12_spill] sm:$0xff] %v5281_v54  ;;  %3725 = vrot.lane.b32.xlu1 %v2466_v12, %s4085_s0  ;;  %v6894_v59 = vand.u32 2147483647, %v4418_v40  ;;  %v682_v28 = vmul.f32 %v681_v23, %v679_v3  ;;  %v847_v32 = vsel %vm839_vm7, %v826_v27, %v829_v6  ;;  %v849_v35 = vsel %vm841_vm10, %v832_v5, %v6897_v44 }
 0x1a1   :  { %v973_v57 = vshrl.u32 %v972_v30, 30  ;;  %vm840_vm3 = vcmp.lt.s32.totalorder %v6892_v19, 2  ;;  %v851_v26 = vsel %vm839_vm7, %v829_v6, %v832_v5  ;;  %v844_v48 = vsel %vm842_vm4, %v832_v5, 2102212464 }
 0x1a2   :  { %vm5289_vm2 = vcmp.le.f32.partialorder %v6894_v59, 0.7853982  ;;  %v683_v18 = vxor.u32 2147483648, %v682_v28  ;;  %v853_v4 = vsel %vm841_vm10, %v6899_v63, %v6898_v17  ;;  %v855_v42 = vshll.u32 %v815_v53, 8 }
 0x1a3   :  { %v688_v11 = vsel %vm5289_vm2, 0, %v686_v37  ;;  %v974_v13 = vshll.u32 %v973_v57, 30  ;;  %v823_v37 = vshrl.u32 %v6858_v41, %v6891_v20  ;;  %v850_v49 = vsel %vm840_vm3, %v847_v32, %v849_v35 }
 0x1a4   :  { %v854_v9 = vsel %vm840_vm3, %v851_v26, %v853_v4  ;;  %v684_v38 = vsel %vm601_vm11, %v683_v18, %v682_v28  ;;  %v692_v5 = vadd.s32 3, %v688_v11  ;;  %v845_v12 = vsel %vm841_vm10, %v829_v6, %v844_v48 }
 0x1a5   :  { %v5317_v51 = vmul.u32.u64.low %v855_v42, %v854_v9  ;;  %v5318_v3 = vmul.u32.u64.high %v855_v42, %v854_v9, %v5317_v51  ;;  %v687_v53 = vsel %vm5289_vm2, %v4418_v40, %v684_v38  ;;  %v5323_v23 = vsub.s32 %v971_v29, %v974_v13 }
 0x1a6   :  { %v843_v20 = vsel %vm839_vm7, %v823_v37, %v826_v27  ;;  %v5330_v30 = vsub.s32 32, %v5020_v46  ;;  %4022 = vcosq.f32 %v687_v53  ;;  %v5338_v22 = vshll.u32 %v6822_v34, %v4977_v39  ;;  %v6901_v37 = vld [vmem:[#allocation4_spill] sm:$0xff] }
 0x1a7   :  { %v5332_v59 = vmul.u32.u64.low %v855_v42, %v850_v49  ;;  %v5333_v28 = vmul.u32.u64.high %v855_v42, %v850_v49, %v5332_v59  ;;  %v5342_v29 = vshll.u32 %v6821_v8, %v5020_v46  ;;  %4024 = vsinq.f32 %v687_v53  ;;  %v6911_v53 = vld [vmem:[#allocation22_spill] sm:$0xff] }
 0x1a8   :  { %6900 = vst [vmem:[#allocation10_spill] sm:$0xff] %v5330_v30  ;;  %v977_v27 = vsub.s32 0, %v5323_v23  ;;  %v5347_v6 = vshrl.u32 %v6822_v34, %v5018_v47  ;;  %v5351_v32 = vshll.u32 %v6822_v34, %v5020_v46  ;;  %v2354_v44 = vand.u32 3, %v688_v11 }
 0x1a9   :  { %v846_v35 = vsel %vm840_vm3, %v843_v20, %v845_v12  ;;  %v5357_v26 = vshrl.u32 %v6823_v52, %v5018_v47  ;;  %v693_v18 = vand.u32 3, %v692_v5  ;;  %vm864_vm4 = vc.u32 %v5318_v3, %v5332_v59  ;;  %v6905_v12 = vld [vmem:[#allocation25_spill] sm:$0xff] }
 0x1aa   :  { %v3827_v48 = vmin.u32 %v977_v27, %v5323_v23  ;;  %v5364_v17 = vshrl.u32 %v6822_v34, %v5330_v30  ;;  %v5368_v11 = vshrl.u32 %v6823_v52, %v5330_v30  ;;  %v997_v19 = vsub.s32 4, %v973_v57 }
 0x1ab   :  { %v865_v63 = vadd.s32 1, %v5333_v28  ;;  %vm913_vm8 = vcmp.lt.s32.totalorder %v6881_v43, 0  ;;  %v862_v13 = vmul.u32 %v855_v42, %v846_v35  ;;  %v6789_v49 = vand.u32 2147483647, %v6901_v37 }
 0x1ac   :  { %v979_v4 = vclz %v3827_v48  ;;  %vm2355_vm11 = vcmp.lt.s32.totalorder %v2354_v44, 2  ;;  %vm2356_vm12 = vcmp.eq.s32.totalorder %v2354_v44, 0  ;;  %vm2359_vm1 = vcmp.eq.s32.totalorder %v2354_v44, 2  ;;  %v6906_v48 = vld [vmem:[#allocation18_spill] sm:$0xff] }
 0x1ad   :  { %v866_v9 = vsel %vm864_vm4, %v865_v63, %v5333_v28  ;;  %vm691_vm9 = vweird.f32 %v4418_v40  ;;  %vm694_vm15 = vcmp.lt.s32.totalorder %v693_v18, 2  ;;  %vm695_vm13 = vcmp.eq.s32.totalorder %v693_v18, 0 }
 0x1ae   :  { %v3828_v38 = vadd.s32 4294967294, %v979_v4  ;;  %v867_v5 = vadd.s32 %v866_v9, %v862_v13  ;;  %vm698_vm14 = vcmp.eq.s32.totalorder %v693_v18, 2  ;;  %v6902_v51 = vand.u32 2147483647, %v6881_v43 }
 0x1af   :  { %v967_v42 = vadd.s32 %v5239_v36, %v5233_v31  ;;  %v998_v20 = vsel %vm913_vm8, %v997_v19, %v973_v57  ;;  %v1140_v28 = vshrl.u32 %v6859_v7, %v6905_v12  ;;  %v1126_v35 = vand.u32 8388607, %v6789_v49 }
 0x1b0   :  { %vm5377_vm0 = vcmp.le.f32.partialorder %v6902_v51, 0.7853982  ;;  %vm3829_vm7 = vcmp.lt.s32.totalorder %v3828_v38, 0  ;;  %v868_v27 = vadd.s32 536870912, %v867_v5  ;;  %v1136_v63 = vshll.u32 %v6858_v41, %v6906_v48  ;;  %v4023_v4 = vpop.eup %4022 }
 0x1b1   :  { %v982_v13 = vsel %vm3829_vm7, 0, %v3828_v38  ;;  %v1137_v9 = vshrl.u32 %v6853_v60, %v6905_v12  ;;  %v1139_v31 = vshll.u32 %v6853_v60, %v6906_v48  ;;  %v1143_v36 = vshrl.u32 %v6821_v8, %v6905_v12  ;;  %v4025_v57 = vpop.eup %4024 }
 0x1b2   :  { %v699_v19 = vxor.u32 2147483648, %v4023_v4  ;;  %v983_v51 = vsub.s32 32, %v982_v13  ;;  %v987_v2 = vsub.s32 4294967266, %v982_v13  ;;  %v1142_v49 = vshll.u32 %v6859_v7, %v6906_v48 }
 0x1b3   :  { %v696_v54 = vxor.u32 2147483648, %v4025_v57  ;;  %v984_v14 = vshll.u32 %v5323_v23, %v982_v13  ;;  %vm809_vm10 = vcmp.lt.s32.totalorder %v6889_v21, 0  ;;  %v869_v38 = vshrl.u32 %v868_v27, 30 }
 0x1b4   :  { %v1141_v58 = vor.u32 %v1140_v28, %v1139_v31  ;;  %v700_v46 = vsel %vm698_vm14, %v699_v19, %v4025_v57  ;;  %v2361_v30 = vsel %vm2359_vm1, %v699_v19, %v4025_v57  ;;  %v985_v39 = vshrl.u32 %v967_v42, %v983_v51 }
 0x1b5   :  { %v988_v47 = vadd.s32 127, %v987_v2  ;;  %v697_v52 = vsel %vm695_vm13, %v4023_v4, %v696_v54  ;;  %v2358_v34 = vsel %vm2356_vm12, %v4023_v4, %v696_v54  ;;  %v870_v24 = vshll.u32 %v869_v38, 30 }
 0x1b6   :  { %v1144_v15 = vor.u32 %v1143_v36, %v1142_v49  ;;  %v701_v48 = vsel %vm694_vm15, %v697_v52, %v700_v46  ;;  %v2362_v23 = vsel %vm2355_vm11, %v2358_v34, %v2361_v30  ;;  %v986_v13 = vor.u32 %v985_v39, %v984_v14 }
 0x1b7   :  { %v989_v1 = vshll.u32 %v988_v47, 23  ;;  %v5409_v28 = vsel %vm691_vm9, nan, %v701_v48  ;;  %v2363_v42 = vsel %vm691_vm9, nan, %v2362_v23  ;;  %v5413_v2 = vsub.s32 %v867_v5, %v870_v24 }
 0x1b8   :  { %v1138_v27 = vor.u32 %v1137_v9, %v1136_v63  ;;  %3723 = vrot.lane.b32.xlu0 %v2363_v42, %s4085_s0  ;;  %v1000_v52 = vsel %vm5377_vm0, 0, %v998_v20  ;;  %v893_v46 = vsub.s32 4, %v869_v38  ;;  %v1127_v34 = vor.u32 8388608, %v1126_v35 }
 0x1b9   :  { %v990_v54 = vor.u32 4788187, %v989_v1  ;;  %v873_v39 = vsub.s32 0, %v5413_v2  ;;  %vm1151_vm2 = vcmp.lt.s32.totalorder %v4643_v55, 1  ;;  %vm1153_vm3 = vcmp.lt.s32.totalorder %v4643_v55, 3 }
 0x1ba   :  { %v1156_v40 = vsel %vm1154_vm5, %v1144_v15, 2102212464  ;;  %v993_v47 = vcvt.s32.f32 %v986_v13  ;;  %v1163_v14 = vsel %vm1151_vm2, %v1141_v58, %v1144_v15  ;;  %v1165_v1 = vsel %vm1153_vm3, %v4692_v0, %v4729_v62 }
 0x1bb   :  { %v991_v24 = vand.u32 2147483647, %v990_v54  ;;  %v3823_v30 = vmin.u32 %v873_v39, %v5413_v2  ;;  %v1135_v44 = vshrl.u32 %v6858_v41, %v6905_v12  ;;  %v1159_v18 = vsel %vm1151_vm2, %v1138_v27, %v1141_v58 }
 0x1bc   :  { %v1161_v49 = vsel %vm1153_vm3, %v1144_v15, %v4718_v56  ;;  %v6907_v20 = vand.u32 2147483647, %v6889_v21  ;;  %v894_v0 = vsel %vm809_vm10, %v893_v46, %v869_v38  ;;  %vm1152_vm4 = vcmp.lt.s32.totalorder %v4643_v55, 2 }
 0x1bd   :  { %v994_v5 = vmul.f32 %v993_v47, %v991_v24  ;;  %v875_v62 = vclz %v3823_v30  ;;  %v1155_v12 = vsel %vm1151_vm2, %v1135_v44, %v1138_v27  ;;  %v1157_v63 = vsel %vm1153_vm3, %v1141_v58, %v1156_v40  ;;  %v6910_v27 = vld [vmem:[#allocation5_spill] sm:$0xff]  ;;  %v6912_v30 = vld [vmem:[#allocation28_spill] sm:$0xff] }
 0x1be   :  { %vm5439_vm5 = vcmp.le.f32.partialorder %v6907_v20, 0.7853982  ;;  %v1166_v56 = vsel %vm1152_vm4, %v1163_v14, %v1165_v1  ;;  %v1004_v4 = vadd.s32 3, %v1000_v52  ;;  %v1162_v9 = vsel %vm1152_vm4, %v1159_v18, %v1161_v49 }
 0x1bf   :  { %v995_v15 = vxor.u32 2147483648, %v994_v5  ;;  %v1167_v31 = vshll.u32 %v1127_v34, 8  ;;  %v5450_v36 = vand.u32 3, %v1000_v52  ;;  %v863_v57 = vadd.s32 %v5332_v59, %v5318_v3 }
 0x1c0   :  { %v3824_v19 = vadd.s32 4294967294, %v875_v62  ;;  %v896_v51 = vsel %vm5439_vm5, 0, %v894_v0  ;;  %v1158_v48 = vsel %vm1152_vm4, %v1155_v12, %v1157_v63  ;;  %v5468_v3 = vand.u32 3, %v1004_v4 }
 0x1c1   :  { %v996_v38 = vsel %vm913_vm8, %v995_v15, %v994_v5  ;;  %v5458_v55 = vmul.u32.u64.low %v1167_v31, %v1166_v56  ;;  %v5459_v58 = vmul.u32.u64.high %v1167_v31, %v1166_v56, %v5458_v55  ;;  %v1015_v54 = vand.u32 2147483647, %v6910_v27 }
 0x1c2   :  { %v999_v23 = vsel %vm5377_vm0, %v6881_v43, %v996_v38  ;;  %vm3825_vm11 = vcmp.lt.s32.totalorder %v3824_v19, 0  ;;  %v5464_v13 = vmul.u32.u64.low %v1167_v31, %v1162_v9  ;;  %v5465_v42 = vmul.u32.u64.high %v1167_v31, %v1162_v9, %v5464_v13 }
 0x1c3   :  { %4026 = vcosq.f32 %v999_v23  ;;  %v878_v59 = vsel %vm3825_vm11, 0, %v3824_v19  ;;  %v900_v34 = vadd.s32 3, %v896_v51  ;;  %v1174_v40 = vmul.u32 %v1167_v31, %v1158_v48 }
 0x1c4   :  { %4028 = vsinq.f32 %v999_v23  ;;  %v879_v52 = vsub.s32 32, %v878_v59  ;;  %v883_v46 = vsub.s32 4294967266, %v878_v59  ;;  %v880_v39 = vshll.u32 %v5413_v2, %v878_v59 }
 0x1c5   :  { %vm1176_vm8 = vc.u32 %v5459_v58, %v5464_v13  ;;  %v1032_v24 = vshll.u32 %v6858_v41, %v6911_v53  ;;  %v1177_v1 = vadd.s32 1, %v5465_v42  ;;  %v1033_v44 = vshrl.u32 %v6853_v60, %v6912_v30 }
 0x1c6   :  { %v881_v47 = vshrl.u32 %v863_v57, %v879_v52  ;;  %v884_v14 = vadd.s32 127, %v883_v46  ;;  %v1022_v18 = vand.u32 8388607, %v1015_v54  ;;  %v1035_v2 = vshll.u32 %v6853_v60, %v6911_v53 }
 0x1c7   :  { %v1036_v49 = vshrl.u32 %v6859_v7, %v6912_v30  ;;  %v1039_v5 = vshrl.u32 %v6821_v8, %v6912_v30  ;;  %vm2665_vm12 = vcmp.eq.s32.totalorder %v5450_v36, 0  ;;  %v1178_v62 = vsel %vm1176_vm8, %v1177_v1, %v5465_v42 }
 0x1c8   :  { %v882_v20 = vor.u32 %v881_v47, %v880_v39  ;;  %v885_v0 = vshll.u32 %v884_v14, 23  ;;  %v1038_v12 = vshll.u32 %v6859_v7, %v6911_v53  ;;  %vm1006_vm1 = vcmp.lt.s32.totalorder %v5468_v3, 2  ;;  %v6913_v47 = vld [vmem:[#allocation35_spill] sm:$0xff] }
 0x1c9   :  { %vm1007_vm9 = vcmp.eq.s32.totalorder %v5468_v3, 0  ;;  %vm2664_vm15 = vcmp.lt.s32.totalorder %v5450_v36, 2  ;;  %vm2668_vm13 = vcmp.eq.s32.totalorder %v5450_v36, 2  ;;  %v1179_v63 = vadd.s32 %v1178_v62, %v1174_v40 }
 0x1ca   :  { %vm1003_vm14 = vweird.f32 %v6881_v43  ;;  %v886_v56 = vor.u32 4788187, %v885_v0  ;;  %v1034_v15 = vor.u32 %v1033_v44, %v1032_v24  ;;  %v1037_v4 = vor.u32 %v1036_v49, %v1035_v2 }
 0x1cb   :  { %v1040_v9 = vor.u32 %v1039_v5, %v1038_v12  ;;  %vm1010_vm0 = vcmp.eq.s32.totalorder %v5468_v3, 2  ;;  %v5497_v31 = vand.u32 3, %v900_v34  ;;  %v5499_v57 = vand.u32 3, %v896_v51 }
 0x1cc   :  { %v1180_v19 = vadd.s32 536870912, %v1179_v63  ;;  %v887_v38 = vand.u32 2147483647, %v886_v56  ;;  %v889_v48 = vcvt.s32.f32 %v882_v20  ;;  %v1023_v55 = vor.u32 8388608, %v1022_v18  ;;  %v6914_v18 = vld [vmem:[#allocation40_spill] sm:$0xff] }
 0x1cd   :  { %v1031_v23 = vshrl.u32 %v6858_v41, %v6912_v30  ;;  %v4027_v42 = vpop.eup %4026  ;;  %vm1047_vm7 = vcmp.lt.s32.totalorder %v4665_v61, 1  ;;  %vm1048_vm2 = vcmp.lt.s32.totalorder %v4665_v61, 2  ;;  %vm1049_vm3 = vcmp.lt.s32.totalorder %v4665_v61, 3  ;;  %v6916_v61 = vld [vmem:[#allocation32_spill] sm:$0xff] }
 0x1ce   :  { %v5503_v59 = vshrl.u32 %v1180_v19, 30  ;;  %v4029_v52 = vpop.eup %4028  ;;  %v1011_v46 = vxor.u32 2147483648, %v4027_v42  ;;  %v890_v51 = vmul.f32 %v889_v48, %v887_v38  ;;  %v1052_v34 = vsel %vm1050_vm6, %v1040_v9, 2102212464 }
 0x1cf   :  { %v1055_v39 = vsel %vm1047_vm7, %v1034_v15, %v1037_v4  ;;  %v1008_v40 = vxor.u32 2147483648, %v4029_v52  ;;  %v1059_v24 = vsel %vm1047_vm7, %v1037_v4, %v1040_v9  ;;  %v1061_v14 = vsel %vm1049_vm3, %v6913_v47, %v4743_v33 }
 0x1d0   :  { %v1182_v53 = vshll.u32 %v5503_v59, 30  ;;  %v1012_v1 = vsel %vm1010_vm0, %v1011_v46, %v4029_v52  ;;  %v2670_v30 = vsel %vm2668_vm13, %v1011_v46, %v4029_v52  ;;  %v891_v44 = vxor.u32 2147483648, %v890_v51 }
 0x1d1   :  { %v1057_v2 = vsel %vm1049_vm3, %v1040_v9, %v6914_v18  ;;  %v1009_v49 = vsel %vm1007_vm9, %v4027_v42, %v1008_v40  ;;  %v2667_v5 = vsel %vm2665_vm12, %v4027_v42, %v1008_v40  ;;  %v1063_v33 = vshll.u32 %v1023_v55, 8 }
 0x1d2   :  { %v5530_v20 = vsub.s32 %v1179_v63, %v1182_v53  ;;  %v1013_v0 = vsel %vm1006_vm1, %v1009_v49, %v1012_v1  ;;  %v2671_v62 = vsel %vm2664_vm15, %v2667_v5, %v2670_v30  ;;  %v892_v12 = vsel %vm809_vm10, %v891_v44, %v890_v51  ;;  %v6917_v1 = vld [vmem:[#allocation26_spill] sm:$0xff] }
 0x1d3   :  { %v1062_v56 = vsel %vm1048_vm2, %v1059_v24, %v1061_v14  ;;  %v5542_v9 = vsel %vm1003_vm14, nan, %v1013_v0  ;;  %v2672_v63 = vsel %vm1003_vm14, nan, %v2671_v62  ;;  %v895_v3 = vsel %vm5439_vm5, %v6889_v21, %v892_v12 }
 0x1d4   :  { %v1185_v36 = vsub.s32 0, %v5530_v20  ;;  %3729 = vrot.lane.b32.xlu1 %v2672_v63, %s4085_s0  ;;  %4030 = vcosq.f32 %v895_v3  ;;  %v1051_v19 = vsel %vm1047_vm7, %v1031_v23, %v1034_v15  ;;  %v1053_v38 = vsel %vm1049_vm3, %v1037_v4, %v1052_v34 }
 0x1d5   :  { %v1058_v48 = vsel %vm1048_vm2, %v1055_v39, %v1057_v2  ;;  %4032 = vsinq.f32 %v895_v3  ;;  %v5558_v55 = vmul.u32.u64.low %v1063_v33, %v1062_v56  ;;  %v5559_v35 = vmul.u32.u64.high %v1063_v33, %v1062_v56, %v5558_v55  ;;  %v6915_v39 = vld [vmem:[#allocation6_spill] sm:$0xff] }
 0x1d6   :  { %v3835_v43 = vmin.u32 %v1185_v36, %v5530_v20  ;;  %v5563_v42 = vor.u32 %v5347_v6, %v5147_v16  ;;  %v1774_v52 = vor.u32 %v5357_v26, %v5338_v22  ;;  %v5568_v15 = vadd.s32 1, %v4898_v25 }
 0x1d7   :  { %v5571_v4 = vadd.s32 1, %v4929_v50  ;;  %v1205_v46 = vsub.s32 4, %v5503_v59  ;;  %v5574_v51 = vmul.u32.u64.low %v1063_v33, %v1058_v48  ;;  %v5575_v34 = vmul.u32.u64.high %v1063_v33, %v1058_v48, %v5574_v51 }
 0x1d8   :  { %v1187_v23 = vclz %v3835_v43  ;;  %v5580_v16 = vor.u32 %v5364_v17, %v5342_v29  ;;  %v1670_v6 = vor.u32 %v5368_v11, %v5351_v32  ;;  %vm1121_vm6 = vcmp.lt.s32.totalorder %v6901_v37, 0 }
 0x1d9   :  { %v1054_v25 = vsel %vm1048_vm2, %v1051_v19, %v1053_v38  ;;  %vm903_vm10 = vcmp.eq.s32.totalorder %v5497_v31, 0  ;;  %vm2562_vm5 = vcmp.eq.s32.totalorder %v5499_v57, 0  ;;  %vm2565_vm4 = vcmp.eq.s32.totalorder %v5499_v57, 2 }
 0x1da   :  { %v3836_v50 = vadd.s32 4294967294, %v1187_v23  ;;  %v1327_v40 = vand.u32 2147483647, %v6915_v39  ;;  %vm902_vm11 = vcmp.lt.s32.totalorder %v5497_v31, 2  ;;  %vm906_vm8 = vcmp.eq.s32.totalorder %v5497_v31, 2 }
 0x1db   :  { %vm2561_vm12 = vcmp.lt.s32.totalorder %v5499_v57, 2  ;;  %v1175_v29 = vadd.s32 %v5464_v13, %v5459_v58  ;;  %vm1072_vm1 = vc.u32 %v5559_v35, %v5574_v51  ;;  %v1345_v17 = vshrl.u32 %v6853_v60, %v6916_v61 }
 0x1dc   :  { %vm899_vm9 = vweird.f32 %v6889_v21  ;;  %vm3837_vm15 = vcmp.lt.s32.totalorder %v3836_v50, 0  ;;  %v1206_v53 = vsel %vm1121_vm6, %v1205_v46, %v5503_v59  ;;  %v1070_v24 = vmul.u32 %v1063_v33, %v1054_v25 }
 0x1dd   :  { %v1073_v47 = vadd.s32 1, %v5575_v34  ;;  %v1190_v14 = vsel %vm3837_vm15, 0, %v3836_v50  ;;  %v1344_v58 = vshll.u32 %v6858_v41, %v6917_v1  ;;  %v1348_v13 = vshrl.u32 %v6859_v7, %v6916_v61 }
 0x1de   :  { %v1351_v30 = vshrl.u32 %v6821_v8, %v6916_v61  ;;  %v6918_v44 = vand.u32 2147483647, %v6901_v37  ;;  %v1191_v59 = vsub.s32 32, %v1190_v14  ;;  %v1195_v2 = vsub.s32 4294967266, %v1190_v14  ;;  %v4031_v33 = vpop.eup %4030 }
 0x1df   :  { %v1074_v49 = vsel %vm1072_vm1, %v1073_v47, %v5575_v34  ;;  %v1334_v5 = vand.u32 8388607, %v1327_v40  ;;  %vm1962_vm14 = vcmp.gt.s32.totalorder %v5568_v15, 0  ;;  %v1346_v62 = vor.u32 %v1345_v17, %v1344_v58  ;;  %v4033_v63 = vpop.eup %4032  ;;  %v6921_v58 = vld [vmem:[#allocation36_spill] sm:$0xff] }
 0x1e0   :  { %vm5613_vm13 = vcmp.le.f32.partialorder %v6918_v44, 0.7853982  ;;  %v1075_v0 = vadd.s32 %v1074_v49, %v1070_v24  ;;  %v1347_v12 = vshll.u32 %v6853_v60, %v6917_v1  ;;  %v1350_v56 = vshll.u32 %v6859_v7, %v6917_v1 }
 0x1e1   :  { %v907_v3 = vxor.u32 2147483648, %v4031_v33  ;;  %v1192_v36 = vshll.u32 %v5530_v20, %v1190_v14  ;;  %v1193_v19 = vshrl.u32 %v1175_v29, %v1191_v59  ;;  %v1196_v38 = vadd.s32 127, %v1195_v2  ;;  %v6923_v2 = vld [vmem:[#allocation41_spill] sm:$0xff] }
 0x1e2   :  { %v904_v48 = vxor.u32 2147483648, %v4033_v63  ;;  %v1076_v43 = vadd.s32 536870912, %v1075_v0  ;;  %v1349_v55 = vor.u32 %v1348_v13, %v1347_v12  ;;  %v1352_v23 = vor.u32 %v1351_v30, %v1350_v56 }
 0x1e3   :  { %vm1858_vm0 = vcmp.gt.s32.totalorder %v5571_v4, 0  ;;  %v908_v46 = vsel %vm906_vm8, %v907_v3, %v4033_v63  ;;  %v2567_v34 = vsel %vm2565_vm4, %v907_v3, %v4033_v63  ;;  %v1194_v25 = vor.u32 %v1193_v19, %v1192_v36  ;;  %v6925_v63 = vld [vmem:[#allocation42_spill] sm:$0xff]  ;;  %v6926_v3 = vld [vmem:[#allocation37_spill] sm:$0xff] }
 0x1e4   :  { %v1197_v50 = vshll.u32 %v1196_v38, 23  ;;  %v905_v17 = vsel %vm903_vm10, %v4031_v33, %v904_v48  ;;  %v2564_v20 = vsel %vm2562_vm5, %v4031_v33, %v904_v48  ;;  %v1077_v29 = vshrl.u32 %v1076_v43, 30 }
 0x1e5   :  { %v1335_v24 = vor.u32 8388608, %v1334_v5  ;;  %vm1778_vm7 = vcmp.lt.s32.totalorder %v4975_v10, 4  ;;  %v909_v47 = vsel %vm902_vm11, %v905_v17, %v908_v46  ;;  %v2568_v14 = vsel %vm2561_vm12, %v2564_v20, %v2567_v34 }
 0x1e6   :  { %v1198_v1 = vor.u32 4788187, %v1197_v50  ;;  %vm1359_vm2 = vcmp.lt.s32.totalorder %v6921_v58, 1  ;;  %v5643_v13 = vsel %vm899_vm9, nan, %v909_v47  ;;  %v2569_v30 = vsel %vm899_vm9, nan, %v2568_v14 }
 0x1e7   :  { %6922 = vst [vmem:[#allocation15_spill] sm:$0xff] %v5643_v13  ;;  %v1078_v44 = vshll.u32 %v1077_v29, 30  ;;  %vm1361_vm3 = vcmp.lt.s32.totalorder %v6921_v58, 3  ;;  %3727 = vrot.lane.b32.xlu0 %v2569_v30, %s4085_s0  ;;  %v1201_v59 = vcvt.s32.f32 %v1194_v25  ;;  %v1367_v57 = vsel %vm1359_vm2, %v1346_v62, %v1349_v55 }
 0x1e8   :  { %v1199_v31 = vand.u32 2147483647, %v1198_v1  ;;  %v1369_v49 = vsel %vm1361_vm3, %v1352_v23, %v6923_v2  ;;  %v1208_v5 = vsel %vm5613_vm13, 0, %v1206_v53  ;;  %vm1360_vm10 = vcmp.lt.s32.totalorder %v6921_v58, 2 }
 0x1e9   :  { %v5656_v33 = vsub.s32 %v1075_v0, %v1078_v44  ;;  %v1371_v21 = vsel %vm1359_vm2, %v1349_v55, %v1352_v23  ;;  %vm6924_vm5 = vcmp.lt.s32.totalorder %v6921_v58, 4  ;;  %v1373_v36 = vsel %vm1361_vm3, %v6926_v3, %v6925_v63 }
 0x1ea   :  { %v1202_v12 = vmul.f32 %v1201_v59, %v1199_v31  ;;  %v1364_v56 = vsel %vm6924_vm5, %v1352_v23, 2102212464  ;;  %v1375_v19 = vshll.u32 %v1335_v24, 8  ;;  %v1343_v53 = vshrl.u32 %v6858_v41, %v6916_v61 }
 0x1eb   :  { %v1081_v38 = vsub.s32 0, %v5656_v33  ;;  %v1370_v0 = vsel %vm1360_vm10, %v1367_v57, %v1369_v49  ;;  %v1374_v48 = vsel %vm1360_vm10, %v1371_v21, %v1373_v36  ;;  %v5677_v43 = vsel %vm1962_vm14, %v5568_v15, 0 }
 0x1ec   :  { %v1203_v23 = vxor.u32 2147483648, %v1202_v12  ;;  %v5679_v46 = vmul.u32.u64.low %v1375_v19, %v1374_v48  ;;  %v5680_v34 = vmul.u32.u64.high %v1375_v19, %v1374_v48, %v5679_v46  ;;  %v1212_v25 = vadd.s32 3, %v1208_v5 }
 0x1ed   :  { %v3831_v50 = vmin.u32 %v1081_v38, %v5656_v33  ;;  %v1363_v61 = vsel %vm1359_vm2, %v1343_v53, %v1346_v62  ;;  %v1365_v17 = vsel %vm1361_vm3, %v1349_v55, %v1364_v56  ;;  %v1101_v24 = vsub.s32 4, %v1077_v29 }
 0x1ee   :  { %v1204_v20 = vsel %vm1121_vm6, %v1203_v23, %v1202_v12  ;;  %v5689_v47 = vmul.u32.u64.low %v1375_v19, %v1370_v0  ;;  %v5690_v15 = vmul.u32.u64.high %v1375_v19, %v1370_v0, %v5689_v47  ;;  %v5696_v14 = vsel %vm1778_vm7, %v5563_v42, 920167782 }
 0x1ef   :  { %v5701_v62 = vsel %vm1858_vm0, %v5571_v4, 0  ;;  %v1207_v55 = vsel %vm5613_vm13, %v6901_v37, %v1204_v20  ;;  %v1083_v1 = vclz %v3831_v50  ;;  %v5711_v30 = vsel %vm1778_vm7, %v1774_v52, 1326507024  ;;  %v6927_v52 = vld [vmem:[#allocation7_spill] sm:$0xff] }
 0x1f0   :  { %4034 = vcosq.f32 %v1207_v55  ;;  %v5713_v44 = vand.u32 3, %v1208_v5  ;;  %v1366_v31 = vsel %vm1360_vm10, %v1363_v61, %v1365_v17  ;;  %vm1017_vm6 = vcmp.lt.s32.totalorder %v6910_v27, 0  ;;  %v6931_v50 = vld [vmem:[#allocation27_spill] sm:$0xff] }
 0x1f1   :  { %4036 = vsinq.f32 %v1207_v55  ;;  %v3832_v4 = vadd.s32 4294967294, %v1083_v1  ;;  %vm1384_vm4 = vc.u32 %v5680_v34, %v5689_v47  ;;  %v1213_v18 = vand.u32 3, %v1212_v25 }
 0x1f2   :  { %v1102_v22 = vsel %vm1017_vm6, %v1101_v24, %v1077_v29  ;;  %v1385_v26 = vadd.s32 1, %v5690_v15  ;;  %v1223_v59 = vand.u32 2147483647, %v6927_v52  ;;  %v5725_v57 = vshrl.u32 %v5677_v43, 5 }
 0x1f3   :  { %vm5729_vm11 = vcmp.le.f32.partialorder %v1015_v54, 0.7853982  ;;  %vm3833_vm8 = vcmp.lt.s32.totalorder %v3832_v4, 0  ;;  %v1382_v2 = vmul.u32 %v1375_v19, %v1366_v31  ;;  %vm2874_vm12 = vcmp.eq.s32.totalorder %v5713_v44, 2 }
 0x1f4   :  { %v1071_v29 = vadd.s32 %v5574_v51, %v5559_v35  ;;  %v1086_v49 = vsel %vm3833_vm8, 0, %v3832_v4  ;;  %v1386_v5 = vsel %vm1384_vm4, %v1385_v26, %v5690_v15  ;;  %vm2871_vm1 = vcmp.eq.s32.totalorder %v5713_v44, 0  ;;  %v6930_v35 = vld [vmem:[#allocation34_spill] sm:$0xff] }
 0x1f5   :  { %v1087_v21 = vsub.s32 32, %v1086_v49  ;;  %v1091_v12 = vsub.s32 4294967266, %v1086_v49  ;;  %v5740_v54 = vsel %vm5729_vm11, 0, %v1102_v22  ;;  %v1387_v56 = vadd.s32 %v1386_v5, %v1382_v2 }
 0x1f6   :  { %vm1214_vm9 = vcmp.lt.s32.totalorder %v1213_v18, 2  ;;  %vm1215_vm15 = vcmp.eq.s32.totalorder %v1213_v18, 0  ;;  %vm2870_vm13 = vcmp.lt.s32.totalorder %v5713_v44, 2  ;;  %v1230_v63 = vand.u32 8388607, %v1223_v59 }
 0x1f7   :  { %v1241_v51 = vshrl.u32 %v6853_v60, %v6930_v35  ;;  %vm1211_vm14 = vweird.f32 %v6901_v37  ;;  %v1088_v3 = vshll.u32 %v5656_v33, %v1086_v49  ;;  %v1089_v36 = vshrl.u32 %v1071_v29, %v1087_v21 }
 0x1f8   :  { %v1092_v19 = vadd.s32 127, %v1091_v12  ;;  %v1388_v38 = vadd.s32 536870912, %v1387_v56  ;;  %vm1218_vm0 = vcmp.eq.s32.totalorder %v1213_v18, 2  ;;  %v1108_v53 = vadd.s32 3, %v5740_v54 }
 0x1f9   :  { %v1244_v0 = vshrl.u32 %v6859_v7, %v6930_v35  ;;  %v1247_v48 = vshrl.u32 %v6821_v8, %v6930_v35  ;;  %v1090_v23 = vor.u32 %v1089_v36, %v1088_v3  ;;  %v1240_v61 = vshll.u32 %v6858_v41, %v6931_v50  ;;  %v6932_v36 = vld [vmem:[#allocation38_spill] sm:$0xff] }
 0x1fa   :  { %v1093_v46 = vshll.u32 %v1092_v19, 23  ;;  %v1389_v25 = vshrl.u32 %v1388_v38, 30  ;;  %v4035_v17 = vpop.eup %4034  ;;  %v1231_v33 = vor.u32 8388608, %v1230_v63  ;;  %v1239_v20 = vshrl.u32 %v6858_v41, %v6930_v35 }
 0x1fb   :  { %v1243_v24 = vshll.u32 %v6853_v60, %v6931_v50  ;;  %v1246_v15 = vshll.u32 %v6859_v7, %v6931_v50  ;;  %v4037_v55 = vpop.eup %4036  ;;  %v1219_v1 = vxor.u32 2147483648, %v4035_v17  ;;  %v1242_v22 = vor.u32 %v1241_v51, %v1240_v61  ;;  %v6935_v50 = vld [vmem:[#allocation39_spill] sm:$0xff] }
 0x1fc   :  { %v1094_v31 = vor.u32 4788187, %v1093_v46  ;;  %v1390_v4 = vshll.u32 %v1389_v25, 30  ;;  %v1216_v26 = vxor.u32 2147483648, %v4037_v55  ;;  %v1097_v2 = vcvt.s32.f32 %v1090_v23  ;;  %v6934_v46 = vld [vmem:[#allocation44_spill] sm:$0xff] }
 0x1fd   :  { %v1245_v29 = vor.u32 %v1244_v0, %v1243_v24  ;;  %v1248_v49 = vor.u32 %v1247_v48, %v1246_v15  ;;  %v1220_v5 = vsel %vm1218_vm0, %v1219_v1, %v4037_v55  ;;  %v2876_v21 = vsel %vm2874_vm12, %v1219_v1, %v4037_v55  ;;  %v6937_v24 = vld [vmem:[#allocation43_spill] sm:$0xff] }
 0x1fe   :  { %v1095_v12 = vand.u32 2147483647, %v1094_v31  ;;  %v5765_v63 = vsub.s32 %v1387_v56, %v1390_v4  ;;  %v1217_v35 = vsel %vm1215_vm15, %v4035_v17, %v1216_v26  ;;  %v2873_v3 = vsel %vm2871_vm1, %v4035_v17, %v1216_v26 }
 0x1ff   :  { %vm1255_vm2 = vcmp.lt.s32.totalorder %v6932_v36, 1  ;;  %vm1257_vm3 = vcmp.lt.s32.totalorder %v6932_v36, 3  ;;  %v1221_v51 = vsel %vm1214_vm9, %v1217_v35, %v1220_v5  ;;  %v2877_v19 = vsel %vm2870_vm13, %v2873_v3, %v2876_v21 }
 0x200   :  { %v1098_v38 = vmul.f32 %v1097_v2, %v1095_v12  ;;  %v1393_v0 = vsub.s32 0, %v5765_v63  ;;  %v5778_v56 = vsel %vm1211_vm14, nan, %v1221_v51  ;;  %v2878_v48 = vsel %vm1211_vm14, nan, %v2877_v19  ;;  %v6940_v19 = vld [vmem:[#allocation8_spill] sm:$0xff] }
 0x201   :  { %6933 = vst [vmem:[#allocation29_spill] sm:$0xff] %v5778_v56  ;;  %v1263_v23 = vsel %vm1255_vm2, %v1242_v22, %v1245_v29  ;;  %v1269_v18 = vsel %vm1257_vm3, %v6935_v50, %v6934_v46  ;;  %3733 = vrot.lane.b32.xlu1 %v2878_v48, %s4085_s0  ;;  %vm6936_vm10 = vcmp.lt.s32.totalorder %v6932_v36, 4  ;;  %v1265_v37 = vsel %vm1257_vm3, %v1248_v49, %v6937_v24 }
 0x202   :  { %v1099_v44 = vxor.u32 2147483648, %v1098_v38  ;;  %v3843_v61 = vmin.u32 %v1393_v0, %v5765_v63  ;;  %v1260_v17 = vsel %vm6936_vm10, %v1248_v49, 2102212464  ;;  %vm1329_vm5 = vcmp.lt.s32.totalorder %v6915_v39, 0 }
 0x203   :  { %v1413_v15 = vsub.s32 4, %v1389_v25  ;;  %vm1256_vm4 = vcmp.lt.s32.totalorder %v6932_v36, 2  ;;  %v1267_v55 = vsel %vm1255_vm2, %v1245_v29, %v1248_v49  ;;  %v1259_v4 = vsel %vm1255_vm2, %v1239_v20, %v1242_v22 }
 0x204   :  { %v1100_v1 = vsel %vm1017_vm6, %v1099_v44, %v1098_v38  ;;  %v1395_v31 = vclz %v3843_v61  ;;  %v1271_v26 = vshll.u32 %v1231_v33, 8  ;;  %v1261_v5 = vsel %vm1257_vm3, %v1245_v29, %v1260_v17 }
 0x205   :  { %v1103_v2 = vsel %vm5729_vm11, %v6910_v27, %v1100_v1  ;;  %v1266_v21 = vsel %vm1256_vm4, %v1263_v23, %v1265_v37  ;;  %v1270_v49 = vsel %vm1256_vm4, %v1267_v55, %v1269_v18  ;;  %v5812_v12 = vand.u32 3, %v1108_v53  ;;  %v6941_v18 = vld [vmem:[#allocation45_spill] sm:$0xff] }
 0x206   :  { %4038 = vcosq.f32 %v1103_v2  ;;  %v5815_v35 = vand.u32 3, %v5740_v54  ;;  %v3844_v33 = vadd.s32 4294967294, %v1395_v31  ;;  %v1414_v58 = vsel %vm1329_vm5, %v1413_v15, %v1389_v25 }
 0x207   :  { %4040 = vsinq.f32 %v1103_v2  ;;  %v5819_v20 = vmul.u32.u64.low %v1271_v26, %v1270_v49  ;;  %v5820_v22 = vmul.u32.u64.high %v1271_v26, %v1270_v49, %v5819_v20  ;;  %v1262_v29 = vsel %vm1256_vm4, %v1259_v4, %v1261_v5 }
 0x208   :  { %vm3845_vm6 = vcmp.lt.s32.totalorder %v3844_v33, 0  ;;  %v5824_v3 = vmul.u32.u64.low %v1271_v26, %v1266_v21  ;;  %v5825_v51 = vmul.u32.u64.high %v1271_v26, %v1266_v21, %v5824_v3  ;;  %v5829_v53 = vand.u32 31, %v5677_v43 }
 0x209   :  { %vm5833_vm11 = vcmp.le.f32.partialorder %v1327_v40, 0.7853982  ;;  %v1398_v25 = vsel %vm3845_vm6, 0, %v3844_v33  ;;  %v1535_v38 = vand.u32 2147483647, %v6940_v19  ;;  %vm2771_vm8 = vcmp.eq.s32.totalorder %v5815_v35, 2 }
 0x20a   :  { %v1383_v36 = vadd.s32 %v5689_v47, %v5680_v34  ;;  %v1399_v0 = vsub.s32 32, %v1398_v25  ;;  %v1403_v48 = vsub.s32 4294967266, %v1398_v25  ;;  %vm2768_vm12 = vcmp.eq.s32.totalorder %v5815_v35, 0 }
 0x20b   :  { %v1400_v43 = vshll.u32 %v5765_v63, %v1398_v25  ;;  %v1416_v40 = vsel %vm5833_vm11, 0, %v1414_v58  ;;  %v1278_v23 = vmul.u32 %v1271_v26, %v1262_v29  ;;  %vm1280_vm1 = vc.u32 %v5820_v22, %v5824_v3 }
 0x20c   :  { %vm1110_vm9 = vcmp.lt.s32.totalorder %v5812_v12, 2  ;;  %vm2767_vm15 = vcmp.lt.s32.totalorder %v5815_v35, 2  ;;  %v1401_v46 = vshrl.u32 %v1383_v36, %v1399_v0  ;;  %v1404_v50 = vadd.s32 127, %v1403_v48  ;;  %v6942_v0 = vld [vmem:[#allocation46_spill] sm:$0xff]  ;;  %v6943_v48 = vld [vmem:[#allocation57_spill] sm:$0xff] }
 0x20d   :  { %v1281_v34 = vadd.s32 1, %v5825_v51  ;;  %v1553_v47 = vshrl.u32 %v6853_v60, %v4795_v45  ;;  %vm1107_vm13 = vweird.f32 %v6910_v27  ;;  %v1542_v63 = vand.u32 8388607, %v1535_v38 }
 0x20e   :  { %v1552_v44 = vshll.u32 %v6858_v41, %v6941_v18  ;;  %v1556_v61 = vshrl.u32 %v6859_v7, %v4795_v45  ;;  %v1559_v17 = vshrl.u32 %v6821_v8, %v4795_v45  ;;  %v1402_v24 = vor.u32 %v1401_v46, %v1400_v43 }
 0x20f   :  { %v1405_v37 = vshll.u32 %v1404_v50, 23  ;;  %v1282_v15 = vsel %vm1280_vm1, %v1281_v34, %v5825_v51  ;;  %v1555_v55 = vshll.u32 %v6853_v60, %v6941_v18  ;;  %vm1111_vm14 = vcmp.eq.s32.totalorder %v5812_v12, 0 }
 0x210   :  { %vm1114_vm0 = vcmp.eq.s32.totalorder %v5812_v12, 2  ;;  %v1283_v1 = vadd.s32 %v1282_v15, %v1278_v23  ;;  %v1558_v31 = vshll.u32 %v6859_v7, %v6941_v18  ;;  %v4039_v4 = vpop.eup %4038  ;;  %v1420_v2 = vadd.s32 3, %v1416_v40 }
 0x211   :  { %v1406_v26 = vor.u32 4788187, %v1405_v37  ;;  %v1554_v5 = vor.u32 %v1553_v47, %v1552_v44  ;;  %v1557_v21 = vor.u32 %v1556_v61, %v1555_v55  ;;  %v4041_v49 = vpop.eup %4040  ;;  %v1115_v33 = vxor.u32 2147483648, %v4039_v4 }
 0x212   :  { %v1284_v58 = vadd.s32 536870912, %v1283_v1  ;;  %v1543_v20 = vor.u32 8388608, %v1542_v63  ;;  %v1560_v29 = vor.u32 %v1559_v17, %v1558_v31  ;;  %v1112_v51 = vxor.u32 2147483648, %v4041_v49  ;;  %v6944_v17 = vld [vmem:[#allocation52_spill] sm:$0xff] }
 0x213   :  { %v1407_v25 = vand.u32 2147483647, %v1406_v26  ;;  %v1409_v36 = vcvt.s32.f32 %v1402_v24  ;;  %vm1567_vm2 = vcmp.lt.s32.totalorder %v6942_v0, 1  ;;  %vm1674_vm3 = vcmp.lt.s32.totalorder %v6943_v48, 4  ;;  %v6947_v26 = vld [vmem:[#allocation50_spill] sm:$0xff] }
 0x214   :  { %v1116_v43 = vsel %vm1114_vm0, %v1115_v33, %v4041_v49  ;;  %v2773_v23 = vsel %vm2771_vm8, %v1115_v33, %v4041_v49  ;;  %v1285_v46 = vshrl.u32 %v1284_v58, 30  ;;  %vm1569_vm10 = vcmp.lt.s32.totalorder %v6942_v0, 3 }
 0x215   :  { %v1113_v50 = vsel %vm1111_vm14, %v4039_v4, %v1112_v51  ;;  %v2770_v34 = vsel %vm2768_vm12, %v4039_v4, %v1112_v51  ;;  %v1410_v47 = vmul.f32 %v1409_v36, %v1407_v25  ;;  %v1575_v63 = vsel %vm1567_vm2, %v1554_v5, %v1557_v21  ;;  %v6946_v4 = vld [vmem:[#allocation53_spill] sm:$0xff] }
 0x216   :  { %v1117_v18 = vsel %vm1110_vm9, %v1113_v50, %v1116_v43  ;;  %v2774_v44 = vsel %vm2767_vm15, %v2770_v34, %v2773_v23  ;;  %v1286_v61 = vshll.u32 %v1285_v46, 30  ;;  %v1577_v24 = vsel %vm1569_vm10, %v1560_v29, %v6944_v17 }
 0x217   :  { %v5890_v37 = vsel %vm1107_vm13, nan, %v1117_v18  ;;  %v2775_v15 = vsel %vm1107_vm13, nan, %v2774_v44  ;;  %v1411_v55 = vxor.u32 2147483648, %v1410_v47  ;;  %v1579_v12 = vsel %vm1567_vm2, %v1557_v21, %v1560_v29 }
 0x218   :  { %6945 = vst [vmem:[#allocation30_spill] sm:$0xff] %v5890_v37  ;;  %3731 = vrot.lane.b32.xlu0 %v2775_v15, %s4085_s0  ;;  %v5897_v35 = vand.u32 3, %v1416_v40  ;;  %v5899_v31 = vsub.s32 %v1283_v1, %v1286_v61  ;;  %vm1568_vm4 = vcmp.lt.s32.totalorder %v6942_v0, 2  ;;  %v1581_v49 = vsel %vm1569_vm10, %v6947_v26, %v6946_v4  ;;  %v6949_v61 = vld [vmem:[#allocation9_spill] sm:$0xff] }
 0x219   :  { %v1412_v27 = vsel %vm1329_vm5, %v1411_v55, %v1410_v47  ;;  %vm6948_vm6 = vcmp.lt.s32.totalorder %v6942_v0, 4  ;;  %v1582_v58 = vsel %vm1568_vm4, %v1579_v12, %v1581_v49  ;;  %v1583_v40 = vshll.u32 %v1543_v20, 8  ;;  %v6950_v55 = vld [vmem:[#allocation49_spill] sm:$0xff] }
 0x21a   :  { %v1572_v33 = vsel %vm6948_vm6, %v1560_v29, 2102212464  ;;  %v1415_v1 = vsel %vm5833_vm11, %v6915_v39, %v1412_v27  ;;  %v1289_v51 = vsub.s32 0, %v5899_v31  ;;  %v1551_v25 = vshrl.u32 %v6858_v41, %v4795_v45 }
 0x21b   :  { %v1578_v36 = vsel %vm1568_vm4, %v1575_v63, %v1577_v24  ;;  %4042 = vcosq.f32 %v1415_v1  ;;  %v5920_v43 = vand.u32 3, %v1420_v2  ;;  %v1573_v50 = vsel %vm1569_vm10, %v1557_v21, %v1572_v33 }
 0x21c   :  { %v5922_v29 = vmul.u32.u64.low %v1583_v40, %v1582_v58  ;;  %v5923_v23 = vmul.u32.u64.high %v1583_v40, %v1582_v58, %v5922_v29  ;;  %4044 = vsinq.f32 %v1415_v1  ;;  %v3839_v20 = vmin.u32 %v1289_v51, %v5899_v31  ;;  %v6953_v58 = vld [vmem:[#allocation48_spill] sm:$0xff] }
 0x21d   :  { %v1571_v54 = vsel %vm1567_vm2, %v1551_v25, %v1554_v5  ;;  %v5933_v45 = vsel %vm1674_vm3, %v5580_v16, 920167782  ;;  %v5940_v2 = vsel %vm1674_vm3, %v1670_v6, 1326507024  ;;  %v5947_v5 = vshrl.u32 %v5701_v62, 5 }
 0x21e   :  { %v5942_v34 = vmul.u32.u64.low %v1583_v40, %v1578_v36  ;;  %v5943_v47 = vmul.u32.u64.high %v1583_v40, %v1578_v36, %v5942_v34  ;;  %v5950_v21 = vand.u32 31, %v5701_v62  ;;  %v1291_v63 = vclz %v3839_v20 }
 0x21f   :  { %v1309_v18 = vsub.s32 4, %v1285_v46  ;;  %v5953_v44 = vsub.s32 32, %v5829_v53  ;;  %v5957_v32 = vshll.u32 %v6821_v8, %v5829_v53  ;;  %vm1225_vm5 = vcmp.lt.s32.totalorder %v6927_v52, 0 }
 0x220   :  { %v1574_v11 = vsel %vm1568_vm4, %v1571_v54, %v1573_v50  ;;  %vm1423_vm11 = vcmp.eq.s32.totalorder %v5920_v43, 0  ;;  %vm3077_vm8 = vcmp.eq.s32.totalorder %v5897_v35, 0  ;;  %vm3080_vm12 = vcmp.eq.s32.totalorder %v5897_v35, 2 }
 0x221   :  { %v3840_v6 = vadd.s32 4294967294, %v1291_v63  ;;  %vm1592_vm1 = vc.u32 %v5923_v23, %v5942_v34  ;;  %vm1422_vm9 = vcmp.lt.s32.totalorder %v5920_v43, 2  ;;  %vm1426_vm15 = vcmp.eq.s32.totalorder %v5920_v43, 2 }
 0x222   :  { %vm3076_vm13 = vcmp.lt.s32.totalorder %v5897_v35, 2  ;;  %v1279_v62 = vadd.s32 %v5824_v3, %v5820_v22  ;;  %v1593_v0 = vadd.s32 1, %v5943_v47  ;;  %v6804_v17 = vand.u32 2147483647, %v6949_v61 }
 0x223   :  { %vm1419_vm14 = vweird.f32 %v6915_v39  ;;  %vm3841_vm0 = vcmp.lt.s32.totalorder %v3840_v6, 0  ;;  %v1310_v24 = vsel %vm1225_vm5, %v1309_v18, %v1285_v46  ;;  %v1590_v15 = vmul.u32 %v1583_v40, %v1574_v11 }
 0x224   :  { %v1449_v12 = vshrl.u32 %v6853_v60, %v6950_v55  ;;  %v1294_v4 = vsel %vm3841_vm0, 0, %v3840_v6  ;;  %v1594_v26 = vsel %vm1592_vm1, %v1593_v0, %v5943_v47  ;;  %v1452_v22 = vshrl.u32 %v6859_v7, %v6950_v55 }
 0x225   :  { %v1455_v3 = vshrl.u32 %v6821_v8, %v6950_v55  ;;  %vm5986_vm2 = vcmp.le.f32.partialorder %v1223_v59, 0.7853982  ;;  %v1295_v46 = vsub.s32 32, %v1294_v4  ;;  %v1299_v27 = vsub.s32 4294967266, %v1294_v4  ;;  %v4043_v1 = vpop.eup %4042 }
 0x226   :  { %v1595_v33 = vadd.s32 %v1594_v26, %v1590_v15  ;;  %v1448_v40 = vshll.u32 %v6858_v41, %v6953_v58  ;;  %v1296_v51 = vshll.u32 %v5899_v31, %v1294_v4  ;;  %v1438_v25 = vand.u32 8388607, %v6804_v17  ;;  %v4045_v29 = vpop.eup %4044 }
 0x227   :  { %v1451_v36 = vshll.u32 %v6853_v60, %v6953_v58  ;;  %v1454_v59 = vshll.u32 %v6859_v7, %v6953_v58  ;;  %v1427_v20 = vxor.u32 2147483648, %v4043_v1  ;;  %v1297_v54 = vshrl.u32 %v1279_v62, %v1295_v46  ;;  %v6954_v58 = vld [vmem:[#allocation47_spill] sm:$0xff] }
 0x228   :  { %v1300_v50 = vadd.s32 127, %v1299_v27  ;;  %v1596_v47 = vadd.s32 536870912, %v1595_v33  ;;  %v1424_v63 = vxor.u32 2147483648, %v4045_v29  ;;  %v1450_v18 = vor.u32 %v1449_v12, %v1448_v40 }
 0x229   :  { %v1453_v11 = vor.u32 %v1452_v22, %v1451_v36  ;;  %v1456_v6 = vor.u32 %v1455_v3, %v1454_v59  ;;  %v1428_v31 = vsel %vm1426_vm15, %v1427_v20, %v4045_v29  ;;  %v3082_v0 = vsel %vm3080_vm12, %v1427_v20, %v4045_v29 }
 0x22a   :  { %v1298_v15 = vor.u32 %v1297_v54, %v1296_v51  ;;  %v1301_v4 = vshll.u32 %v1300_v50, 23  ;;  %v1425_v26 = vsel %vm1423_vm11, %v4043_v1, %v1424_v63  ;;  %v3079_v62 = vsel %vm3077_vm8, %v4043_v1, %v1424_v63  ;;  %v6959_v63 = vld [vmem:[#allocation51_spill] sm:$0xff] }
 0x22b   :  { %v1597_v46 = vshrl.u32 %v1596_v47, 30  ;;  %v1439_v27 = vor.u32 8388608, %v1438_v25  ;;  %v1429_v12 = vsel %vm1422_vm9, %v1425_v26, %v1428_v31  ;;  %v3083_v22 = vsel %vm3076_vm13, %v3079_v62, %v3082_v0  ;;  %v6956_v25 = vld [vmem:[#allocation54_spill] sm:$0xff]  ;;  %v6958_v47 = vld [vmem:[#allocation56_spill] sm:$0xff] }
 0x22c   :  { %v1302_v3 = vor.u32 4788187, %v1301_v4  ;;  %vm1463_vm10 = vcmp.lt.s32.totalorder %v6954_v58, 1  ;;  %v6014_v40 = vsel %vm1419_vm14, nan, %v1429_v12  ;;  %v3084_v51 = vsel %vm1419_vm14, nan, %v3083_v22 }
 0x22d   :  { %6955 = vst [vmem:[#allocation23_spill] sm:$0xff] %v6014_v40  ;;  %v1598_v36 = vshll.u32 %v1597_v46, 30  ;;  %vm1465_vm4 = vcmp.lt.s32.totalorder %v6954_v58, 3  ;;  %3737 = vrot.lane.b32.xlu1 %v3084_v51, %s4085_s0  ;;  %v1305_v1 = vcvt.s32.f32 %v1298_v15  ;;  %v1471_v35 = vsel %vm1463_vm10, %v1450_v18, %v1453_v11 }
 0x22e   :  { %v1303_v43 = vand.u32 2147483647, %v1302_v3  ;;  %v1473_v59 = vsel %vm1465_vm4, %v1456_v6, %v6956_v25  ;;  %v1312_v29 = vsel %vm5986_vm2, 0, %v1310_v24  ;;  %vm1464_vm6 = vcmp.lt.s32.totalorder %v6954_v58, 2 }
 0x22f   :  { %v6027_v20 = vsub.s32 %v1595_v33, %v1598_v36  ;;  %v1475_v39 = vsel %vm1463_vm10, %v1453_v11, %v1456_v6  ;;  %vm6957_vm11 = vcmp.lt.s32.totalorder %v6954_v58, 4  ;;  %v1477_v31 = vsel %vm1465_vm4, %v6959_v63, %v6958_v47 }
 0x230   :  { %v1306_v54 = vmul.f32 %v1305_v1, %v1303_v43  ;;  %v1468_v50 = vsel %vm6957_vm11, %v1456_v6, 2102212464  ;;  %v1479_v0 = vshll.u32 %v1439_v27, 8  ;;  %v1447_v24 = vshrl.u32 %v6858_v41, %v6950_v55 }
 0x231   :  { %v1601_v15 = vsub.s32 0, %v6027_v20  ;;  %v1474_v33 = vsel %vm1464_vm6, %v1471_v35, %v1473_v59  ;;  %v1478_v4 = vsel %vm1464_vm6, %v1475_v39, %v1477_v31  ;;  %v6960_v26 = vmov 920167782  }
 0x232   :  { %v6047_v6 = vshll.u32 %v6960_v26, %v5829_v53  ;;  %v1307_v62 = vxor.u32 2147483648, %v1306_v54  ;;  %v6049_v12 = vmul.u32.u64.low %v1479_v0, %v1478_v4  ;;  %v6050_v22 = vmul.u32.u64.high %v1479_v0, %v1478_v4, %v6049_v12 }
 0x233   :  { %v1316_v27 = vadd.s32 3, %v1312_v29  ;;  %v3851_v3 = vmin.u32 %v1601_v15, %v6027_v20  ;;  %v1467_v55 = vsel %vm1463_vm10, %v1447_v24, %v1450_v18  ;;  %v1469_v51 = vsel %vm1465_vm4, %v1453_v11, %v1468_v50  ;;  %v6962_v24 = vld [vmem:[#allocation16_spill] sm:$0xff] }
 0x234   :  { %v1308_v36 = vsel %vm1225_vm5, %v1307_v62, %v1306_v54  ;;  %v1621_v43 = vsub.s32 4, %v1597_v46  ;;  %v6059_v1 = vmul.u32.u64.low %v1479_v0, %v1474_v33  ;;  %v6060_v35 = vmul.u32.u64.high %v1479_v0, %v1474_v33, %v6059_v1 }
 0x235   :  { %v1978_v25 = vshrl.u32 %v6960_v26, %v5953_v44  ;;  %v6066_v59 = vsub.s32 32, %v5950_v21  ;;  %v1311_v18 = vsel %vm5986_vm2, %v6927_v52, %v1308_v36  ;;  %v1603_v39 = vclz %v3851_v3 }
 0x236   :  { %v6961_v11 = vmov 1326507024   ;;  %4046 = vcosq.f32 %v1311_v18  ;;  %v6075_v54 = vand.u32 3, %v1312_v29  ;;  %v1470_v47 = vsel %vm1464_vm6, %v1467_v55, %v1469_v51 }
 0x237   :  { %v6073_v50 = vshrl.u32 %v6961_v11, %v5953_v44  ;;  %4048 = vsinq.f32 %v1311_v18  ;;  %vm1537_vm5 = vcmp.lt.s32.totalorder %v6940_v19, 0  ;;  %v3852_v63 = vadd.s32 4294967294, %v1603_v39 }
 0x238   :  { %vm1488_vm8 = vc.u32 %v6050_v22, %v6059_v1  ;;  %v1317_v49 = vand.u32 3, %v1316_v27  ;;  %v1622_v31 = vsel %vm1537_vm5, %v1621_v43, %v1597_v46  ;;  %v1489_v15 = vadd.s32 1, %v6060_v35 }
 0x239   :  { %v6803_v33 = vand.u32 2147483647, %v6962_v24  ;;  %v6087_v29 = vor.u32 %v1978_v25, %v5957_v32  ;;  %vm6091_vm12 = vcmp.le.f32.partialorder %v1535_v38, 0.7853982  ;;  %vm3853_vm1 = vcmp.lt.s32.totalorder %v3852_v63, 0 }
 0x23a   :  { %v1486_v4 = vmul.u32 %v1479_v0, %v1470_v47  ;;  %vm2977_vm9 = vcmp.eq.s32.totalorder %v6075_v54, 2  ;;  %v1591_v46 = vadd.s32 %v5942_v34, %v5923_v23  ;;  %v1606_v62 = vsel %vm3853_vm1, 0, %v3852_v63  ;;  %v6965_v23 = vld [vmem:[#allocation58_spill] sm:$0xff] }
 0x23b   :  { %v1490_v12 = vsel %vm1488_vm8, %v1489_v15, %v6060_v35  ;;  %vm2974_vm15 = vcmp.eq.s32.totalorder %v6075_v54, 0  ;;  %v1607_v32 = vsub.s32 32, %v1606_v62  ;;  %v1611_v27 = vsub.s32 4294967266, %v1606_v62 }
 0x23c   :  { %v6102_v38 = vsel %vm6091_vm12, 0, %v1622_v31  ;;  %v1491_v3 = vadd.s32 %v1490_v12, %v1486_v4  ;;  %vm1318_vm13 = vcmp.lt.s32.totalorder %v1317_v49, 2  ;;  %vm1319_vm14 = vcmp.eq.s32.totalorder %v1317_v49, 0  ;;  %v6966_v31 = vld [vmem:[#allocation55_spill] sm:$0xff] }
 0x23d   :  { %vm2973_vm0 = vcmp.lt.s32.totalorder %v6075_v54, 2  ;;  %v1750_v0 = vand.u32 8388607, %v6803_v33  ;;  %v1761_v34 = vshrl.u32 %v6853_v60, %v6965_v23  ;;  %vm1315_vm2 = vweird.f32 %v6927_v52 }
 0x23e   :  { %v1608_v55 = vshll.u32 %v6027_v20, %v1606_v62  ;;  %v1609_v51 = vshrl.u32 %v1591_v46, %v1607_v32  ;;  %v1612_v36 = vadd.s32 127, %v1611_v27  ;;  %v1492_v43 = vadd.s32 536870912, %v1491_v3 }
 0x23f   :  { %vm1322_vm10 = vcmp.eq.s32.totalorder %v1317_v49, 2  ;;  %v1628_v35 = vadd.s32 3, %v6102_v38  ;;  %v1764_v25 = vshrl.u32 %v6859_v7, %v6965_v23  ;;  %v1767_v18 = vshrl.u32 %v6821_v8, %v6965_v23 }
 0x240   :  { %v1610_v39 = vor.u32 %v1609_v51, %v1608_v55  ;;  %v1613_v47 = vshll.u32 %v1612_v36, 23  ;;  %v1493_v63 = vshrl.u32 %v1492_v43, 30  ;;  %v1760_v15 = vshll.u32 %v6858_v41, %v6966_v31  ;;  %v4047_v4 = vpop.eup %4046 }
 0x241   :  { %v1751_v20 = vor.u32 8388608, %v1750_v0  ;;  %v1759_v46 = vshrl.u32 %v6858_v41, %v6965_v23  ;;  %v1763_v62 = vshll.u32 %v6853_v60, %v6966_v31  ;;  %v1766_v12 = vshll.u32 %v6859_v7, %v6966_v31  ;;  %v4049_v32 = vpop.eup %4048 }
 0x242   :  { %v1323_v27 = vxor.u32 2147483648, %v4047_v4  ;;  %v1614_v33 = vor.u32 4788187, %v1613_v47  ;;  %v1494_v55 = vshll.u32 %v1493_v63, 30  ;;  %v1762_v51 = vor.u32 %v1761_v34, %v1760_v15 }
 0x243   :  { %v1320_v36 = vxor.u32 2147483648, %v4049_v32  ;;  %v1617_v43 = vcvt.s32.f32 %v1610_v39  ;;  %v1765_v17 = vor.u32 %v1764_v25, %v1763_v62  ;;  %v1768_v40 = vor.u32 %v1767_v18, %v1766_v12 }
 0x244   :  { %v1324_v0 = vsel %vm1322_vm10, %v1323_v27, %v4049_v32  ;;  %v2979_v23 = vsel %vm2977_vm9, %v1323_v27, %v4049_v32  ;;  %v1615_v37 = vand.u32 2147483647, %v1614_v33  ;;  %v6127_v56 = vsub.s32 %v1491_v3, %v1494_v55 }
 0x245   :  { %v1321_v13 = vsel %vm1319_vm14, %v4047_v4, %v1320_v36  ;;  %v2976_v31 = vsel %vm2974_vm15, %v4047_v4, %v1320_v36  ;;  %vm1775_vm4 = vcmp.lt.s32.totalorder %v4975_v10, 1  ;;  %vm1777_vm6 = vcmp.lt.s32.totalorder %v4975_v10, 3 }
 0x246   :  { %v1325_v34 = vsel %vm1318_vm13, %v1321_v13, %v1324_v0  ;;  %v2980_v25 = vsel %vm2973_vm0, %v2976_v31, %v2979_v23  ;;  %v1618_v18 = vmul.f32 %v1617_v43, %v1615_v37  ;;  %v1497_v39 = vsub.s32 0, %v6127_v56  ;;  %v6970_v31 = vld [vmem:[#allocation17_spill] sm:$0xff] }
 0x247   :  { %v6140_v33 = vsel %vm1315_vm2, nan, %v1325_v34  ;;  %v2981_v3 = vsel %vm1315_vm2, nan, %v2980_v25  ;;  %v1783_v47 = vsel %vm1775_vm4, %v1762_v51, %v1765_v17  ;;  %v1789_v13 = vsel %vm1777_vm6, %v5563_v42, %v5711_v30 }
 0x248   :  { %3735 = vrot.lane.b32.xlu0 %v2981_v3, %s4085_s0  ;;  %v1619_v37 = vxor.u32 2147483648, %v1618_v18  ;;  %v3847_v54 = vmin.u32 %v1497_v39, %v6127_v56  ;;  %v1780_v49 = vsel %vm1778_vm7, %v1768_v40, 2102212464  ;;  %v1785_v52 = vsel %vm1777_vm6, %v1768_v40, %v5696_v14 }
 0x249   :  { %vm1433_vm11 = vcmp.lt.s32.totalorder %v6949_v61, 0  ;;  %v1517_v15 = vsub.s32 4, %v1493_v63  ;;  %vm1776_vm8 = vcmp.lt.s32.totalorder %v4975_v10, 2  ;;  %v1787_v42 = vsel %vm1775_vm4, %v1765_v17, %v1768_v40 }
 0x24a   :  { %v1620_v30 = vsel %vm1537_vm5, %v1619_v37, %v1618_v18  ;;  %v1499_v4 = vclz %v3847_v54  ;;  %v1779_v62 = vsel %vm1775_vm4, %v1759_v46, %v1762_v51  ;;  %v1791_v12 = vshll.u32 %v1751_v20, 8 }
 0x24b   :  { %v1623_v14 = vsel %vm6091_vm12, %v6940_v19, %v1620_v30  ;;  %v1781_v32 = vsel %vm1777_vm6, %v1765_v17, %v1780_v49  ;;  %v1786_v27 = vsel %vm1776_vm8, %v1783_v47, %v1785_v52  ;;  %v1790_v40 = vsel %vm1776_vm8, %v1787_v42, %v1789_v13  ;;  %v6972_v49 = vld [vmem:[#allocation59_spill] sm:$0xff] }
 0x24c   :  { %4050 = vcosq.f32 %v1623_v14  ;;  %v6174_v55 = vand.u32 3, %v1628_v35  ;;  %v6177_v36 = vand.u32 3, %v6102_v38  ;;  %v3848_v20 = vadd.s32 4294967294, %v1499_v4 }
 0x24d   :  { %4052 = vsinq.f32 %v1623_v14  ;;  %v1518_v58 = vsel %vm1433_vm11, %v1517_v15, %v1493_v63  ;;  %v6181_v46 = vmul.u32.u64.low %v1791_v12, %v1790_v40  ;;  %v6182_v51 = vmul.u32.u64.high %v1791_v12, %v1790_v40, %v6181_v46 }
 0x24e   :  { %vm3849_vm7 = vcmp.lt.s32.totalorder %v3848_v20, 0  ;;  %v1782_v17 = vsel %vm1776_vm8, %v1779_v62, %v1781_v32  ;;  %v6186_v43 = vmul.u32.u64.low %v1791_v12, %v1786_v27  ;;  %v6187_v0 = vmul.u32.u64.high %v1791_v12, %v1786_v27, %v6186_v43 }
 0x24f   :  { %v1982_v38 = vor.u32 %v6073_v50, %v6047_v6  ;;  %v6967_v35 = vand.u32 2147483647, %v6949_v61  ;;  %v1502_v63 = vsel %vm3849_vm7, 0, %v3848_v20  ;;  %v1639_v34 = vand.u32 2147483647, %v6970_v31  ;;  %v6973_v50 = vld [vmem:[#allocation19_spill] sm:$0xff] }
 0x250   :  { %vm3286_vm12 = vcmp.eq.s32.totalorder %v6177_v36, 2  ;;  %v1487_v10 = vadd.s32 %v6059_v1, %v6050_v22  ;;  %v1503_v25 = vsub.s32 32, %v1502_v63  ;;  %v1507_v18 = vsub.s32 4294967266, %v1502_v63  ;;  %v6971_v1 = vld [vmem:[#allocation10_spill] sm:$0xff] }
 0x251   :  { %vm6194_vm5 = vcmp.le.f32.partialorder %v6967_v35, 0.7853982  ;;  %vm3283_vm1 = vcmp.eq.s32.totalorder %v6177_v36, 0  ;;  %v1504_v39 = vshll.u32 %v6127_v56, %v1502_v63  ;;  %v1798_v47 = vmul.u32 %v1791_v12, %v1782_v17 }
 0x252   :  { %v1520_v3 = vsel %vm6194_vm5, 0, %v1518_v58  ;;  %vm1800_vm9 = vc.u32 %v6182_v51, %v6186_v43  ;;  %vm1630_vm15 = vcmp.lt.s32.totalorder %v6174_v55, 2  ;;  %vm3282_vm13 = vcmp.lt.s32.totalorder %v6177_v36, 2 }
 0x253   :  { %v1505_v13 = vshrl.u32 %v1487_v10, %v1503_v25  ;;  %v1508_v37 = vadd.s32 127, %v1507_v18  ;;  %v1801_v22 = vadd.s32 1, %v6187_v0  ;;  %v1657_v54 = vshrl.u32 %v6853_v60, %v6971_v1 }
 0x254   :  { %vm1627_vm14 = vweird.f32 %v6940_v19  ;;  %v1646_v56 = vand.u32 8388607, %v1639_v34  ;;  %v1656_v52 = vshll.u32 %v6858_v41, %v6972_v49  ;;  %v1660_v15 = vshrl.u32 %v6859_v7, %v6971_v1 }
 0x255   :  { %v1663_v42 = vshrl.u32 %v6821_v8, %v6971_v1  ;;  %v1506_v30 = vor.u32 %v1505_v13, %v1504_v39  ;;  %v1509_v4 = vshll.u32 %v1508_v37, 23  ;;  %v1802_v62 = vsel %vm1800_vm9, %v1801_v22, %v6187_v0 }
 0x256   :  { %v1659_v12 = vshll.u32 %v6853_v60, %v6972_v49  ;;  %vm1631_vm0 = vcmp.eq.s32.totalorder %v6174_v55, 0  ;;  %vm1634_vm2 = vcmp.eq.s32.totalorder %v6174_v55, 2  ;;  %v1803_v14 = vadd.s32 %v1802_v62, %v1798_v47  ;;  %v4051_v27 = vpop.eup %4050 }
 0x257   :  { %v1662_v32 = vshll.u32 %v6859_v7, %v6972_v49  ;;  %v1510_v40 = vor.u32 4788187, %v1509_v4  ;;  %v1524_v20 = vadd.s32 3, %v1520_v3  ;;  %v1658_v58 = vor.u32 %v1657_v54, %v1656_v52  ;;  %v4053_v17 = vpop.eup %4052 }
 0x258   :  { %v1661_v46 = vor.u32 %v1660_v15, %v1659_v12  ;;  %v1635_v35 = vxor.u32 2147483648, %v4051_v27  ;;  %v1804_v63 = vadd.s32 536870912, %v1803_v14  ;;  %v1647_v0 = vor.u32 8388608, %v1646_v56 }
 0x259   :  { %v1664_v10 = vor.u32 %v1663_v42, %v1662_v32  ;;  %v1632_v25 = vxor.u32 2147483648, %v4053_v17  ;;  %v1511_v18 = vand.u32 2147483647, %v1510_v40  ;;  %v1513_v39 = vcvt.s32.f32 %v1506_v30 }
 0x25a   :  { %vm1671_vm10 = vcmp.lt.s32.totalorder %v6943_v48, 1  ;;  %v1636_v47 = vsel %vm1634_vm2, %v1635_v35, %v4053_v17  ;;  %v3288_v13 = vsel %vm3286_vm12, %v1635_v35, %v4053_v17  ;;  %v1805_v37 = vshrl.u32 %v1804_v63, 30 }
 0x25b   :  { %vm1673_vm4 = vcmp.lt.s32.totalorder %v6943_v48, 3  ;;  %v1633_v22 = vsel %vm1631_vm0, %v4051_v27, %v1632_v25  ;;  %v3285_v54 = vsel %vm3283_vm1, %v4051_v27, %v1632_v25  ;;  %v1514_v56 = vmul.f32 %v1513_v39, %v1511_v18 }
 0x25c   :  { %v1679_v49 = vsel %vm1671_vm10, %v1658_v58, %v1661_v46  ;;  %v1637_v52 = vsel %vm1630_vm15, %v1633_v22, %v1636_v47  ;;  %v3289_v15 = vsel %vm3282_vm13, %v3285_v54, %v3288_v13  ;;  %v1806_v42 = vshll.u32 %v1805_v37, 30 }
 0x25d   :  { %v1681_v30 = vsel %vm1673_vm4, %v1664_v10, %v5933_v45  ;;  %v6250_v4 = vsel %vm1627_vm14, nan, %v1637_v52  ;;  %v3290_v62 = vsel %vm1627_vm14, nan, %v3289_v15  ;;  %v1515_v12 = vxor.u32 2147483648, %v1514_v56 }
 0x25e   :  { %v1683_v55 = vsel %vm1671_vm10, %v1661_v46, %v1664_v10  ;;  %3741 = vrot.lane.b32.xlu1 %v3290_v62, %s4085_s0  ;;  %v6257_v36 = vand.u32 3, %v1520_v3  ;;  %v6259_v32 = vsub.s32 %v1803_v14, %v1806_v42  ;;  %vm1672_vm6 = vcmp.lt.s32.totalorder %v6943_v48, 2 }
 0x25f   :  { %v1685_v45 = vsel %vm1673_vm4, %v5580_v16, %v5940_v2  ;;  %v1516_v19 = vsel %vm1433_vm11, %v1515_v12, %v1514_v56  ;;  %v1676_v27 = vsel %vm1674_vm3, %v1664_v10, 2102212464  ;;  %v1687_v3 = vshll.u32 %v1647_v0, 8 }
 0x260   :  { %v1686_v40 = vsel %vm1672_vm6, %v1683_v55, %v1685_v45  ;;  %v1519_v14 = vsel %vm6194_vm5, %v6949_v61, %v1516_v19  ;;  %v1809_v17 = vsub.s32 0, %v6259_v32  ;;  %v1655_v35 = vshrl.u32 %v6858_v41, %v6971_v1 }
 0x261   :  { %v1682_v16 = vsel %vm1672_vm6, %v1679_v49, %v1681_v30  ;;  %4054 = vcosq.f32 %v1519_v14  ;;  %v6280_v2 = vand.u32 3, %v1524_v20  ;;  %v1677_v25 = vsel %vm1673_vm4, %v1661_v46, %v1676_v27 }
 0x262   :  { %v6282_v63 = vmul.u32.u64.low %v1687_v3, %v1686_v40  ;;  %v6283_v10 = vmul.u32.u64.high %v1687_v3, %v1686_v40, %v6282_v63  ;;  %4056 = vsinq.f32 %v1519_v14  ;;  %v3859_v0 = vmin.u32 %v1809_v17, %v6259_v32 }
 0x263   :  { %v1675_v23 = vsel %vm1671_vm10, %v1655_v35, %v1658_v58  ;;  %vm1986_vm3 = vcmp.lt.s32.totalorder %v5725_v57, 4  ;;  %v6293_v1 = vshll.u32 %v6821_v8, %v5950_v21  ;;  %v6301_v39 = vshrl.u32 %v6960_v26, %v6066_v59 }
 0x264   :  { %v6295_v20 = vmul.u32.u64.low %v1687_v3, %v1682_v16  ;;  %v6296_v18 = vmul.u32.u64.high %v1687_v3, %v1682_v16, %v6295_v20  ;;  %v6305_v58 = vshrl.u32 %v6961_v11, %v6066_v59  ;;  %v1811_v47 = vclz %v3859_v0 }
 0x265   :  { %v1829_v46 = vsub.s32 4, %v1805_v37  ;;  %v6310_v13 = vsel %vm1986_vm3, %v6087_v29, 920167782  ;;  %v6317_v22 = vsel %vm1986_vm3, %v1982_v38, 1326507024  ;;  %vm1745_vm11 = vcmp.lt.s32.totalorder %v6962_v24, 0 }
 0x266   :  { %v1678_v11 = vsel %vm1672_vm6, %v1675_v23, %v1677_v25  ;;  %vm1527_vm8 = vcmp.eq.s32.totalorder %v6280_v2, 0  ;;  %vm3180_vm7 = vcmp.eq.s32.totalorder %v6257_v36, 0  ;;  %vm3183_vm5 = vcmp.eq.s32.totalorder %v6257_v36, 2 }
 0x267   :  { %v3860_v54 = vadd.s32 4294967294, %v1811_v47  ;;  %vm1696_vm12 = vc.u32 %v6283_v10, %v6295_v20  ;;  %vm1526_vm1 = vcmp.lt.s32.totalorder %v6280_v2, 2  ;;  %vm1530_vm9 = vcmp.eq.s32.totalorder %v6280_v2, 2 }
 0x268   :  { %vm3179_vm15 = vcmp.lt.s32.totalorder %v6257_v36, 2  ;;  %v1799_v48 = vadd.s32 %v6186_v43, %v6182_v51  ;;  %v1697_v6 = vadd.s32 1, %v6296_v18  ;;  %v1951_v38 = vand.u32 2147483647, %v6973_v50 }
 0x269   :  { %vm1523_vm13 = vweird.f32 %v6949_v61  ;;  %vm3861_vm14 = vcmp.lt.s32.totalorder %v3860_v54, 0  ;;  %v1830_v56 = vsel %vm1745_vm11, %v1829_v46, %v1805_v37  ;;  %v1694_v49 = vmul.u32 %v1687_v3, %v1678_v11 }
 0x26a   :  { %v1969_v52 = vshrl.u32 %v6853_v60, %v5953_v44  ;;  %v1814_v15 = vsel %vm3861_vm14, 0, %v3860_v54  ;;  %v1698_v42 = vsel %vm1696_vm12, %v1697_v6, %v6296_v18  ;;  %v1972_v51 = vshrl.u32 %v6859_v7, %v5953_v44 }
 0x26b   :  { %v1975_v43 = vshrl.u32 %v6821_v8, %v5953_v44  ;;  %v6974_v30 = vand.u32 2147483647, %v6962_v24  ;;  %v1815_v37 = vsub.s32 32, %v1814_v15  ;;  %v1819_v12 = vsub.s32 4294967266, %v1814_v15  ;;  %v4055_v19 = vpop.eup %4054 }
 0x26c   :  { %v1699_v55 = vadd.s32 %v1698_v42, %v1694_v49  ;;  %v1968_v45 = vshll.u32 %v6858_v41, %v5829_v53  ;;  %v1816_v27 = vshll.u32 %v6259_v32, %v1814_v15  ;;  %v1958_v40 = vand.u32 8388607, %v1951_v38  ;;  %v4057_v17 = vpop.eup %4056 }
 0x26d   :  { %vm6346_vm0 = vcmp.le.f32.partialorder %v6974_v30, 0.7853982  ;;  %v1971_v3 = vshll.u32 %v6853_v60, %v5829_v53  ;;  %v1974_v14 = vshll.u32 %v6859_v7, %v5829_v53  ;;  %v1531_v35 = vxor.u32 2147483648, %v4055_v19 }
 0x26e   :  { %v1817_v16 = vshrl.u32 %v1799_v48, %v1815_v37  ;;  %v1820_v63 = vadd.s32 127, %v1819_v12  ;;  %v1700_v0 = vadd.s32 536870912, %v1699_v55  ;;  %v1528_v23 = vxor.u32 2147483648, %v4057_v17 }
 0x26f   :  { %v1970_v25 = vor.u32 %v1969_v52, %v1968_v45  ;;  %v1973_v18 = vor.u32 %v1972_v51, %v1971_v3  ;;  %v1976_v47 = vor.u32 %v1975_v43, %v1974_v14  ;;  %v1532_v32 = vsel %vm1530_vm9, %v1531_v35, %v4057_v17 }
 0x270   :  { %v3185_v46 = vsel %vm3183_vm5, %v1531_v35, %v4057_v17  ;;  %v1818_v11 = vor.u32 %v1817_v16, %v1816_v27  ;;  %v1821_v54 = vshll.u32 %v1820_v63, 23  ;;  %v1529_v53 = vsel %vm1527_vm8, %v4055_v19, %v1528_v23 }
 0x271   :  { %v3182_v48 = vsel %vm3180_vm7, %v4055_v19, %v1528_v23  ;;  %v1701_v6 = vshrl.u32 %v1700_v0, 30  ;;  %v1959_v49 = vor.u32 8388608, %v1958_v40  ;;  %v1533_v52 = vsel %vm1526_vm1, %v1529_v53, %v1532_v32 }
 0x272   :  { %v3186_v15 = vsel %vm3179_vm15, %v3182_v48, %v3185_v46  ;;  %v1822_v42 = vor.u32 4788187, %v1821_v54  ;;  %vm1983_vm2 = vcmp.lt.s32.totalorder %v5725_v57, 1  ;;  %v6374_v51 = vsel %vm1523_vm13, nan, %v1533_v52 }
 0x273   :  { %v3187_v43 = vsel %vm1523_vm13, nan, %v3186_v15  ;;  %v1702_v30 = vshll.u32 %v1701_v6, 30  ;;  %vm1985_vm10 = vcmp.lt.s32.totalorder %v5725_v57, 3  ;;  %v1825_v37 = vcvt.s32.f32 %v1818_v11 }
 0x274   :  { %3739 = vrot.lane.b32.xlu0 %v3187_v43, %s4085_s0  ;;  %v1823_v2 = vand.u32 2147483647, %v1822_v42  ;;  %v1991_v36 = vsel %vm1983_vm2, %v1970_v25, %v1973_v18  ;;  %v1993_v12 = vsel %vm1985_vm10, %v1976_v47, %v6310_v13  ;;  %v1832_v45 = vsel %vm6346_vm0, 0, %v1830_v56 }
 0x275   :  { %v6387_v19 = vsub.s32 %v1699_v55, %v1702_v30  ;;  %vm1984_vm4 = vcmp.lt.s32.totalorder %v5725_v57, 2  ;;  %v1995_v61 = vsel %vm1983_vm2, %v1973_v18, %v1976_v47  ;;  %v1988_v40 = vsel %vm1986_vm3, %v1976_v47, 2102212464 }
 0x276   :  { %v1826_v27 = vmul.f32 %v1825_v37, %v1823_v2  ;;  %v1997_v3 = vsel %vm1985_vm10, %v6087_v29, %v6317_v22  ;;  %v1999_v13 = vshll.u32 %v1959_v49, 8  ;;  %v1967_v56 = vshrl.u32 %v6858_v41, %v5953_v44 }
 0x277   :  { %v1705_v14 = vsub.s32 0, %v6387_v19  ;;  %v1994_v55 = vsel %vm1984_vm4, %v1991_v36, %v1993_v12  ;;  %v1998_v17 = vsel %vm1984_vm4, %v1995_v61, %v1997_v3  ;;  %v1876_v35 = vshll.u32 %v6960_v26, %v5950_v21  ;;  %v6979_v36 = vld [vmem:[#allocation20_spill] sm:$0xff]  ;;  %v6466_v61 = vpop.permute.xlu1 %3721  ;;  %v6470_v3 = vpop.permute.xlu0 %3719 }
 0x278   :  { %v1827_v16 = vxor.u32 2147483648, %v1826_v27  ;;  %v6407_v63 = vmul.u32.u64.low %v1999_v13, %v1998_v17  ;;  %v6408_v0 = vmul.u32.u64.high %v1999_v13, %v1998_v17, %v6407_v63  ;;  %v6412_v29 = vor.u32 %v6301_v39, %v6293_v1 }
 0x279   :  { %v3855_v22 = vmin.u32 %v1705_v14, %v6387_v19  ;;  %v1987_v44 = vsel %vm1983_vm2, %v1967_v56, %v1970_v25  ;;  %v1989_v23 = vsel %vm1985_vm10, %v1973_v18, %v1988_v40  ;;  %v1836_v26 = vadd.s32 3, %v1832_v45 }
 0x27a   :  { %v1828_v47 = vsel %vm1745_vm11, %v1827_v16, %v1826_v27  ;;  %v6421_v32 = vmul.u32.u64.low %v1999_v13, %v1994_v55  ;;  %v6422_v46 = vmul.u32.u64.high %v1999_v13, %v1994_v55, %v6421_v32  ;;  %v1878_v11 = vor.u32 %v6305_v58, %v1876_v35 }
 0x27b   :  { %v1831_v1 = vsel %vm6346_vm0, %v6962_v24, %v1828_v47  ;;  %v1707_v39 = vclz %v3855_v22  ;;  %v1725_v54 = vsub.s32 4, %v1701_v6  ;;  %v6429_v25 = vand.u32 3, %v1832_v45 }
 0x27c   :  { %4058 = vcosq.f32 %v1831_v1  ;;  %v1990_v18 = vsel %vm1984_vm4, %v1987_v44, %v1989_v23  ;;  %vm1882_vm6 = vcmp.lt.s32.totalorder %v5947_v5, 4  ;;  %vm2008_vm3 = vc.u32 %v6408_v0, %v6421_v32 }
 0x27d   :  { %4060 = vsinq.f32 %v1831_v1  ;;  %v3856_v53 = vadd.s32 4294967294, %v1707_v39  ;;  %v6439_v58 = vsel %vm1882_vm6, %v6412_v29, 920167782  ;;  %v1837_v62 = vand.u32 3, %v1836_v26 }
 0x27e   :  { %vm1641_vm11 = vcmp.lt.s32.totalorder %v6970_v31, 0  ;;  %v2009_v48 = vadd.s32 1, %v6422_v46  ;;  %v6445_v57 = vsel %vm1882_vm6, %v1878_v11, 1326507024  ;;  %v2006_v52 = vmul.u32 %v1999_v13, %v1990_v18  ;;  %v3726_v18 = vpop.permute.xlu1 %3725 }
 0x27f   :  { %vm3857_vm8 = vcmp.lt.s32.totalorder %v3856_v53, 0  ;;  %v1726_v49 = vsel %vm1641_vm11, %v1725_v54, %v1701_v6  ;;  %vm3492_vm7 = vcmp.eq.s32.totalorder %v6429_v25, 2  ;;  %vm6452_vm5 = vcmp.le.f32.partialorder %v1639_v34, 0.7853982 }
 0x280   :  { %v1710_v42 = vsel %vm3857_vm8, 0, %v3856_v53  ;;  %v2010_v43 = vsel %vm2008_vm3, %v2009_v48, %v6422_v46  ;;  %vm3489_vm12 = vcmp.eq.s32.totalorder %v6429_v25, 0  ;;  %v1695_v30 = vadd.s32 %v6295_v20, %v6283_v10 }
 0x281   :  { %v1711_v2 = vsub.s32 32, %v1710_v42  ;;  %v1715_v37 = vsub.s32 4294967266, %v1710_v42  ;;  %v2011_v6 = vadd.s32 %v2010_v43, %v2006_v52  ;;  %vm1838_vm1 = vcmp.lt.s32.totalorder %v1837_v62, 2 }
 0x282   :  { %vm3488_vm9 = vcmp.lt.s32.totalorder %v6429_v25, 2  ;;  %v1728_v34 = vsel %vm6452_vm5, 0, %v1726_v49  ;;  %v1847_v12 = vand.u32 2147483647, %v6979_v36  ;;  %v1865_v45 = vshrl.u32 %v6853_v60, %v6066_v59 }
 0x283   :  { %vm1835_vm15 = vweird.f32 %v6962_v24  ;;  %v1712_v10 = vshll.u32 %v6387_v19, %v1710_v42  ;;  %v1713_v20 = vshrl.u32 %v1695_v30, %v1711_v2  ;;  %v1716_v27 = vadd.s32 127, %v1715_v37 }
 0x284   :  { %v2012_v40 = vadd.s32 536870912, %v2011_v6  ;;  %vm1839_vm13 = vcmp.eq.s32.totalorder %v1837_v62, 0  ;;  %vm1842_vm14 = vcmp.eq.s32.totalorder %v1837_v62, 2  ;;  %v1868_v13 = vshrl.u32 %v6859_v7, %v6066_v59 }
 0x285   :  { %v1871_v14 = vshrl.u32 %v6821_v8, %v6066_v59  ;;  %v1714_v56 = vor.u32 %v1713_v20, %v1712_v10  ;;  %v1717_v55 = vshll.u32 %v1716_v27, 23  ;;  %v1864_v19 = vshll.u32 %v6858_v41, %v5950_v21 }
 0x286   :  { %v6476_v17 = vshrl.u32 %v2012_v40, 30  ;;  %v4059_v35 = vpop.eup %4058  ;;  %v6480_v16 = vadd.s32 3, %v1728_v34  ;;  %v1854_v63 = vand.u32 8388607, %v1847_v12  ;;  %v1867_v22 = vshll.u32 %v6853_v60, %v5950_v21 }
 0x287   :  { %v1870_v44 = vshll.u32 %v6859_v7, %v5950_v21  ;;  %v4061_v8 = vpop.eup %4060  ;;  %v1843_v23 = vxor.u32 2147483648, %v4059_v35  ;;  %v1718_v47 = vor.u32 4788187, %v1717_v55  ;;  %v1866_v46 = vor.u32 %v1865_v45, %v1864_v19  ;;  %v3724_v7 = vpop.permute.xlu0 %3723 }
 0x288   :  { %v2014_v26 = vshll.u32 %v6476_v17, 30  ;;  %v1840_v11 = vxor.u32 2147483648, %v4061_v8  ;;  %v1721_v1 = vcvt.s32.f32 %v1714_v56  ;;  %v1869_v39 = vor.u32 %v1868_v13, %v1867_v22  ;;  %v3730_v56 = vpop.permute.xlu1 %3729 }
 0x289   :  { %v1872_v54 = vor.u32 %v1871_v14, %v1870_v44  ;;  %v1844_v53 = vsel %vm1842_vm14, %v1843_v23, %v4061_v8  ;;  %v3494_v48 = vsel %vm3492_vm7, %v1843_v23, %v4061_v8  ;;  %v1719_v60 = vand.u32 2147483647, %v1718_v47  ;;  %v6980_v23 = vld [vmem:[#allocation13_spill] sm:$0xff] }
 0x28a   :  { %v6492_v49 = vsub.s32 %v2011_v6, %v2014_v26  ;;  %v1841_v21 = vsel %vm1839_vm13, %v4059_v35, %v1840_v11  ;;  %v3491_v52 = vsel %vm3489_vm12, %v4059_v35, %v1840_v11  ;;  %v1855_v42 = vor.u32 8388608, %v1854_v63  ;;  %v6981_v26 = vld [vmem:[#allocation2_spill] sm:$0xff]  ;;  %v6982_v11 = vld [vmem:[#allocation12_spill] sm:$0xff] }
 0x28b   :  { %vm1879_vm0 = vcmp.lt.s32.totalorder %v5947_v5, 1  ;;  %v1845_v43 = vsel %vm1838_vm1, %v1841_v21, %v1844_v53  ;;  %v3495_v30 = vsel %vm3488_vm9, %v3491_v52, %v3494_v48  ;;  %v1722_v2 = vmul.f32 %v1721_v1, %v1719_v60  ;;  %v6983_v60 = vld [vmem:[#allocation15_spill] sm:$0xff] }
 0x28c   :  { %v2017_v37 = vsub.s32 0, %v6492_v49  ;;  %v6504_v6 = vsel %vm1835_vm15, nan, %v1845_v43  ;;  %v3496_v45 = vsel %vm1835_vm15, nan, %v3495_v30  ;;  %vm1881_vm2 = vcmp.lt.s32.totalorder %v5947_v5, 3  ;;  %v6985_v30 = vld [vmem:[#allocation30_spill] sm:$0xff] }
 0x28d   :  { %v1887_v10 = vsel %vm1879_vm0, %v1866_v46, %v1869_v39  ;;  %3745 = vrot.lane.b32.xlu1 %v3496_v45, %s4085_s0  ;;  %v1723_v62 = vxor.u32 2147483648, %v1722_v2  ;;  %v1889_v20 = vsel %vm1881_vm2, %v1872_v54, %v6439_v58  ;;  %v1893_v24 = vsel %vm1881_vm2, %v6412_v29, %v6445_v57  ;;  %v3728_v57 = vpop.permute.xlu0 %3727 }
 0x28e   :  { %v3867_v25 = vmin.u32 %v2017_v37, %v6492_v49  ;;  %v6520_v27 = vand.u32 3, %v1728_v34  ;;  %v2007_v40 = vadd.s32 %v6421_v32, %v6408_v0  ;;  %v1863_v13 = vshrl.u32 %v6858_v41, %v6066_v59 }
 0x28f   :  { %v1891_v14 = vsel %vm1879_vm0, %v1869_v39, %v1872_v54  ;;  %v1724_v58 = vsel %vm1641_vm11, %v1723_v62, %v1722_v2  ;;  %vm1880_vm10 = vcmp.lt.s32.totalorder %v5947_v5, 2  ;;  %v1884_v29 = vsel %vm1882_vm6, %v1872_v54, 2102212464 }
 0x290   :  { %v2019_v55 = vclz %v3867_v25  ;;  %v1727_v0 = vsel %vm6452_vm5, %v6970_v31, %v1724_v58  ;;  %v1890_v41 = vsel %vm1880_vm10, %v1887_v10, %v1889_v20  ;;  %v1894_v59 = vsel %vm1880_vm10, %v1891_v14, %v1893_v24 }
 0x291   :  { %v1895_v32 = vshll.u32 %v1855_v42, 8  ;;  %4062 = vcosq.f32 %v1727_v0  ;;  %v1883_v19 = vsel %vm1879_vm0, %v1863_v13, %v1866_v46  ;;  %vm3767_vm4 = vcmask 146432   ;;  %v3732_v5 = vpop.permute.xlu0 %3731 }
 0x292   :  { %v3868_v34 = vadd.s32 4294967294, %v2019_v55  ;;  %4064 = vsinq.f32 %v1727_v0  ;;  %v1885_v35 = vsel %vm1881_vm2, %v1869_v39, %v1884_v29  ;;  %vm3784_vm3 = vcmask 293888   ;;  %v3734_v39 = vpop.permute.xlu1 %3733 }
 0x293   :  { %v6544_v63 = vmul.u32.u64.low %v1895_v32, %v1894_v59  ;;  %v6545_v15 = vmul.u32.u64.high %v1895_v32, %v1894_v59, %v6544_v63  ;;  %v6547_v22 = vmul.u32.u64.low %v1895_v32, %v1890_v41  ;;  %v6548_v44 = vmul.u32.u64.high %v1895_v32, %v1890_v41, %v6547_v22 }
 0x294   :  { %vm3869_vm6 = vcmp.lt.s32.totalorder %v3868_v34, 0  ;;  %v3769_v47 = vsel %vm3767_vm4, %v6980_v23, %v6466_v61  ;;  %v3768_v46 = vsel %vm3767_vm4, %v6981_v26, %v6470_v3  ;;  %v3771_v1 = vsel %vm3767_vm4, %v6982_v11, %v3726_v18 }
 0x295   :  { %v2022_v8 = vsel %vm3869_vm6, 0, %v3868_v34  ;;  %v1886_v48 = vsel %vm1880_vm10, %v1883_v19, %v1885_v35  ;;  %3786 = vst.msk [vmem:[%s6694_s2 + $0x8] sm:$0xff] %vm3784_vm3, %v3769_v47  ;;  %3785 = vst.msk [vmem:[%s6694_s2] sm:$0xff] %vm3784_vm3, %v3768_v46  ;;  %v3770_v61 = vsel %vm3767_vm4, %v5409_v28, %v3724_v7  ;;  %vm1904_vm11 = vc.u32 %v6545_v15, %v6547_v22  ;;  %v6986_v46 = vld [vmem:[#allocation23_spill] sm:$0xff] }
 0x296   :  { %v2023_v54 = vsub.s32 32, %v2022_v8  ;;  %v2027_v53 = vsub.s32 4294967266, %v2022_v8  ;;  %3788 = vst.msk [vmem:[%s6694_s2 + $0x18] sm:$0xff] %vm3784_vm3, %v3771_v1  ;;  %v2024_v3 = vshll.u32 %v6492_v49, %v2022_v8  ;;  %3787 = vst.msk [vmem:[%s6694_s2 + $0x10] sm:$0xff] %vm3784_vm3, %v3770_v61  ;;  %v3773_v18 = vsel %vm3767_vm4, %v5542_v9, %v3730_v56  ;;  %v6984_v49 = vld [vmem:[#allocation29_spill] sm:$0xff] }
 0x297   :  { %v3772_v21 = vsel %vm3767_vm4, %v6983_v60, %v3728_v57  ;;  %v1905_v28 = vadd.s32 1, %v6548_v44  ;;  %3790 = vst.msk [vmem:[%s6694_s2 + $0x28] sm:$0xff] %vm3784_vm3, %v3773_v18  ;;  %v3775_v9 = vsel %vm3767_vm4, %v6984_v49, %v3734_v39  ;;  %v1733_v7 = vand.u32 3, %v6480_v16 }
 0x298   :  { %v2025_v52 = vshrl.u32 %v2007_v40, %v2023_v54  ;;  %v2028_v42 = vadd.s32 127, %v2027_v53  ;;  %3789 = vst.msk [vmem:[%s6694_s2 + $0x20] sm:$0xff] %vm3784_vm3, %v3772_v21  ;;  %v1902_v43 = vmul.u32 %v1895_v32, %v1886_v48  ;;  %3792 = vst.msk [vmem:[%s6694_s2 + $0x38] sm:$0xff] %vm3784_vm3, %v3775_v9  ;;  %v3774_v2 = vsel %vm3767_vm4, %v6985_v30, %v3732_v5 }
 0x299   :  { %v1906_v10 = vsel %vm1904_vm11, %v1905_v28, %v6548_v44  ;;  %3791 = vst.msk [vmem:[%s6694_s2 + $0x30] sm:$0xff] %vm3784_vm3, %v3774_v2  ;;  %vm3385_vm8 = vcmp.lt.s32.totalorder %v6520_v27, 2  ;;  %vm3386_vm7 = vcmp.eq.s32.totalorder %v6520_v27, 0  ;;  %vm1734_vm5 = vcmp.lt.s32.totalorder %v1733_v7, 2 }
 0x29a   :  { %v2026_v37 = vor.u32 %v2025_v52, %v2024_v3  ;;  %v2029_v45 = vshll.u32 %v2028_v42, 23  ;;  %v1907_v16 = vadd.s32 %v1906_v10, %v1902_v43  ;;  %vm3389_vm12 = vcmp.eq.s32.totalorder %v6520_v27, 2 }
 0x29b   :  { %v4063_v62 = vpop.eup %4062  ;;  %vm1738_vm1 = vcmp.eq.s32.totalorder %v1733_v7, 2  ;;  %vm1735_vm9 = vcmp.eq.s32.totalorder %v1733_v7, 0  ;;  %v2037_v59 = vsub.s32 4, %v6476_v17  ;;  %vm1731_vm15 = vweird.f32 %v6970_v31 }
 0x29c   :  { %v2030_v25 = vor.u32 4788187, %v2029_v45  ;;  %v4065_v20 = vpop.eup %4064  ;;  %v1739_v24 = vxor.u32 2147483648, %v4063_v62  ;;  %v1908_v40 = vadd.s32 536870912, %v1907_v16  ;;  %v2033_v56 = vcvt.s32.f32 %v2026_v37 }
 0x29d   :  { %v1736_v13 = vxor.u32 2147483648, %v4065_v20  ;;  %vm1953_vm13 = vcmp.lt.s32.totalorder %v6973_v50, 0  ;;  %vm1952_vm14 = vcmp.le.f32.partialorder %v1951_v38, 0.7853982  ;;  %v1903_v5 = vadd.s32 %v6547_v22, %v6545_v15 }
 0x29e   :  { %v2031_v14 = vand.u32 2147483647, %v2030_v25  ;;  %v1740_v58 = vsel %vm1738_vm1, %v1739_v24, %v4065_v20  ;;  %v3391_v55 = vsel %vm3389_vm12, %v1739_v24, %v4065_v20  ;;  %v6615_v29 = vshrl.u32 %v1908_v40, 30 }
 0x29f   :  { %v1737_v57 = vsel %vm1735_vm9, %v4063_v62, %v1736_v13  ;;  %v3388_v0 = vsel %vm3386_vm7, %v4063_v62, %v1736_v13  ;;  %v2038_v23 = vsel %vm1953_vm13, %v2037_v59, %v6476_v17  ;;  %v3738_v26 = vpop.permute.xlu1 %3737  ;;  %vm1849_vm12 = vcmp.lt.s32.totalorder %v6979_v36, 0 }
 0x2a0   :  { %v2034_v41 = vmul.f32 %v2033_v56, %v2031_v14  ;;  %v1741_v32 = vsel %vm1734_vm5, %v1737_v57, %v1740_v58  ;;  %v3392_v34 = vsel %vm3385_vm8, %v3388_v0, %v3391_v55  ;;  %v1910_v19 = vshll.u32 %v6615_v29, 30 }
 0x2a1   :  { %v6625_v35 = vsel %vm1731_vm15, nan, %v1741_v32  ;;  %v3393_v63 = vsel %vm1731_vm15, nan, %v3392_v34  ;;  %v3777_v11 = vsel %vm3767_vm4, %v6986_v46, %v3738_v26  ;;  %v2040_v1 = vsel %vm1952_vm14, 0, %v2038_v23 }
 0x2a2   :  { %v2035_v44 = vxor.u32 2147483648, %v2034_v41  ;;  %3743 = vrot.lane.b32.xlu0 %v3393_v63, %s4085_s0  ;;  %v1911_v8 = vsub.s32 %v1907_v16, %v1910_v19  ;;  %3794 = vst.msk [vmem:[%s6694_s2 + $0x48] sm:$0xff] %vm3784_vm3, %v3777_v11  ;;  %v2044_v54 = vadd.s32 3, %v2040_v1  ;;  %v3693_v17 = vand.u32 3, %v2040_v1 }
 0x2a3   :  { %vm2043_vm5 = vweird.f32 %v6973_v50  ;;  %v1933_v40 = vsub.s32 4, %v6615_v29  ;;  %vm1848_vm1 = vcmp.le.f32.partialorder %v1847_v12, 0.7853982 }
 0x2a4   :  { %v2036_v31 = vsel %vm1953_vm13, %v2035_v44, %v2034_v41  ;;  %v1913_v47 = vsub.s32 0, %v1911_v8  ;;  %v2045_v48 = vand.u32 3, %v2044_v54  ;;  %vm3695_vm2 = vcmp.eq.s32.totalorder %v3693_v17, 0 }
 0x2a5   :  { %v2039_v27 = vsel %vm1952_vm14, %v6973_v50, %v2036_v31  ;;  %vm3698_vm11 = vcmp.eq.s32.totalorder %v3693_v17, 2  ;;  %vm3694_vm7 = vcmp.lt.s32.totalorder %v3693_v17, 2  ;;  %v1934_v50 = vsel %vm1849_vm12, %v1933_v40, %v6615_v29 }
 0x2a6   :  { %4066 = vcosq.f32 %v2039_v27  ;;  %v3863_v39 = vmin.u32 %v1913_v47, %v1911_v8  ;;  %vm2047_vm10 = vcmp.eq.s32.totalorder %v2045_v48, 0  ;;  %vm2050_vm6 = vcmp.eq.s32.totalorder %v2045_v48, 2 }
 0x2a7   :  { %4068 = vsinq.f32 %v2039_v27  ;;  %vm2046_vm8 = vcmp.lt.s32.totalorder %v2045_v48, 2  ;;  %v1936_v57 = vsel %vm1848_vm1, 0, %v1934_v50 }
 0x2a8   :  { %v1915_v38 = vclz %v3863_v39  ;;  %v1940_v0 = vadd.s32 3, %v1936_v57  ;;  %v3590_v12 = vand.u32 3, %v1936_v57 }
 0x2aa   :  { %v3864_v53 = vadd.s32 4294967294, %v1915_v38  ;;  %v1941_v41 = vand.u32 3, %v1940_v0  ;;  %vm3595_vm15 = vcmp.eq.s32.totalorder %v3590_v12, 2  ;;  %vm3592_vm14 = vcmp.eq.s32.totalorder %v3590_v12, 0 }
 0x2ac   :  { %vm3865_vm0 = vcmp.lt.s32.totalorder %v3864_v53, 0  ;;  %vm1946_vm9 = vcmp.eq.s32.totalorder %v1941_v41, 2  ;;  %vm1943_vm13 = vcmp.eq.s32.totalorder %v1941_v41, 0 }
 0x2ad   :  { %v1918_v61 = vsel %vm3865_vm0, 0, %v3864_v53  ;;  %vm1942_vm0 = vcmp.lt.s32.totalorder %v1941_v41, 2 }
 0x2ae   :  { %v1919_v3 = vsub.s32 32, %v1918_v61  ;;  %v1923_v18 = vsub.s32 4294967266, %v1918_v61  ;;  %v1920_v42 = vshll.u32 %v1911_v8, %v1918_v61 }
 0x2b0   :  { %v4067_v60 = vpop.eup %4066  ;;  %v1921_v28 = vshrl.u32 %v1903_v5, %v1919_v3  ;;  %v1924_v49 = vadd.s32 127, %v1923_v18 }
 0x2b1   :  { %v4069_v21 = vpop.eup %4068  ;;  %v2051_v52 = vxor.u32 2147483648, %v4067_v60 }
 0x2b2   :  { %v2048_v9 = vxor.u32 2147483648, %v4069_v21  ;;  %v1922_v30 = vor.u32 %v1921_v28, %v1920_v42  ;;  %v1925_v2 = vshll.u32 %v1924_v49, 23 }
 0x2b3   :  { %v2052_v7 = vsel %vm2050_vm6, %v2051_v52, %v4069_v21  ;;  %v3700_v43 = vsel %vm3698_vm11, %v2051_v52, %v4069_v21 }
 0x2b4   :  { %v2049_v37 = vsel %vm2047_vm10, %v4067_v60, %v2048_v9  ;;  %v3697_v15 = vsel %vm3695_vm2, %v4067_v60, %v2048_v9  ;;  %v1926_v10 = vor.u32 4788187, %v1925_v2  ;;  %v1929_v20 = vcvt.s32.f32 %v1922_v30 }
 0x2b5   :  { %v2053_v22 = vsel %vm2046_vm8, %v2049_v37, %v2052_v7  ;;  %v3701_v45 = vsel %vm3694_vm7, %v3697_v15, %v3700_v43  ;;  %vm3591_vm2 = vcmp.lt.s32.totalorder %v3590_v12, 2  ;;  %vm1939_vm10 = vweird.f32 %v6979_v36 }
 0x2b6   :  { %v2054_v16 = vsel %vm2043_vm5, nan, %v2053_v22  ;;  %v3702_v62 = vsel %vm2043_vm5, nan, %v3701_v45  ;;  %v1927_v25 = vand.u32 2147483647, %v1926_v10 }
 0x2b7   :  { %3749 = vrot.lane.b32.xlu1 %v3702_v62, %s4085_s0 }
 0x2b8   :  { %v1930_v24 = vmul.f32 %v1929_v20, %v1927_v25 }
 0x2ba   :  { %v1931_v13 = vxor.u32 2147483648, %v1930_v24  ;;  %v3736_v58 = vpop.permute.xlu0 %3735 }
 0x2bb   :  { %v3776_v55 = vsel %vm3767_vm4, %v6140_v33, %v3736_v58 }
 0x2bc   :  { %v1932_v14 = vsel %vm1849_vm12, %v1931_v13, %v1930_v24  ;;  %3793 = vst.msk [vmem:[%s6694_s2 + $0x40] sm:$0xff] %vm3784_vm3, %v3776_v55 }
 0x2bd   :  { %v1935_v56 = vsel %vm1848_vm1, %v6979_v36, %v1932_v14 }
 0x2be   :  { %4070 = vcosq.f32 %v1935_v56 }
 0x2bf   :  { %4072 = vsinq.f32 %v1935_v56 }
 0x2c8   :  { %v4071_v59 = vpop.eup %4070 }
 0x2c9   :  { %v4073_v32 = vpop.eup %4072  ;;  %v1947_v29 = vxor.u32 2147483648, %v4071_v59 }
 0x2ca   :  { %v1944_v34 = vxor.u32 2147483648, %v4073_v32 }
 0x2cb   :  { %v1948_v19 = vsel %vm1946_vm9, %v1947_v29, %v4073_v32  ;;  %v3597_v33 = vsel %vm3595_vm15, %v1947_v29, %v4073_v32 }
 0x2cc   :  { %v1945_v63 = vsel %vm1943_vm13, %v4071_v59, %v1944_v34  ;;  %v3594_v44 = vsel %vm3592_vm14, %v4071_v59, %v1944_v34 }
 0x2cd   :  { %v1949_v8 = vsel %vm1942_vm0, %v1945_v63, %v1948_v19  ;;  %v3598_v31 = vsel %vm3591_vm2, %v3594_v44, %v3597_v33 }
 0x2ce   :  { %v1950_v23 = vsel %vm1939_vm10, nan, %v1949_v8  ;;  %v3599_v27 = vsel %vm1939_vm10, nan, %v3598_v31 }
 0x2cf   :  { %3747 = vrot.lane.b32.xlu0 %v3599_v27, %s4085_s0 }
 0x2d0   :  { %v3742_v47 = vpop.permute.xlu1 %3741 }
 0x2d1   :  { %v3779_v26 = vsel %vm3767_vm4, %v6250_v4, %v3742_v47 }
 0x2d2   :  { %3796 = vst.msk [vmem:[%s6694_s2 + $0x58] sm:$0xff] %vm3784_vm3, %v3779_v26 }
 0x2e6   :  { %v3740_v46 = vpop.permute.xlu0 %3739 }
 0x2e7   :  { %v3778_v11 = vsel %vm3767_vm4, %v6374_v51, %v3740_v46 }
 0x2e8   :  { %3795 = vst.msk [vmem:[%s6694_s2 + $0x50] sm:$0xff] %vm3784_vm3, %v3778_v11 }
 0x2ff   :  { %v3746_v36 = vpop.permute.xlu1 %3745 }
 0x300   :  { %v3781_v1 = vsel %vm3767_vm4, %v6504_v6, %v3746_v36 }
 0x301   :  { %3798 = vst.msk [vmem:[%s6694_s2 + $0x68] sm:$0xff] %vm3784_vm3, %v3781_v1 }
 0x314   :  { %v3744_v4 = vpop.permute.xlu0 %3743 }
 0x315   :  { %v3780_v39 = vsel %vm3767_vm4, %v6625_v35, %v3744_v4 }
 0x316   :  { %3797 = vst.msk [vmem:[%s6694_s2 + $0x60] sm:$0xff] %vm3784_vm3, %v3780_v39 }
 0x329   :  { %v3750_v51 = vpop.permute.xlu1 %3749 }
 0x32a   :  { %v3783_v38 = vsel %vm3767_vm4, %v2054_v16, %v3750_v51 }
 0x32b   :  { %3800 = vst.msk [vmem:[%s6694_s2 + $0x78] sm:$0xff] %vm3784_vm3, %v3783_v38 }
 0x341   :  { %v3748_v6 = vpop.permute.xlu0 %3747 }
 0x342   :  { %v3782_v54 = vsel %vm3767_vm4, %v1950_v23, %v3748_v6 }
 0x343   :  { %3799 = vst.msk [vmem:[%s6694_s2 + $0x70] sm:$0xff] %vm3784_vm3, %v3782_v54 }

</bundles_post_ra>
